<compile_context>
chip_gen: v6e
topology: v6e:2x2x1
jax: 0.10.0
libtpu: 0.0.40
codegen_flags: <defaults>
</compile_context>

<pallas_src>
import functools

import jax
import jax.numpy as jnp
from jax import lax
from jax.experimental import pallas as pl
from jax.experimental.pallas import tpu as pltpu

_LANE = 128
_SUBLANE = 8


def _round_up(x, m):
    return (x + m - 1) // m * m


def _spp_kernel(x_ref, w1_ref, s1_ref, b1_ref, w2_ref, s2_ref, b2_ref,
                o_ref, pad_ref, *, k, w_real, pool_dtype, bf16_sigmoid):
    # x_ref  : (1, H, Wp, Cin)  bf16, one batch element per grid step
    # w1_ref : (Cin, Cmid)      bf16 conv1 1x1 weight
    # s1/b1  : (1, Cmid)        f32 folded BN scale / bias for conv1
    # w2_ref : (4*Cmid, Cout)   bf16 conv2 1x1 weight (over concat channels)
    # s2/b2  : (1, Cout)        f32 folded BN scale / bias for conv2
    # o_ref  : (1, H, Wp, Cout) f32
    # pad_ref: VMEM scratch (H + 2r, Wp, Cmid) pool_dtype; -inf border rows
    #          for the H-axis pooling pass, interior rewritten every stage.
    _, H, Wp, Cin = x_ref.shape
    Cmid = w1_ref.shape[1]
    Cout = w2_ref.shape[1]
    r = k // 2
    neg_inf = jnp.asarray(-jnp.inf, dtype=pool_dtype)

    def silu(x):
        # x stays f32; only the EUP sigmoid runs in bf16 on v6e/v7x.
        if bf16_sigmoid:
            sg = jax.nn.sigmoid(x.astype(jnp.bfloat16)).astype(jnp.float32)
        else:
            sg = jax.nn.sigmoid(x)
        return x * sg

    # ---- conv1 (1x1) + folded BN + SiLU  (bf16 MXU operands, f32 acc) ----
    x2 = x_ref[0].reshape(H * Wp, Cin)
    h = jnp.dot(x2, w1_ref[...], preferred_element_type=jnp.float32)
    h = h * s1_ref[0] + b1_ref[0]
    a = silu(h).reshape(H, Wp, Cmid).astype(pool_dtype)

    # Padded W columns must act as -inf for the pooling windows of the real
    # columns.  Masking once (before the first pool stage) is sufficient:
    # any finite value a later stage leaks back from a padded column is the
    # max over a subset of real columns that are already inside the real
    # column's own window, so real-column results are unchanged.
    if Wp != w_real:
        col = lax.broadcasted_iota(jnp.int32, (1, Wp, Cmid), 1)
        a = jnp.where(col < w_real, a, neg_inf)

    # -inf border rows of the H-pass scratch (interior rewritten per stage).
    # Re-initialised every grid step -- only 2*r rows, and it keeps the
    # kernel correct if the batch grid axis is split across TensorCores.
    border = jnp.full((r, Wp, Cmid), -jnp.inf, pad_ref.dtype)
    pad_ref[0:r, :, :] = border
    pad_ref[H + r:H + 2 * r, :, :] = border

    # Masks for the in-register W pass (hoisted; one (1, Wp, Cmid) slab each).
    w_idx = lax.broadcasted_iota(jnp.int32, (1, Wp, Cmid), 1)
    masks = [(w_idx >= d, w_idx < Wp - d) for d in range(1, r + 1)]

    def pool(v):
        # Separable k x k, stride-1, "same"-padded max pool (pad value -inf,
        # matching MaxPool2d's implicit -inf padding).
        # (1) W pass: in-register XLU rolls + masked -inf; no unaligned
        #     sublane reads of VMEM.
        out = v
        for d in range(1, r + 1):
            m_l, m_r = masks[d - 1]
            right = jnp.where(m_r, pltpu.roll(v, Wp - d, axis=1), neg_inf)
            left = jnp.where(m_l, pltpu.roll(v, d, axis=1), neg_inf)
            out = jnp.maximum(out, jnp.maximum(left, right))
        # (2) H pass: through the -inf-bordered scratch; slices move only
        #     along the untiled leading axis, so every read is tile-aligned.
        pad_ref[r:r + H, :, :] = out
        res = out                      # center tap stays in-register
        for dy in range(k):
            if dy == r:
                continue
            res = jnp.maximum(res, pad_ref[dy:dy + H, :, :])
        return res

    # ---- conv2 (1x1) over concat([a, y1, y2, y3], C), fused as two
    # K=2*Cmid matmuls ([a,y1] then [y2,y3]) interleaved with the pool
    # stages: at most ~two activation maps live at once, and the f32 h2
    # accumulator is read-modify-written only once. -------------------------
    def half(u, v, i):
        cat = jnp.concatenate([u, v], axis=-1).reshape(H * Wp, 2 * Cmid)
        w = w2_ref[2 * i * Cmid:2 * (i + 1) * Cmid, :]   # aligned static slice
        return jnp.dot(cat.astype(w2_ref.dtype), w,
                       preferred_element_type=jnp.float32)

    y1 = pool(a)
    h2 = half(a, y1, 0)
    y2 = pool(y1)
    y3 = pool(y2)
    h2 = h2 + half(y2, y3, 1)

    h2 = h2 * s2_ref[0] + b2_ref[0]
    h2 = silu(h2)
    # TODO(synk): store bf16 here if the downstream DarkNet consumer accepts
    # it (halves the output writeback DMA).
    o_ref[0] = h2.reshape(H, Wp, Cout).astype(o_ref.dtype)


def _compute_dtype():
    """bf16 pool/EUP chain on v6e/v7x; f32 on v5e and older (no bf16 VPU/EUP)."""
    try:
        kind = jax.devices()[0].device_kind.lower()
    except Exception:
        return jnp.float32
    if "tpu" not in kind:
        return jnp.float32
    for tag in ("v2", "v3", "v4", "v5"):
        if tag in kind:
            return jnp.float32
    return jnp.bfloat16


def _vmem_limit_bytes(est):
    """Per-generation scoped-VMEM limit with ~15% headroom below physical."""
    try:
        cap = int(pltpu.get_tpu_info().vmem_capacity_bytes)
    except Exception:
        kind = ""
        try:
            kind = jax.devices()[0].device_kind.lower()
        except Exception:
            pass
        cap = 64 * 2**20 if "7" in kind else 128 * 2**20
    ceiling = int(cap * 0.85)
    return max(16 * 2**20, min(ceiling, max(32 * 2**20, 2 * est)))


def spp_forward(x, params, k=5):
    """x: (N, H, W, Cin) float32 NHWC. Returns (N, H, W, Cout) float32."""
    w1, s1, b1, w2, s2, b2 = params
    N, H, W, Cin = x.shape
    Cmid = w1.shape[1]
    Cout = w2.shape[1]
    assert w2.shape[0] == 4 * Cmid
    r = k // 2

    cin_p = _round_up(Cin, _LANE)
    cmid_p = _round_up(Cmid, _LANE)
    cout_p = _round_up(Cout, _LANE)
    w_p = _round_up(W, _SUBLANE)   # keep (H*W, C) reshapes relayout-free

    pool_dtype = _compute_dtype()
    bf16_sigmoid = pool_dtype == jnp.bfloat16

    # Zero-pad channel dims to lane multiples (mathematically neutral: padded
    # mid channels produce SiLU(0)=0 activations and zero conv2 contributions;
    # padded output channels / padded W columns are sliced off below).
    # TODO(synk): accept pre-padded bf16 NHWC activations and pre-folded bf16
    # weights from the producer to drop this per-call pad+cast HBM pass.
    xp = jnp.pad(x, ((0, 0), (0, 0), (0, w_p - W), (0, cin_p - Cin)))
    xp = xp.astype(jnp.bfloat16)
    w1p = jnp.pad(w1, ((0, cin_p - Cin), (0, cmid_p - Cmid))).astype(jnp.bfloat16)
    s1p = jnp.pad(s1, ((0, 0), (0, cmid_p - Cmid)))
    b1p = jnp.pad(b1, ((0, 0), (0, cmid_p - Cmid)))
    w2p = jnp.pad(w2.reshape(4, Cmid, Cout),
                  ((0, 0), (0, cmid_p - Cmid), (0, cout_p - Cout)))
    w2p = w2p.reshape(4 * cmid_p, cout_p).astype(jnp.bfloat16)
    s2p = jnp.pad(s2, ((0, 0), (0, cout_p - Cout)))
    b2p = jnp.pad(b2, ((0, 0), (0, cout_p - Cout)))

    pool_bytes = jnp.dtype(pool_dtype).itemsize
    est = (2 * H * w_p * cin_p * 2                        # x tile (bf16), 2-buf
           + 2 * H * w_p * cout_p * 4                     # out tile (f32), 2-buf
           + 2 * (cin_p * cmid_p + 4 * cmid_p * cout_p) * 2   # weights (bf16)
           + (H + 2 * r) * w_p * cmid_p * pool_bytes      # pool scratch
           + 4 * H * w_p * cmid_p * pool_bytes            # live activation maps
           + 2 * H * w_p * cout_p * 4)                    # h2 accumulator
    vmem_limit = _vmem_limit_bytes(est)

    flops = 2 * N * H * w_p * (cin_p * cmid_p + 4 * cmid_p * cout_p)
    transcendentals = N * H * w_p * (cmid_p + cout_p)
    bytes_accessed = int(xp.size * 2 + w1p.size * 2 + w2p.size * 2
                         + (s1p.size + b1p.size + s2p.size + b2p.size) * 4
                         + N * H * w_p * cout_p * 4)

    kernel = functools.partial(_spp_kernel, k=k, w_real=W,
                               pool_dtype=pool_dtype,
                               bf16_sigmoid=bf16_sigmoid)
    # TODO(synk): add an H-strip "parallel" grid axis (strip height a multiple
    # of 8, 3*r-row input halo) to feed both v7x TensorCores and bound the
    # per-step VMEM footprint for larger-than-P5 feature maps.
    out = pl.pallas_call(
        kernel,
        out_shape=jax.ShapeDtypeStruct((N, H, w_p, cout_p), jnp.float32),
        grid_spec=pltpu.PrefetchScalarGridSpec(
            num_scalar_prefetch=0,
            grid=(N,),
            in_specs=[
                pl.BlockSpec((1, H, w_p, cin_p), lambda n: (n, 0, 0, 0)),
                # TODO(synk): pipeline_mode=pl.Buffered(1) on these constant
                # weight/scale specs would drop one VMEM buffer copy on v7x;
                # left default-buffered for portability across jax versions.
                pl.BlockSpec((cin_p, cmid_p), lambda n: (0, 0)),
                pl.BlockSpec((1, cmid_p), lambda n: (0, 0)),
                pl.BlockSpec((1, cmid_p), lambda n: (0, 0)),
                pl.BlockSpec((4 * cmid_p, cout_p), lambda n: (0, 0)),
                pl.BlockSpec((1, cout_p), lambda n: (0, 0)),
                pl.BlockSpec((1, cout_p), lambda n: (0, 0)),
            ],
            out_specs=pl.BlockSpec((1, H, w_p, cout_p), lambda n: (n, 0, 0, 0)),
            scratch_shapes=[pltpu.VMEM((H + 2 * r, w_p, cmid_p), pool_dtype)],
        ),
        compiler_params=pltpu.CompilerParams(
            dimension_semantics=("parallel",),
            vmem_limit_bytes=vmem_limit),
        cost_estimate=pl.CostEstimate(flops=flops,
                                      transcendentals=transcendentals,
                                      bytes_accessed=bytes_accessed),
    )(xp, w1p, s1p, b1p, w2p, s2p, b2p)
    return out[:, :, :W, :Cout]


def make_params(key, in_ch, out_ch, eps=1e-3):
    """Deterministic synthetic weights; BN (eval mode) folded into scale/bias."""
    c_mid = in_ch // 2
    ks = jax.random.split(key, 10)
    w1 = 0.2 * jax.random.normal(ks[0], (in_ch, c_mid), jnp.float32)
    g1 = 1.0 + 0.1 * jax.random.normal(ks[1], (c_mid,), jnp.float32)
    be1 = 0.1 * jax.random.normal(ks[2], (c_mid,), jnp.float32)
    m1 = 0.1 * jax.random.normal(ks[3], (c_mid,), jnp.float32)
    v1 = jax.random.uniform(ks[4], (c_mid,), jnp.float32, 0.5, 1.5)
    w2 = 0.2 * jax.random.normal(ks[5], (2 * in_ch, out_ch), jnp.float32)
    g2 = 1.0 + 0.1 * jax.random.normal(ks[6], (out_ch,), jnp.float32)
    be2 = 0.1 * jax.random.normal(ks[7], (out_ch,), jnp.float32)
    m2 = 0.1 * jax.random.normal(ks[8], (out_ch,), jnp.float32)
    v2 = jax.random.uniform(ks[9], (out_ch,), jnp.float32, 0.5, 1.5)

    s1 = g1 / jnp.sqrt(v1 + eps)
    b1 = be1 - m1 * s1
    s2 = g2 / jnp.sqrt(v2 + eps)
    b2 = be2 - m2 * s2
    return (w1, s1[None, :], b1[None, :], w2, s2[None, :], b2[None, :])


def spp_reference(x, params, k=5):
    """Pure-JAX (XLA-only, f32 HIGHEST) reference for correctness checking."""
    w1, s1, b1, w2, s2, b2 = params
    h = jnp.einsum('nhwc,cd->nhwd', x, w1,
                   precision=lax.Precision.HIGHEST) * s1[0] + b1[0]
    h = h * jax.nn.sigmoid(h)
    r = k // 2

    def pool(v):
        return lax.reduce_window(v, -jnp.inf, lax.max,
                                 (1, k, k, 1), (1, 1, 1, 1),
                                 [(0, 0), (r, r), (r, r), (0, 0)])

    y1 = pool(h)
    y2 = pool(y1)
    y3 = pool(y2)
    cat = jnp.concatenate([h, y1, y2, y3], axis=-1)
    o = jnp.einsum('nhwc,cd->nhwd', cat, w2,
                   precision=lax.Precision.HIGHEST) * s2[0] + b2[0]
    return o * jax.nn.sigmoid(o)


if __name__ == "__main__":
    root = jax.random.PRNGKey(0)
    kx, kp, kx2 = jax.random.split(root, 3)

    in_ch, out_ch, k = 4, 8, 5
    params = make_params(kp, in_ch, out_ch)

    # Case 1: sublane-aligned spatial shape.
    N, H, W = 2, 16, 16
    x = jax.random.normal(kx, (N, H, W, in_ch), jnp.float32)
    out = jax.block_until_ready(spp_forward(x, params, k=k))
    ref = jax.block_until_ready(spp_reference(x, params, k=k))
    assert out.shape == (N, H, W, out_ch), out.shape
    # bf16 matmul operands / bf16 pool vs. f32 HIGHEST reference -> 2e-2 tol.
    assert jnp.allclose(out, ref, atol=2e-2, rtol=2e-2), (
        float(jnp.max(jnp.abs(out - ref))))

    # Case 2: W not a multiple of the sublane count (exercises the padded-W
    # -inf masking path) and odd batch.
    N2, H2, W2 = 1, 12, 20
    x2 = jax.random.normal(kx2, (N2, H2, W2, in_ch), jnp.float32)
    out2 = jax.block_until_ready(spp_forward(x2, params, k=k))
    ref2 = jax.block_until_ready(spp_reference(x2, params, k=k))
    assert out2.shape == (N2, H2, W2, out_ch), out2.shape
    assert jnp.allclose(out2, ref2, atol=2e-2, rtol=2e-2), (
        float(jnp.max(jnp.abs(out2 - ref2))))

    print("KERNEL_OK")
</pallas_src>

<mosaic_0001>
module attributes {stable_mosaic.version = 11 : i64} {
  func.func @_spp_kernel(%arg0: i32, %arg1: memref<1x16x16x128xbf16, #tpu.memory_space<vmem>>, %arg2: memref<128x128xbf16, #tpu.memory_space<vmem>>, %arg3: memref<1x128xf32, #tpu.memory_space<vmem>>, %arg4: memref<1x128xf32, #tpu.memory_space<vmem>>, %arg5: memref<512x128xbf16, #tpu.memory_space<vmem>>, %arg6: memref<1x128xf32, #tpu.memory_space<vmem>>, %arg7: memref<1x128xf32, #tpu.memory_space<vmem>>, %arg8: memref<1x16x16x128xf32, #tpu.memory_space<vmem>>, %arg9: memref<20x16x128xf32, #tpu.memory_space<vmem>>) attributes {dimension_semantics = [#tpu.dimension_semantics<parallel>], iteration_bounds = array<i64: 2>, scalar_prefetch = 0 : i64, scratch_operands = 1 : i64, tpu.core_type = #tpu.core_type<tc>, window_params = [{transform_indices = @transform_0, window_bounds = array<i64: 1, 16, 16, 128>}, {pipeline_mode = #tpu.pipeline_mode<synchronous>, transform_indices = @transform_1, window_bounds = array<i64: 128, 128>}, {pipeline_mode = #tpu.pipeline_mode<synchronous>, transform_indices = @transform_2, window_bounds = array<i64: 1, 128>}, {pipeline_mode = #tpu.pipeline_mode<synchronous>, transform_indices = @transform_3, window_bounds = array<i64: 1, 128>}, {pipeline_mode = #tpu.pipeline_mode<synchronous>, transform_indices = @transform_4, window_bounds = array<i64: 512, 128>}, {pipeline_mode = #tpu.pipeline_mode<synchronous>, transform_indices = @transform_5, window_bounds = array<i64: 1, 128>}, {pipeline_mode = #tpu.pipeline_mode<synchronous>, transform_indices = @transform_6, window_bounds = array<i64: 1, 128>}, {transform_indices = @transform_7, window_bounds = array<i64: 1, 16, 16, 128>}]} {
    %c0 = arith.constant 0 : index
    %c0_0 = arith.constant 0 : index
    %c0_1 = arith.constant 0 : index
    %c0_2 = arith.constant 0 : index
    %0 = vector.load %arg1[%c0, %c0_0, %c0_1, %c0_2] : memref<1x16x16x128xbf16, #tpu.memory_space<vmem>>, vector<1x16x16x128xbf16>
    %1 = vector.shape_cast %0 : vector<1x16x16x128xbf16> to vector<16x16x128xbf16>
    %2 = vector.shape_cast %1 : vector<16x16x128xbf16> to vector<256x128xbf16>
    %c0_3 = arith.constant 0 : index
    %c0_4 = arith.constant 0 : index
    %3 = vector.load %arg2[%c0_3, %c0_4] : memref<128x128xbf16, #tpu.memory_space<vmem>>, vector<128x128xbf16>
    %cst = arith.constant dense<0.000000e+00> : vector<256x128xf32>
    %4 = tpu.matmul %2, %3, %cst {dimension_numbers = #tpu.dot_dimension_numbers<[1], [0], [0], [1], [0, 0, 1, 1], [], []>} : vector<256x128xbf16>, vector<128x128xbf16>, vector<256x128xf32> -> vector<256x128xf32>
    %c0_5 = arith.constant 0 : index
    %c0_6 = arith.constant 0 : index
    %5 = vector.load %arg3[%c0_5, %c0_6] : memref<1x128xf32, #tpu.memory_space<vmem>>, vector<1x128xf32>
    %6 = vector.shape_cast %5 : vector<1x128xf32> to vector<128xf32>
    %7 = vector.shape_cast %6 : vector<128xf32> to vector<1x128xf32>
    %8 = vector.broadcast %7 : vector<1x128xf32> to vector<256x128xf32>
    %9 = arith.mulf %4, %8 : vector<256x128xf32>
    %c0_7 = arith.constant 0 : index
    %c0_8 = arith.constant 0 : index
    %10 = vector.load %arg4[%c0_7, %c0_8] : memref<1x128xf32, #tpu.memory_space<vmem>>, vector<1x128xf32>
    %11 = vector.shape_cast %10 : vector<1x128xf32> to vector<128xf32>
    %12 = vector.shape_cast %11 : vector<128xf32> to vector<1x128xf32>
    %13 = vector.broadcast %12 : vector<1x128xf32> to vector<256x128xf32>
    %14 = arith.addf %9, %13 : vector<256x128xf32>
    %15 = arith.negf %14 : vector<256x128xf32>
    %16 = math.exp %15 : vector<256x128xf32>
    %cst_9 = arith.constant 1.000000e+00 : f32
    %17 = vector.broadcast %cst_9 : f32 to vector<256x128xf32>
    %18 = arith.addf %17, %16 : vector<256x128xf32>
    %19 = arith.divf %17, %18 : vector<256x128xf32>
    %20 = arith.mulf %14, %19 : vector<256x128xf32>
    %21 = vector.shape_cast %20 : vector<256x128xf32> to vector<16x16x128xf32>
    %cst_10 = arith.constant 0xFF800000 : f32
    %22 = vector.broadcast %cst_10 : f32 to vector<2x16x128xf32>
    %c0_11 = arith.constant 0 : index
    %c0_12 = arith.constant 0 : index
    %c0_13 = arith.constant 0 : index
    %23 = vector.load %arg9[%c0_11, %c0_12, %c0_13] : memref<20x16x128xf32, #tpu.memory_space<vmem>>, vector<2x16x128xf32>
    tpu.vector_store %arg9[%c0_11, %c0_12, %c0_13], %22 {strides = array<i32>} : memref<20x16x128xf32, #tpu.memory_space<vmem>>, vector<2x16x128xf32>,
    %c18 = arith.constant 18 : index
    %c0_14 = arith.constant 0 : index
    %c0_15 = arith.constant 0 : index
    %24 = vector.load %arg9[%c18, %c0_14, %c0_15] : memref<20x16x128xf32, #tpu.memory_space<vmem>>, vector<2x16x128xf32>
    tpu.vector_store %arg9[%c18, %c0_14, %c0_15], %22 {strides = array<i32>} : memref<20x16x128xf32, #tpu.memory_space<vmem>>, vector<2x16x128xf32>,
    %25 = tpu.iota {dimensions = array<i32: 1>} : vector<1x16x128xi32>
    %c1_i32 = arith.constant 1 : i32
    %26 = vector.broadcast %c1_i32 : i32 to vector<1x16x128xi32>
    %27 = arith.cmpi sge, %25, %26 : vector<1x16x128xi32>
    %c15_i32 = arith.constant 15 : i32
    %28 = vector.broadcast %c15_i32 : i32 to vector<1x16x128xi32>
    %29 = arith.cmpi slt, %25, %28 : vector<1x16x128xi32>
    %c2_i32 = arith.constant 2 : i32
    %30 = vector.broadcast %c2_i32 : i32 to vector<1x16x128xi32>
    %31 = arith.cmpi sge, %25, %30 : vector<1x16x128xi32>
    %c14_i32 = arith.constant 14 : i32
    %32 = vector.broadcast %c14_i32 : i32 to vector<1x16x128xi32>
    %33 = arith.cmpi slt, %25, %32 : vector<1x16x128xi32>
    %c15_i32_16 = arith.constant 15 : i32
    %34 = tpu.dynamic_rotate %21 by %c15_i32_16 dim 1 : vector<16x16x128xf32>, i32 -> vector<16x16x128xf32>
    %cst_17 = arith.constant 0xFF800000 : f32
    %35 = vector.shape_cast %29 : vector<1x16x128xi1> to vector<1x16x128xi1>
    %36 = vector.broadcast %35 : vector<1x16x128xi1> to vector<16x16x128xi1>
    %37 = vector.broadcast %cst_17 : f32 to vector<16x16x128xf32>
    %38 = arith.select %36, %34, %37 : vector<16x16x128xi1>, vector<16x16x128xf32>
    %c1_i32_18 = arith.constant 1 : i32
    %39 = tpu.dynamic_rotate %21 by %c1_i32_18 dim 1 : vector<16x16x128xf32>, i32 -> vector<16x16x128xf32>
    %cst_19 = arith.constant 0xFF800000 : f32
    %40 = vector.shape_cast %27 : vector<1x16x128xi1> to vector<1x16x128xi1>
    %41 = vector.broadcast %40 : vector<1x16x128xi1> to vector<16x16x128xi1>
    %42 = vector.broadcast %cst_19 : f32 to vector<16x16x128xf32>
    %43 = arith.select %41, %39, %42 : vector<16x16x128xi1>, vector<16x16x128xf32>
    %44 = arith.maximumf %43, %38 : vector<16x16x128xf32>
    %45 = arith.maximumf %21, %44 : vector<16x16x128xf32>
    %c14_i32_20 = arith.constant 14 : i32
    %46 = tpu.dynamic_rotate %21 by %c14_i32_20 dim 1 : vector<16x16x128xf32>, i32 -> vector<16x16x128xf32>
    %cst_21 = arith.constant 0xFF800000 : f32
    %47 = vector.shape_cast %33 : vector<1x16x128xi1> to vector<1x16x128xi1>
    %48 = vector.broadcast %47 : vector<1x16x128xi1> to vector<16x16x128xi1>
    %49 = vector.broadcast %cst_21 : f32 to vector<16x16x128xf32>
    %50 = arith.select %48, %46, %49 : vector<16x16x128xi1>, vector<16x16x128xf32>
    %c2_i32_22 = arith.constant 2 : i32
    %51 = tpu.dynamic_rotate %21 by %c2_i32_22 dim 1 : vector<16x16x128xf32>, i32 -> vector<16x16x128xf32>
    %cst_23 = arith.constant 0xFF800000 : f32
    %52 = vector.shape_cast %31 : vector<1x16x128xi1> to vector<1x16x128xi1>
    %53 = vector.broadcast %52 : vector<1x16x128xi1> to vector<16x16x128xi1>
    %54 = vector.broadcast %cst_23 : f32 to vector<16x16x128xf32>
    %55 = arith.select %53, %51, %54 : vector<16x16x128xi1>, vector<16x16x128xf32>
    %56 = arith.maximumf %55, %50 : vector<16x16x128xf32>
    %57 = arith.maximumf %45, %56 : vector<16x16x128xf32>
    %c2 = arith.constant 2 : index
    %c0_24 = arith.constant 0 : index
    %c0_25 = arith.constant 0 : index
    %58 = vector.load %arg9[%c2, %c0_24, %c0_25] : memref<20x16x128xf32, #tpu.memory_space<vmem>>, vector<16x16x128xf32>
    tpu.vector_store %arg9[%c2, %c0_24, %c0_25], %57 {strides = array<i32>} : memref<20x16x128xf32, #tpu.memory_space<vmem>>, vector<16x16x128xf32>,
    %c0_26 = arith.constant 0 : index
    %c0_27 = arith.constant 0 : index
    %c0_28 = arith.constant 0 : index
    %59 = vector.load %arg9[%c0_26, %c0_27, %c0_28] : memref<20x16x128xf32, #tpu.memory_space<vmem>>, vector<16x16x128xf32>
    %60 = arith.maximumf %57, %59 : vector<16x16x128xf32>
    %c1 = arith.constant 1 : index
    %c0_29 = arith.constant 0 : index
    %c0_30 = arith.constant 0 : index
    %61 = vector.load %arg9[%c1, %c0_29, %c0_30] : memref<20x16x128xf32, #tpu.memory_space<vmem>>, vector<16x16x128xf32>
    %62 = arith.maximumf %60, %61 : vector<16x16x128xf32>
    %c3 = arith.constant 3 : index
    %c0_31 = arith.constant 0 : index
    %c0_32 = arith.constant 0 : index
    %63 = vector.load %arg9[%c3, %c0_31, %c0_32] : memref<20x16x128xf32, #tpu.memory_space<vmem>>, vector<16x16x128xf32>
    %64 = arith.maximumf %62, %63 : vector<16x16x128xf32>
    %c4 = arith.constant 4 : index
    %c0_33 = arith.constant 0 : index
    %c0_34 = arith.constant 0 : index
    %65 = vector.load %arg9[%c4, %c0_33, %c0_34] : memref<20x16x128xf32, #tpu.memory_space<vmem>>, vector<16x16x128xf32>
    %66 = arith.maximumf %64, %65 : vector<16x16x128xf32>
    %67 = tpu.concatenate %21, %66 in 2 : vector<16x16x128xf32>, vector<16x16x128xf32> -> vector<16x16x256xf32>
    %68 = vector.shape_cast %67 : vector<16x16x256xf32> to vector<256x256xf32>
    %c0_35 = arith.constant 0 : index
    %c0_36 = arith.constant 0 : index
    %69 = vector.load %arg5[%c0_35, %c0_36] : memref<512x128xbf16, #tpu.memory_space<vmem>>, vector<256x128xbf16>
    %70 = arith.truncf %68 : vector<256x256xf32> to vector<256x256xbf16>
    %cst_37 = arith.constant dense<0.000000e+00> : vector<256x128xf32>
    %71 = tpu.matmul %70, %69, %cst_37 {dimension_numbers = #tpu.dot_dimension_numbers<[1], [0], [0], [1], [0, 0, 1, 1], [], []>} : vector<256x256xbf16>, vector<256x128xbf16>, vector<256x128xf32> -> vector<256x128xf32>
    %c15_i32_38 = arith.constant 15 : i32
    %72 = tpu.dynamic_rotate %66 by %c15_i32_38 dim 1 : vector<16x16x128xf32>, i32 -> vector<16x16x128xf32>
    %cst_39 = arith.constant 0xFF800000 : f32
    %73 = vector.shape_cast %29 : vector<1x16x128xi1> to vector<1x16x128xi1>
    %74 = vector.broadcast %73 : vector<1x16x128xi1> to vector<16x16x128xi1>
    %75 = vector.broadcast %cst_39 : f32 to vector<16x16x128xf32>
    %76 = arith.select %74, %72, %75 : vector<16x16x128xi1>, vector<16x16x128xf32>
    %c1_i32_40 = arith.constant 1 : i32
    %77 = tpu.dynamic_rotate %66 by %c1_i32_40 dim 1 : vector<16x16x128xf32>, i32 -> vector<16x16x128xf32>
    %cst_41 = arith.constant 0xFF800000 : f32
    %78 = vector.shape_cast %27 : vector<1x16x128xi1> to vector<1x16x128xi1>
    %79 = vector.broadcast %78 : vector<1x16x128xi1> to vector<16x16x128xi1>
    %80 = vector.broadcast %cst_41 : f32 to vector<16x16x128xf32>
    %81 = arith.select %79, %77, %80 : vector<16x16x128xi1>, vector<16x16x128xf32>
    %82 = arith.maximumf %81, %76 : vector<16x16x128xf32>
    %83 = arith.maximumf %66, %82 : vector<16x16x128xf32>
    %c14_i32_42 = arith.constant 14 : i32
    %84 = tpu.dynamic_rotate %66 by %c14_i32_42 dim 1 : vector<16x16x128xf32>, i32 -> vector<16x16x128xf32>
    %cst_43 = arith.constant 0xFF800000 : f32
    %85 = vector.shape_cast %33 : vector<1x16x128xi1> to vector<1x16x128xi1>
    %86 = vector.broadcast %85 : vector<1x16x128xi1> to vector<16x16x128xi1>
    %87 = vector.broadcast %cst_43 : f32 to vector<16x16x128xf32>
    %88 = arith.select %86, %84, %87 : vector<16x16x128xi1>, vector<16x16x128xf32>
    %c2_i32_44 = arith.constant 2 : i32
    %89 = tpu.dynamic_rotate %66 by %c2_i32_44 dim 1 : vector<16x16x128xf32>, i32 -> vector<16x16x128xf32>
    %cst_45 = arith.constant 0xFF800000 : f32
    %90 = vector.shape_cast %31 : vector<1x16x128xi1> to vector<1x16x128xi1>
    %91 = vector.broadcast %90 : vector<1x16x128xi1> to vector<16x16x128xi1>
    %92 = vector.broadcast %cst_45 : f32 to vector<16x16x128xf32>
    %93 = arith.select %91, %89, %92 : vector<16x16x128xi1>, vector<16x16x128xf32>
    %94 = arith.maximumf %93, %88 : vector<16x16x128xf32>
    %95 = arith.maximumf %83, %94 : vector<16x16x128xf32>
    %c2_46 = arith.constant 2 : index
    %c0_47 = arith.constant 0 : index
    %c0_48 = arith.constant 0 : index
    %96 = vector.load %arg9[%c2_46, %c0_47, %c0_48] : memref<20x16x128xf32, #tpu.memory_space<vmem>>, vector<16x16x128xf32>
    tpu.vector_store %arg9[%c2_46, %c0_47, %c0_48], %95 {strides = array<i32>} : memref<20x16x128xf32, #tpu.memory_space<vmem>>, vector<16x16x128xf32>,
    %c0_49 = arith.constant 0 : index
    %c0_50 = arith.constant 0 : index
    %c0_51 = arith.constant 0 : index
    %97 = vector.load %arg9[%c0_49, %c0_50, %c0_51] : memref<20x16x128xf32, #tpu.memory_space<vmem>>, vector<16x16x128xf32>
    %98 = arith.maximumf %95, %97 : vector<16x16x128xf32>
    %c1_52 = arith.constant 1 : index
    %c0_53 = arith.constant 0 : index
    %c0_54 = arith.constant 0 : index
    %99 = vector.load %arg9[%c1_52, %c0_53, %c0_54] : memref<20x16x128xf32, #tpu.memory_space<vmem>>, vector<16x16x128xf32>
    %100 = arith.maximumf %98, %99 : vector<16x16x128xf32>
    %c3_55 = arith.constant 3 : index
    %c0_56 = arith.constant 0 : index
    %c0_57 = arith.constant 0 : index
    %101 = vector.load %arg9[%c3_55, %c0_56, %c0_57] : memref<20x16x128xf32, #tpu.memory_space<vmem>>, vector<16x16x128xf32>
    %102 = arith.maximumf %100, %101 : vector<16x16x128xf32>
    %c4_58 = arith.constant 4 : index
    %c0_59 = arith.constant 0 : index
    %c0_60 = arith.constant 0 : index
    %103 = vector.load %arg9[%c4_58, %c0_59, %c0_60] : memref<20x16x128xf32, #tpu.memory_space<vmem>>, vector<16x16x128xf32>
    %104 = arith.maximumf %102, %103 : vector<16x16x128xf32>
    %c15_i32_61 = arith.constant 15 : i32
    %105 = tpu.dynamic_rotate %104 by %c15_i32_61 dim 1 : vector<16x16x128xf32>, i32 -> vector<16x16x128xf32>
    %cst_62 = arith.constant 0xFF800000 : f32
    %106 = vector.shape_cast %29 : vector<1x16x128xi1> to vector<1x16x128xi1>
    %107 = vector.broadcast %106 : vector<1x16x128xi1> to vector<16x16x128xi1>
    %108 = vector.broadcast %cst_62 : f32 to vector<16x16x128xf32>
    %109 = arith.select %107, %105, %108 : vector<16x16x128xi1>, vector<16x16x128xf32>
    %c1_i32_63 = arith.constant 1 : i32
    %110 = tpu.dynamic_rotate %104 by %c1_i32_63 dim 1 : vector<16x16x128xf32>, i32 -> vector<16x16x128xf32>
    %cst_64 = arith.constant 0xFF800000 : f32
    %111 = vector.shape_cast %27 : vector<1x16x128xi1> to vector<1x16x128xi1>
    %112 = vector.broadcast %111 : vector<1x16x128xi1> to vector<16x16x128xi1>
    %113 = vector.broadcast %cst_64 : f32 to vector<16x16x128xf32>
    %114 = arith.select %112, %110, %113 : vector<16x16x128xi1>, vector<16x16x128xf32>
    %115 = arith.maximumf %114, %109 : vector<16x16x128xf32>
    %116 = arith.maximumf %104, %115 : vector<16x16x128xf32>
    %c14_i32_65 = arith.constant 14 : i32
    %117 = tpu.dynamic_rotate %104 by %c14_i32_65 dim 1 : vector<16x16x128xf32>, i32 -> vector<16x16x128xf32>
    %cst_66 = arith.constant 0xFF800000 : f32
    %118 = vector.shape_cast %33 : vector<1x16x128xi1> to vector<1x16x128xi1>
    %119 = vector.broadcast %118 : vector<1x16x128xi1> to vector<16x16x128xi1>
    %120 = vector.broadcast %cst_66 : f32 to vector<16x16x128xf32>
    %121 = arith.select %119, %117, %120 : vector<16x16x128xi1>, vector<16x16x128xf32>
    %c2_i32_67 = arith.constant 2 : i32
    %122 = tpu.dynamic_rotate %104 by %c2_i32_67 dim 1 : vector<16x16x128xf32>, i32 -> vector<16x16x128xf32>
    %cst_68 = arith.constant 0xFF800000 : f32
    %123 = vector.shape_cast %31 : vector<1x16x128xi1> to vector<1x16x128xi1>
    %124 = vector.broadcast %123 : vector<1x16x128xi1> to vector<16x16x128xi1>
    %125 = vector.broadcast %cst_68 : f32 to vector<16x16x128xf32>
    %126 = arith.select %124, %122, %125 : vector<16x16x128xi1>, vector<16x16x128xf32>
    %127 = arith.maximumf %126, %121 : vector<16x16x128xf32>
    %128 = arith.maximumf %116, %127 : vector<16x16x128xf32>
    %c2_69 = arith.constant 2 : index
    %c0_70 = arith.constant 0 : index
    %c0_71 = arith.constant 0 : index
    %129 = vector.load %arg9[%c2_69, %c0_70, %c0_71] : memref<20x16x128xf32, #tpu.memory_space<vmem>>, vector<16x16x128xf32>
    tpu.vector_store %arg9[%c2_69, %c0_70, %c0_71], %128 {strides = array<i32>} : memref<20x16x128xf32, #tpu.memory_space<vmem>>, vector<16x16x128xf32>,
    %c0_72 = arith.constant 0 : index
    %c0_73 = arith.constant 0 : index
    %c0_74 = arith.constant 0 : index
    %130 = vector.load %arg9[%c0_72, %c0_73, %c0_74] : memref<20x16x128xf32, #tpu.memory_space<vmem>>, vector<16x16x128xf32>
    %131 = arith.maximumf %128, %130 : vector<16x16x128xf32>
    %c1_75 = arith.constant 1 : index
    %c0_76 = arith.constant 0 : index
    %c0_77 = arith.constant 0 : index
    %132 = vector.load %arg9[%c1_75, %c0_76, %c0_77] : memref<20x16x128xf32, #tpu.memory_space<vmem>>, vector<16x16x128xf32>
    %133 = arith.maximumf %131, %132 : vector<16x16x128xf32>
    %c3_78 = arith.constant 3 : index
    %c0_79 = arith.constant 0 : index
    %c0_80 = arith.constant 0 : index
    %134 = vector.load %arg9[%c3_78, %c0_79, %c0_80] : memref<20x16x128xf32, #tpu.memory_space<vmem>>, vector<16x16x128xf32>
    %135 = arith.maximumf %133, %134 : vector<16x16x128xf32>
    %c4_81 = arith.constant 4 : index
    %c0_82 = arith.constant 0 : index
    %c0_83 = arith.constant 0 : index
    %136 = vector.load %arg9[%c4_81, %c0_82, %c0_83] : memref<20x16x128xf32, #tpu.memory_space<vmem>>, vector<16x16x128xf32>
    %137 = arith.maximumf %135, %136 : vector<16x16x128xf32>
    %138 = tpu.concatenate %104, %137 in 2 : vector<16x16x128xf32>, vector<16x16x128xf32> -> vector<16x16x256xf32>
    %139 = vector.shape_cast %138 : vector<16x16x256xf32> to vector<256x256xf32>
    %c256 = arith.constant 256 : index
    %c0_84 = arith.constant 0 : index
    %140 = vector.load %arg5[%c256, %c0_84] : memref<512x128xbf16, #tpu.memory_space<vmem>>, vector<256x128xbf16>
    %141 = arith.truncf %139 : vector<256x256xf32> to vector<256x256xbf16>
    %cst_85 = arith.constant dense<0.000000e+00> : vector<256x128xf32>
    %142 = tpu.matmul %141, %140, %cst_85 {dimension_numbers = #tpu.dot_dimension_numbers<[1], [0], [0], [1], [0, 0, 1, 1], [], []>} : vector<256x256xbf16>, vector<256x128xbf16>, vector<256x128xf32> -> vector<256x128xf32>
    %143 = arith.addf %71, %142 : vector<256x128xf32>
    %c0_86 = arith.constant 0 : index
    %c0_87 = arith.constant 0 : index
    %144 = vector.load %arg6[%c0_86, %c0_87] : memref<1x128xf32, #tpu.memory_space<vmem>>, vector<1x128xf32>
    %145 = vector.shape_cast %144 : vector<1x128xf32> to vector<128xf32>
    %146 = vector.shape_cast %145 : vector<128xf32> to vector<1x128xf32>
    %147 = vector.broadcast %146 : vector<1x128xf32> to vector<256x128xf32>
    %148 = arith.mulf %143, %147 : vector<256x128xf32>
    %c0_88 = arith.constant 0 : index
    %c0_89 = arith.constant 0 : index
    %149 = vector.load %arg7[%c0_88, %c0_89] : memref<1x128xf32, #tpu.memory_space<vmem>>, vector<1x128xf32>
    %150 = vector.shape_cast %149 : vector<1x128xf32> to vector<128xf32>
    %151 = vector.shape_cast %150 : vector<128xf32> to vector<1x128xf32>
    %152 = vector.broadcast %151 : vector<1x128xf32> to vector<256x128xf32>
    %153 = arith.addf %148, %152 : vector<256x128xf32>
    %154 = arith.negf %153 : vector<256x128xf32>
    %155 = math.exp %154 : vector<256x128xf32>
    %cst_90 = arith.constant 1.000000e+00 : f32
    %156 = vector.broadcast %cst_90 : f32 to vector<256x128xf32>
    %157 = arith.addf %156, %155 : vector<256x128xf32>
    %158 = arith.divf %156, %157 : vector<256x128xf32>
    %159 = arith.mulf %153, %158 : vector<256x128xf32>
    %160 = vector.shape_cast %159 : vector<256x128xf32> to vector<16x16x128xf32>
    %c0_91 = arith.constant 0 : index
    %c0_92 = arith.constant 0 : index
    %c0_93 = arith.constant 0 : index
    %c0_94 = arith.constant 0 : index
    %161 = vector.load %arg8[%c0_91, %c0_92, %c0_93, %c0_94] : memref<1x16x16x128xf32, #tpu.memory_space<vmem>>, vector<1x16x16x128xf32>
    %162 = vector.shape_cast %161 : vector<1x16x16x128xf32> to vector<16x16x128xf32>
    %163 = vector.shape_cast %160 : vector<16x16x128xf32> to vector<1x16x16x128xf32>
    tpu.vector_store %arg8[%c0_91, %c0_92, %c0_93, %c0_94], %163 {strides = array<i32>} : memref<1x16x16x128xf32, #tpu.memory_space<vmem>>, vector<1x16x16x128xf32>,
    return
  }
  func.func @transform_0(%arg0: i32) -> (i32, i32, i32, i32) {
    %c0_i32 = arith.constant 0 : i32
    %c0_i32_0 = arith.constant 0 : i32
    %c0_i32_1 = arith.constant 0 : i32
    %c0_i32_2 = arith.constant 0 : i32
    return %arg0, %c0_i32, %c0_i32_0, %c0_i32_1 : i32, i32, i32, i32
  }
  func.func @transform_1(%arg0: i32) -> (i32, i32) {
    %c0_i32 = arith.constant 0 : i32
    %c0_i32_0 = arith.constant 0 : i32
    %c0_i32_1 = arith.constant 0 : i32
    return %c0_i32, %c0_i32_0 : i32, i32
  }
  func.func @transform_2(%arg0: i32) -> (i32, i32) {
    %c0_i32 = arith.constant 0 : i32
    %c0_i32_0 = arith.constant 0 : i32
    %c0_i32_1 = arith.constant 0 : i32
    return %c0_i32, %c0_i32_0 : i32, i32
  }
  func.func @transform_3(%arg0: i32) -> (i32, i32) {
    %c0_i32 = arith.constant 0 : i32
    %c0_i32_0 = arith.constant 0 : i32
    %c0_i32_1 = arith.constant 0 : i32
    return %c0_i32, %c0_i32_0 : i32, i32
  }
  func.func @transform_4(%arg0: i32) -> (i32, i32) {
    %c0_i32 = arith.constant 0 : i32
    %c0_i32_0 = arith.constant 0 : i32
    %c0_i32_1 = arith.constant 0 : i32
    return %c0_i32, %c0_i32_0 : i32, i32
  }
  func.func @transform_5(%arg0: i32) -> (i32, i32) {
    %c0_i32 = arith.constant 0 : i32
    %c0_i32_0 = arith.constant 0 : i32
    %c0_i32_1 = arith.constant 0 : i32
    return %c0_i32, %c0_i32_0 : i32, i32
  }
  func.func @transform_6(%arg0: i32) -> (i32, i32) {
    %c0_i32 = arith.constant 0 : i32
    %c0_i32_0 = arith.constant 0 : i32
    %c0_i32_1 = arith.constant 0 : i32
    return %c0_i32, %c0_i32_0 : i32, i32
  }
  func.func @transform_7(%arg0: i32) -> (i32, i32, i32, i32) {
    %c0_i32 = arith.constant 0 : i32
    %c0_i32_0 = arith.constant 0 : i32
    %c0_i32_1 = arith.constant 0 : i32
    %c0_i32_2 = arith.constant 0 : i32
    return %arg0, %c0_i32, %c0_i32_0, %c0_i32_1 : i32, i32, i32, i32
  }
}

</mosaic_0001>

<bundles_post_ra>
// kernel: tpu_custom_call.1
= control target key start
LH: loop header
LB: loop body
LE: loop exit
PB: predicated region body
PF: predicated region fallthrough
CT: control target
= control target key end

     0   :  { %s9201_s0 = inlined_call_operand.hbm [shape: bf16[2,16,16,128], index: 0, kind: input, shape index: {}]   ;;  %s9202_s1 = inlined_call_operand.hbm [shape: bf16[128,128], index: 1, kind: input, shape index: {}]   ;;  %s9203_s2 = inlined_call_operand.vmem [shape: f32[1,128], index: 2, kind: input, shape index: {}]   ;;  %s9204_s3 = inlined_call_operand.vmem [shape: f32[1,128], index: 3, kind: input, shape index: {}]   ;;  %s9205_s4 = inlined_call_operand.hbm [shape: bf16[512,128], index: 4, kind: input, shape index: {}]   ;;  %s9206_s5 = inlined_call_operand.vmem [shape: f32[1,128], index: 5, kind: input, shape index: {}]   ;;  %s9207_s6 = inlined_call_operand.vmem [shape: f32[1,128], index: 6, kind: input, shape index: {}]   ;;  %s9208_s7 = inlined_call_operand.hbm [shape: f32[2,16,16,128], index: 7, kind: output, shape index: {}]  }
   0x1   :  { %9264 = sst [smem:[#allocation45_spill]] %s9202_s1 }
   0x2   :  { %12 = vsyncpa [#allocation4], 0 }
   0x3   :  { %14 = vsyncpa [#allocation4 + $0x1], 0 }
   0x4   :  { %15 = vsyncpa [#allocation7], 0 }
   0x5   :  { %16 = vsyncpa [#allocation5], 0 }
   0x6   :  { %18 = vsyncpa [#allocation5 + $0x1], 0  ;;  %s5545_s24 = smov 0   ;;  %s5547_s25 = smov 0  }
   0x7   :  { %s5549_s26 = smov 0   ;;  %s5551_s27 = smov 0  }
   0x8 LB: > { %s5566_s28 = sadd.s32 4294967295, %s5495_s27   ;;  %s4508_s29 = sadd.s32 4294967294, %s5495_s27   ;;  %s5495_s27 = sphi %s5551_s27, %s9483_s27   ;;  %s5491_s26 = sphi %s5549_s26, %s9482_s26   ;;  %s5487_s25 = sphi %s5547_s25, %s9481_s25   ;;  %s5483_s24 = sphi %s5545_s24, %s9480_s24  }
   0x9   : > { %p44_p0 = scmp.ne.s32.totalorder %s5487_s25, %s5483_s24  ;;  %p9210_p1 = scmp.eq.s32.totalorder %s5566_s28, 0 }
   0xa   : > { %p194_p2 = scmp.eq.s32.totalorder %s5566_s28, 1  ;;  %p200_p3 = scmp.eq.s32.totalorder %s4508_s29, 1 }
   0xb   : > { %p5575_p4 = por %p9210_p1, %p44_p0  ;;  %p4509_p5 = scmp.ge.s32.totalorder %s5495_s27, 1 }
   0xc   : > { %p5580_p6 = por %p200_p3, %p44_p0  ;;  %p207_p7 = scmp.lt.s32.totalorder %s5495_s27, 3 }
   0xd   : > { %s9265_s30 = scalar_select %p5575_p4, 1, 0 }
   0xe   : > { %s9266_s8 = scalar_select %p5580_p6, 1, 0 }
   0xf   : > { %p5585_p8 = pnand %p4509_p5, %p207_p7  ;;  %s5497_s10 = smov [#allocation6]  }
  0x10   : > { %s219_s11 = sshll.u32 %s5497_s10, 4  ;;  %s5498_s13 = smov [#allocation8]   ;;  %s220_s11 = int_to_ptr.vmem [resolvable:$true] %s219_s11 }
  0x11   : > { %s9267_s9 = scalar_select %p5585_p8, 1, 0 }
  0x12   : > { %p4976_p9 = pneg %p5585_p8  ;;  %s238_s14 = sshll.u32 %s5498_s13, 4  ;;  %s239_s14 = int_to_ptr.vmem [resolvable:$true] %s238_s14 }
  0x13   : > { %s5358_s15 = scalar_lea.vmem %s220_s11, 1024  ;;  %p5366_p5 = scmp.lt.s32.totalorder %s220_s11, %s220_s11 }
  0x14   : > { %p5594_p11 = pnand %p4976_p9, %p9210_p1  ;;  %p5359_p13 = scmp.ne.s32.totalorder %s220_s11, %s5358_s15 }
  0x15   : > { %p5367_p7 = scmp.lt.s32.totalorder %s5358_s15, %s5358_s15 }
  0x16   : > { %p5349_p12 = pneg %p5594_p11 }
  0x17   : > { %p5368_p10 = por %p5367_p7, %p5366_p5 }
  0x18   : > { %p5361_p0 = pnand %p5359_p13, %p5349_p12 }
  0x1a   : > { %p5362_p3 = pneg %p5361_p0 }
  0x1c   : > { %p5369_p9 = pnand %p5368_p10, %p5362_p3 }
  0x1e   : > { %5372 = shalt.err (!%p5369_p9)
}
  0x1f   : > { %s9209_s16 = smov 64   ;;  %s9211_s17 = smov 4  }
  0x20   : > { %s9269_s1 = sld [smem:[#allocation45_spill]]  ;;  %s5384_s20 = scalar_lea.vmem %s239_s14, 4096 }
  0x21   : > { %p5385_p13 = scmp.ne.s32.totalorder %s239_s14, %s5384_s20  ;;  %p5392_p10 = scmp.lt.s32.totalorder %s239_s14, %s239_s14 }
  0x22   : > { %p5393_p3 = scmp.lt.s32.totalorder %s5384_s20, %s5384_s20 }
  0x23   : > { %p5387_p0 = pnand %p5385_p13, %p5349_p12 }
  0x24   : > { %p5394_p7 = por %p5393_p3, %p5392_p10 }
  0x25   : > { %p5388_p5 = pneg %p5387_p0 }
  0x26   : > { %4979 = dma.hbm_to_vmem [thread:$0]  (!%p5594_p11), %s9269_s1, 1024, %s220_s11, [#allocation7], %s9209_s16, %s9209_s16, %s9211_s17  }
  0x27   : > { %p5395_p9 = pnand %p5394_p7, %p5388_p5 }
  0x29   : > { %5398 = shalt.err (!%p5395_p9)
}
  0x2a   : > { %4982 = dma.hbm_to_vmem [thread:$0]  (!%p5594_p11), %s9205_s4, 4096, %s239_s14, [#allocation7], %s9209_s16, %s9209_s16, %s9211_s17  }
  0x2b   : > { %s5623_s23 = sadd.s32 1, %s5495_s27   ;;  %s31_s29 = sadd.s32 1, %s5491_s26 }
  0x2c   : > { %s28_s10 = ssub.s32 %s5495_s27, %s5623_s23  ;;  %p38_p12 = scmp.ne.s32.totalorder %s5491_s26, %s5487_s25 }
  0x2d   : > { %p29_p13 = scmp.eq.s32.totalorder %s28_s10, 0  ;;  %p39_p0 = scmp.eq.s32.totalorder %s5495_s27, 0 }
  0x2e   : > { %p5633_p5 = por %p194_p2, %p38_p12  ;;  %p4993_p10 = scmp.lt.s32.totalorder %s5495_s27, 2 }
  0x2f   : > { %s5639_s12 = scalar_select %p29_p13, %s5491_s26, %s31_s29  }
  0x30   : > { %s9270_s11 = scalar_select %p5633_p5, 1, 0 }
  0x31   : > { %p40_p3 = por %p39_p0, %p38_p12  ;;  %s258_s13 = sand.u32 1, %s5491_s26  }
  0x32   : > { %s4513_s15 = sshll.u32 %s258_s13, 7  ;;  %s4650_s14 = sshll.u32 %s5495_s27, 11 }
  0x33   : > { %s5646_s20 = scalar_lea.hbm %s9201_s0, %s4650_s14  ;;  %s262_s21 = scalar_lea.vmem [#allocation3], %s4513_s15 }
  0x34   : > { %s269_s22 = sshll.u32 %s262_s21, 4  ;;  %p5650_p2 = pnand %p4993_p10, %p40_p3  ;;  %s5648_s22 = int_to_ptr.vmem [resolvable:$true] %s269_s22 }
  0x35   : > { %s5654_s29 = scalar_lea.sflag [#allocation4], %s258_s13  ;;  %s5399_s16 = scalar_lea.hbm %s5646_s20, 2048 }
  0x36   : > { %p5400_p11 = scmp.ne.s32.totalorder %s5646_s20, %s5399_s16  ;;  %p5401_p7 = pneg %p5650_p2 }
  0x37   : > { %s5404_s15 = scalar_lea.hbm %s9201_s0, 4096  ;;  %p5405_p13 = scmp.lt.s32.totalorder %s5646_s20, %s9201_s0 }
  0x38   : > { %p5402_p9 = pnand %p5401_p7, %p5400_p11  ;;  %p5406_p0 = scmp.lt.s32.totalorder %s5404_s15, %s5399_s16 }
  0x3a   : > { %p5403_p12 = pneg %p5402_p9  ;;  %p5407_p10 = por %p5406_p0, %p5405_p13 }
  0x3c   : > { %p5408_p3 = pnand %p5407_p10, %p5403_p12 }
  0x3e   : > { %5411 = shalt.err (!%p5408_p3)
}
  0x3f   : > { %s5412_s13 = scalar_lea.vmem %s5648_s22, 2048  ;;  %s5501_s17 = smov [#allocation3]  }
  0x40   : > { %p5413_p1 = scmp.ne.s32.totalorder %s5648_s22, %s5412_s13  ;;  %s5417_s1 = sshll.u32 %s5501_s17, 4  ;;  %s5418_s1 = int_to_ptr.vmem [resolvable:$false] %s5417_s1 }
  0x41   : > { %s5419_s14 = scalar_lea.vmem %s5418_s1, 4096  ;;  %p5420_p9 = scmp.lt.s32.totalorder %s5648_s22, %s5418_s1 }
  0x42   : > { %p5415_p6 = pnand %p5413_p1, %p5401_p7  ;;  %p5421_p5 = scmp.lt.s32.totalorder %s5419_s14, %s5412_s13 }
  0x44   : > { %p5416_p11 = pneg %p5415_p6  ;;  %p5422_p4 = por %p5421_p5, %p5420_p9 }
  0x46   : > { %p5423_p8 = pnand %p5422_p4, %p5416_p11 }
  0x48   : > { %5426 = shalt.err (!%p5423_p8)
}
  0x49   : > { %s9272_s16 = smov 4   ;;  %s9273_s18 = smov 64  }
  0x4a   : > { %4986 = dma.hbm_to_vmem [thread:$0]  (!%p5650_p2), %s5646_s20, 2048, %s5648_s22, %s5654_s29, %s9273_s18, %s9273_s18, %s9272_s16  }
  0x4b   : > { %p9274_p1 = scmp.ne.s32.totalorder %s9267_s9, 0 }
  0x4d   : > { %281 = sbr.rel (%p9274_p1) target bundleno = 1113 (0x459), region = 48 }
  0x52   : > { %s5681_s17 = sand.u32 1, %s5487_s25   ;;  %p9275_p4 = scmp.ne.s32.totalorder %s9265_s30, 0 }
  0x53   : > { %s4517_s1 = sshll.u32 %s5681_s17, 7  ;;  %s284_s15 = scalar_lea.sflag [#allocation4], %s5681_s17 }
  0x54   : > { %s5685_s19 = scalar_lea.vmem [#allocation3], %s4517_s1 }
  0x55   : > { %5470 = dma.done.wait (%p9275_p4), %s284_s15, 2048  }
  0x56   : > { %5472 = vsyncadd (%p9275_p4), %s284_s15, 4294965248  ;;  %p9276_p6 = scmp.eq.s32.totalorder %s5566_s28, 0 }
  0x58   : > { %5474 = dma.done.wait (%p9276_p6), [#allocation7], 5120   ;;  %p9277_p8 = pmov %p9276_p6 }
  0x59   : > { %v5035_v0 = vld [vmem:[#allocation6 + $0x38] sm:$0xff]   ;;  %v5036_v1 = vld [vmem:[#allocation6 + $0x30] sm:$0xff]   ;;  %v5037_v2 = vld [vmem:[#allocation6 + $0x28] sm:$0xff]   ;;  %v991_v32 = vlaneseq  ;;  %s4520_s14 = sshll.u32 %s5681_s17, 8  ;;  %s4651_s18 = sshll.u32 %s5566_s28, 12 }
  0x5a   : > { %5476 = vsyncadd (%p9277_p8), [#allocation7], 4294962176  ;;  %4900 = vmatprep.subr.bf16.mxu0 %v5035_v0  ;;  %4948 = vmatprep.subr.bf16.mxu1 %v5035_v0  ;;  %v5038_v3 = vld [vmem:[#allocation6 + $0x20] sm:$0xff]   ;;  %v5039_v6 = vld [vmem:[#allocation6 + $0x18] sm:$0xff]   ;;  %s9024_s16 = scalar_lea.vmem [#allocation9], %s4520_s14  ;;  %s9155_s30 = scalar_lea.hbm %s9208_s7, %s4651_s18 }
  0x5b   : > { %4901 = vmatpush3.bf16.msra.mxu0 %v5035_v0  ;;  %4956 = vmatpush3.bf16.msra.mxu1 %v5035_v0  ;;  %v5043_v4 = vld [vmem:[%s5685_s19] sm:$0xff]   ;;  %v5040_v7 = vld [vmem:[#allocation6 + $0x10] sm:$0xff]   ;;  %v5041_v8 = vld [vmem:[#allocation6 + $0x8] sm:$0xff]   ;;  %v5740_v44 = vshrl.u32 %v991_v32, 7  ;;  %s4416_s1 = sshll.u32 %s9024_s16, 4  ;;  %s4403_s9 = scalar_lea.sflag [#allocation5], %s5681_s17  ;;  %s9157_s1 = int_to_ptr.vmem [resolvable:$true] %s4416_s1 }
  0x5c   : > { %4902 = vmatprep.subr.bf16.mxu0 %v5036_v1  ;;  %4949 = vmatprep.subr.bf16.mxu1 %v5036_v1  ;;  %v5044_v5 = vld [vmem:[%s5685_s19 + $0x40] sm:$0xff]   ;;  %v5045_v10 = vld [vmem:[%s5685_s19 + $0x8] sm:$0xff]   ;;  %v5047_v12 = vld [vmem:[%s5685_s19 + $0x10] sm:$0xff]   ;;  %s5427_s20 = scalar_lea.vmem %s9157_s1, 4096  ;;  %p9477_p2 = scmp.ne.s32.totalorder %s9270_s11, 0 }
  0x5d   : > { %4916 = vmatprep.mubr.bf16.mxu0 %v5043_v4  ;;  %4932 = vmatprep.mubr.bf16.mxu1 %v5044_v5  ;;  %v5042_v9 = vld [vmem:[#allocation6] sm:$0xff]   ;;  %v5046_v11 = vld [vmem:[%s5685_s19 + $0x48] sm:$0xff]   ;;  %v5048_v13 = vld [vmem:[%s5685_s19 + $0x50] sm:$0xff]   ;;  %v5772_v4 = vadd.s32 8, %v5740_v44  ;;  %vm1034_vm0 = vcmp.lt.s32.totalorder %v5740_v44, 7  ;;  %vm1135_vm1 = vcmp.lt.s32.totalorder %v5740_v44, 1  ;;  %p5428_p5 = scmp.ne.s32.totalorder %s9157_s1, %s5427_s20 }
  0x5e   : > { %v5049_v14 = vld [vmem:[%s5685_s19 + $0x18] sm:$0xff]   ;;  %v5051_v16 = vld [vmem:[%s5685_s19 + $0x20] sm:$0xff]   ;;  %v5053_v18 = vld [vmem:[%s5685_s19 + $0x28] sm:$0xff]   ;;  %vm994_vm2 = vcmp.ge.s32.totalorder %v5740_v44, 1  ;;  %vm1300_vm4 = vcmp.lt.s32.totalorder %v5740_v44, 6  ;;  %vm1401_vm6 = vcmp.lt.s32.totalorder %v5740_v44, 2 }
  0x5f   : > { %4903 = vmatpush3.bf16.msra.mxu0 %v5036_v1  ;;  %4957 = vmatpush3.bf16.msra.mxu1 %v5036_v1  ;;  %v5050_v15 = vld [vmem:[%s5685_s19 + $0x58] sm:$0xff]   ;;  %v5052_v17 = vld [vmem:[%s5685_s19 + $0x60] sm:$0xff]   ;;  %v5054_v19 = vld [vmem:[%s5685_s19 + $0x68] sm:$0xff]   ;;  %vm997_vm3 = vcmp.lt.s32.totalorder %v5772_v4, 15  ;;  %vm1001_vm5 = vcmp.lt.s32.totalorder %v5772_v4, 14  ;;  %vm998_vm7 = vcmp.ge.s32.totalorder %v5740_v44, 2  ;;  %p5429_p7 = pnand %p5428_p5, %p9477_p2 }
  0x60   : > { %4904 = vmatprep.subr.bf16.mxu0 %v5037_v2  ;;  %4950 = vmatprep.subr.bf16.mxu1 %v5037_v2  ;;  %v5055_v20 = vld [vmem:[%s5685_s19 + $0x30] sm:$0xff]   ;;  %v5057_v22 = vld [vmem:[%s5685_s19 + $0x38] sm:$0xff]   ;;  %v5714_v24 = vld [vmem:[%s9203_s2] ss:$0 sm:$0xff]  ;;  %s5502_s28 = smov [#allocation9]  }
  0x61   : > { %v5056_v21 = vld [vmem:[%s5685_s19 + $0x70] sm:$0xff]   ;;  %v5058_v23 = vld [vmem:[%s5685_s19 + $0x78] sm:$0xff]   ;;  %v5719_v26 = vld [vmem:[%s9204_s3] ss:$0 sm:$0xff]  ;;  %p5430_p12 = pneg %p5429_p7  ;;  %s5431_s22 = sshll.u32 %s5502_s28, 4  ;;  %s5432_s22 = int_to_ptr.vmem [resolvable:$false] %s5431_s22 }
  0x62   : > { %s5433_s10 = scalar_lea.vmem %s5432_s22, 8192  ;;  %p5434_p13 = scmp.lt.s32.totalorder %s9157_s1, %s5432_s22 }
  0x63   : > { %4905 = vmatpush3.bf16.msra.mxu0 %v5037_v2  ;;  %4958 = vmatpush3.bf16.msra.mxu1 %v5037_v2  ;;  %p5435_p0 = scmp.lt.s32.totalorder %s5433_s10, %s5427_s20 }
  0x64   : > { %4906 = vmatprep.subr.bf16.mxu0 %v5038_v3  ;;  %4951 = vmatprep.subr.bf16.mxu1 %v5038_v3 }
  0x65   : > { %p5436_p10 = por %p5435_p0, %p5434_p13 }
  0x67   : > { %4907 = vmatpush3.bf16.msra.mxu0 %v5038_v3  ;;  %4959 = vmatpush3.bf16.msra.mxu1 %v5038_v3  ;;  %p5437_p3 = pnand %p5436_p10, %p5430_p12 }
  0x68   : > { %4908 = vmatprep.subr.bf16.mxu0 %v5039_v6  ;;  %4952 = vmatprep.subr.bf16.mxu1 %v5039_v6 }
  0x6b   : > { %4909 = vmatpush3.bf16.msra.mxu0 %v5039_v6  ;;  %4960 = vmatpush3.bf16.msra.mxu1 %v5039_v6 }
  0x6c   : > { %4910 = vmatprep.subr.bf16.mxu0 %v5040_v7  ;;  %4953 = vmatprep.subr.bf16.mxu1 %v5040_v7 }
  0x6f   : > { %4911 = vmatpush3.bf16.msra.mxu0 %v5040_v7  ;;  %4961 = vmatpush3.bf16.msra.mxu1 %v5040_v7 }
  0x70   : > { %4912 = vmatprep.subr.bf16.mxu0 %v5041_v8  ;;  %4954 = vmatprep.subr.bf16.mxu1 %v5041_v8 }
  0x73   : > { %4913 = vmatpush3.bf16.msra.mxu0 %v5041_v8  ;;  %4962 = vmatpush3.bf16.msra.mxu1 %v5041_v8 }
  0x74   : > { %4914 = vmatprep.subr.bf16.mxu0 %v5042_v9  ;;  %4955 = vmatprep.subr.bf16.mxu1 %v5042_v9 }
  0x77   : > { %4915 = vmatpush3.bf16.msra.mxu0 %v5042_v9  ;;  %4963 = vmatpush3.bf16.msra.mxu1 %v5042_v9 }
  0x7a   : > { %4917 = vmatmul.mubr.bf16.vlgmr.msra.gmra.mxu0 %v5045_v10  ;;  %4933 = vmatmul.mubr.bf16.vlgmr.msra.gmra.mxu1 %v5046_v11 }
  0x7b   : > { %4920 = vmatprep.mubr.bf16.mxu0 %v5047_v12  ;;  %4936 = vmatprep.mubr.bf16.mxu1 %v5048_v13 }
  0x82   : > { %4921 = vmatmul.mubr.bf16.gmra.mxu0 %v5049_v14  ;;  %4937 = vmatmul.mubr.bf16.gmra.mxu1 %v5050_v15 }
  0x83   : > { %4924 = vmatprep.mubr.bf16.mxu0 %v5051_v16  ;;  %4940 = vmatprep.mubr.bf16.mxu1 %v5052_v17 }
  0x8a   : > { %4925 = vmatmul.mubr.bf16.gmra.mxu0 %v5053_v18  ;;  %4941 = vmatmul.mubr.bf16.gmra.mxu1 %v5054_v19 }
  0x8b   : > { %4928 = vmatprep.mubr.bf16.mxu0 %v5055_v20  ;;  %4944 = vmatprep.mubr.bf16.mxu1 %v5056_v21 }
  0x92   : > { %4929 = vmatmul.mubr.bf16.gmra.mxu0 %v5057_v22  ;;  %4945 = vmatmul.mubr.bf16.gmra.mxu1 %v5058_v23 }
 0x13a   : > { %v4918_v25 = vpop.f32.mrf.mxu0  ;;  %v4934_v27 = vpop.f32.mrf.mxu1 }
 0x13b   : > { %v689_v28 = vmul.f32 %v4918_v25, %v5714_v24  ;;  %v705_v29 = vmul.f32 %v4934_v27, %v5714_v24 }
 0x13c   : > { %v553_v30 = vpop.f32.mrf.mxu0  ;;  %v617_v31 = vpop.f32.mrf.mxu1 }
 0x13d   : > { %v5724_v33 = vadd.f32 %v5719_v26, %v689_v28  ;;  %v5727_v34 = vadd.f32 %v5719_v26, %v705_v29  ;;  %v687_v35 = vmul.f32 %v5714_v24, %v553_v30  ;;  %v703_v36 = vmul.f32 %v5714_v24, %v617_v31 }
 0x13e   : > { %v4919_v37 = vpop.f32.mrf.mxu0  ;;  %v4935_v38 = vpop.f32.mrf.mxu1 }
 0x13f   : > { %v4549_v39 = vmul.f32 -1.442695, %v5724_v33  ;;  %v4565_v40 = vmul.f32 -1.442695, %v5727_v34  ;;  %v5734_v41 = vadd.f32 %v5719_v26, %v687_v35  ;;  %v5737_v42 = vadd.f32 %v5719_v26, %v703_v36 }
 0x140   : > { %v690_v43 = vmul.f32 %v4919_v37, %v5714_v24  ;;  %v706_v45 = vmul.f32 %v4935_v38, %v5714_v24  ;;  %v556_v46 = vpop.f32.mrf.mxu0  ;;  %v620_v47 = vpop.f32.mrf.mxu1 }
 0x141   : > { %5091 = vpow2.f32 %v4549_v39  ;;  %v4547_v48 = vmul.f32 -1.442695, %v5734_v41  ;;  %v4563_v49 = vmul.f32 -1.442695, %v5737_v42  ;;  %v688_v50 = vmul.f32 %v5714_v24, %v556_v46 }
 0x142   : > { %5093 = vpow2.f32 %v4565_v40  ;;  %v5747_v51 = vadd.f32 %v5719_v26, %v690_v43  ;;  %v5750_v52 = vadd.f32 %v5719_v26, %v706_v45  ;;  %v704_v53 = vmul.f32 %v5714_v24, %v620_v47  ;;  %v4922_v54 = vpop.f32.mrf.mxu0  ;;  %v4938_v55 = vpop.f32.mrf.mxu1 }
 0x143   : > { %5095 = vpow2.f32 %v4547_v48  ;;  %v5754_v56 = vadd.f32 %v5719_v26, %v688_v50  ;;  %v693_v57 = vmul.f32 %v4922_v54, %v5714_v24  ;;  %v709_v58 = vmul.f32 %v4938_v55, %v5714_v24 }
 0x144   : > { %5097 = vpow2.f32 %v4563_v49  ;;  %v4550_v59 = vmul.f32 -1.442695, %v5747_v51  ;;  %v4566_v60 = vmul.f32 -1.442695, %v5750_v52  ;;  %v5761_v61 = vadd.f32 %v5719_v26, %v704_v53  ;;  %v569_v62 = vpop.f32.mrf.mxu0  ;;  %v633_v63 = vpop.f32.mrf.mxu1 }
 0x145   : > { %v4548_v0 = vmul.f32 -1.442695, %v5754_v56  ;;  %v5765_v1 = vadd.f32 %v5719_v26, %v693_v57  ;;  %v5768_v2 = vadd.f32 %v5719_v26, %v709_v58  ;;  %v691_v3 = vmul.f32 %v5714_v24, %v569_v62 }
 0x146   : > { %5099 = vpow2.f32 %v4550_v59  ;;  %v4564_v5 = vmul.f32 -1.442695, %v5761_v61  ;;  %v707_v6 = vmul.f32 %v5714_v24, %v633_v63  ;;  %v4923_v7 = vpop.f32.mrf.mxu0  ;;  %v4939_v8 = vpop.f32.mrf.mxu1 }
 0x147   : > { %5101 = vpow2.f32 %v4566_v60  ;;  %v4553_v9 = vmul.f32 -1.442695, %v5765_v1  ;;  %v4569_v10 = vmul.f32 -1.442695, %v5768_v2  ;;  %v5779_v11 = vadd.f32 %v5719_v26, %v691_v3 }
 0x148   : > { %5103 = vpow2.f32 %v4548_v0  ;;  %v5782_v12 = vadd.f32 %v5719_v26, %v707_v6  ;;  %v694_v13 = vmul.f32 %v4923_v7, %v5714_v24  ;;  %v710_v14 = vmul.f32 %v4939_v8, %v5714_v24  ;;  %v572_v15 = vpop.f32.mrf.mxu0  ;;  %v636_v16 = vpop.f32.mrf.mxu1 }
 0x149   : > { %5105 = vpow2.f32 %v4564_v5  ;;  %v4551_v17 = vmul.f32 -1.442695, %v5779_v11  ;;  %v692_v18 = vmul.f32 %v5714_v24, %v572_v15  ;;  %v708_v19 = vmul.f32 %v5714_v24, %v636_v16 }
 0x14a   : > { %5107 = vpow2.f32 %v4553_v9  ;;  %v4567_v20 = vmul.f32 -1.442695, %v5782_v12  ;;  %v5791_v21 = vadd.f32 %v5719_v26, %v694_v13  ;;  %v5794_v22 = vadd.f32 %v5719_v26, %v710_v14  ;;  %v4926_v23 = vpop.f32.mrf.mxu0  ;;  %v4942_v25 = vpop.f32.mrf.mxu1 }
 0x14b   : > { %5109 = vpow2.f32 %v4569_v10  ;;  %v5797_v27 = vadd.f32 %v5719_v26, %v692_v18  ;;  %v5800_v28 = vadd.f32 %v5719_v26, %v708_v19  ;;  %v697_v29 = vmul.f32 %v4926_v23, %v5714_v24 }
 0x14c   : > { %5111 = vpow2.f32 %v4551_v17  ;;  %v4554_v30 = vmul.f32 -1.442695, %v5791_v21  ;;  %v4570_v31 = vmul.f32 -1.442695, %v5794_v22  ;;  %v713_v32 = vmul.f32 %v4942_v25, %v5714_v24  ;;  %v585_v35 = vpop.f32.mrf.mxu0  ;;  %v649_v36 = vpop.f32.mrf.mxu1 }
 0x14d   : > { %5113 = vpow2.f32 %v4567_v20  ;;  %v4552_v37 = vmul.f32 -1.442695, %v5797_v27  ;;  %v4568_v38 = vmul.f32 -1.442695, %v5800_v28  ;;  %v5809_v39 = vadd.f32 %v5719_v26, %v697_v29 }
 0x14e   : > { %v5092_v40 = vpop.eup %5091  ;;  %5115 = vpow2.f32 %v4554_v30  ;;  %v5812_v43 = vadd.f32 %v5719_v26, %v713_v32  ;;  %v695_v45 = vmul.f32 %v5714_v24, %v585_v35  ;;  %v711_v46 = vmul.f32 %v5714_v24, %v649_v36  ;;  %v4927_v47 = vpop.f32.mrf.mxu0 }
 0x14f   : > { %9278 = vst [vmem:[#allocation13_spill] sm:$0xff] %v5809_v39  ;;  %v4943_v48 = vpop.f32.mrf.mxu1  ;;  %v5094_v49 = vpop.eup %5093  ;;  %v856_v50 = vadd.f32 1.0, %v5092_v40  ;;  %5117 = vpow2.f32 %v4570_v31  ;;  %v5817_v53 = vmul.f32 -1.442695, %v5809_v39  ;;  %v698_v54 = vmul.f32 %v4927_v47, %v5714_v24 }
 0x150   : > { %9279 = vst [vmem:[#allocation14_spill] sm:$0xff] %v5812_v43  ;;  %v5096_v55 = vpop.eup %5095  ;;  %v872_v57 = vadd.f32 1.0, %v5094_v49  ;;  %5119 = vpow2.f32 %v4552_v37  ;;  %v5821_v58 = vmul.f32 -1.442695, %v5812_v43  ;;  %v5824_v59 = vadd.f32 %v5719_v26, %v695_v45  ;;  %v588_v60 = vpop.f32.mrf.mxu0 }
 0x151   : > { %v652_v62 = vpop.f32.mrf.mxu1  ;;  %v5098_v63 = vpop.eup %5097  ;;  %5121 = vrcp.f32 %v856_v50  ;;  %v854_v0 = vadd.f32 1.0, %v5096_v55  ;;  %v5827_v3 = vadd.f32 %v5719_v26, %v711_v46  ;;  %v5830_v5 = vadd.f32 %v5719_v26, %v698_v54 }
 0x152   : > { %9280 = vst [vmem:[#allocation15_spill] sm:$0xff] %v5824_v59  ;;  %5123 = vrcp.f32 %v872_v57  ;;  %v870_v6 = vadd.f32 1.0, %v5098_v63  ;;  %v5833_v7 = vmul.f32 -1.442695, %v5824_v59  ;;  %v714_v8 = vmul.f32 %v4943_v48, %v5714_v24  ;;  %v4930_v9 = vpop.f32.mrf.mxu0 }
 0x153   : > { %9281 = vst [vmem:[#allocation16_spill] sm:$0xff] %v5827_v3  ;;  %9282 = vst [vmem:[#allocation17_spill] sm:$0xff] %v5830_v5  ;;  %v4946_v10 = vpop.f32.mrf.mxu1  ;;  %v5100_v13 = vpop.eup %5099  ;;  %5125 = vrcp.f32 %v854_v0  ;;  %v5837_v14 = vmul.f32 -1.442695, %v5827_v3  ;;  %v5840_v15 = vmul.f32 -1.442695, %v5830_v5  ;;  %v696_v16 = vmul.f32 %v5714_v24, %v588_v60 }
 0x154   : > { %v5102_v17 = vpop.eup %5101  ;;  %5127 = vrcp.f32 %v870_v6  ;;  %v857_v18 = vadd.f32 1.0, %v5100_v13  ;;  %v5844_v19 = vadd.f32 %v5719_v26, %v714_v8  ;;  %v712_v20 = vmul.f32 %v5714_v24, %v652_v62  ;;  %v601_v23 = vpop.f32.mrf.mxu0 }
 0x155   : > { %v5104_v25 = vpop.eup %5103  ;;  %v873_v29 = vadd.f32 1.0, %v5102_v17  ;;  %5129 = vpow2.f32 %v4568_v38  ;;  %v5848_v30 = vadd.f32 %v5719_v26, %v696_v16  ;;  %v701_v31 = vmul.f32 %v4930_v9, %v5714_v24  ;;  %v665_v32 = vpop.f32.mrf.mxu1 }
 0x156   : > { %9283 = vst [vmem:[#allocation18_spill] sm:$0xff] %v5844_v19  ;;  %v5106_v35 = vpop.eup %5105  ;;  %5131 = vrcp.f32 %v857_v18  ;;  %v855_v36 = vadd.f32 1.0, %v5104_v25  ;;  %v5852_v37 = vmul.f32 -1.442695, %v5844_v19  ;;  %v5855_v40 = vadd.f32 %v5719_v26, %v712_v20  ;;  %v4931_v55 = vpop.f32.mrf.mxu0 }
 0x157   : > { %9284 = vst [vmem:[#allocation19_spill] sm:$0xff] %v5848_v30  ;;  %v5108_v45 = vpop.eup %5107  ;;  %5133 = vrcp.f32 %v873_v29  ;;  %v871_v46 = vadd.f32 1.0, %v5106_v35  ;;  %v5858_v38 = vmul.f32 -1.442695, %v5848_v30  ;;  %v5861_v47 = vadd.f32 %v5719_v26, %v701_v31  ;;  %v4947_v0 = vpop.f32.mrf.mxu1 }
 0x158   : > { %9285 = vst [vmem:[#allocation20_spill] sm:$0xff] %v5855_v40  ;;  %v5110_v48 = vpop.eup %5109  ;;  %5135 = vrcp.f32 %v855_v36  ;;  %v860_v49 = vadd.f32 1.0, %v5108_v45  ;;  %v5864_v50 = vmul.f32 -1.442695, %v5855_v40  ;;  %v717_v54 = vmul.f32 %v4946_v10, %v5714_v24  ;;  %v604_v31 = vpop.f32.mrf.mxu0  ;;  %v5067_v40 = vld [vmem:[#allocation8 + $0x58] sm:$0xff]  }
 0x159   : > { %9286 = vst [vmem:[#allocation21_spill] sm:$0xff] %v5861_v47  ;;  %v5112_v57 = vpop.eup %5111  ;;  %5137 = vrcp.f32 %v871_v46  ;;  %v876_v60 = vadd.f32 1.0, %v5110_v48  ;;  %v5868_v62 = vmul.f32 -1.442695, %v5861_v47  ;;  %v699_v63 = vmul.f32 %v5714_v24, %v601_v23  ;;  %v668_v46 = vpop.f32.mrf.mxu1  ;;  %v5059_v48 = vld [vmem:[#allocation8 + $0x78] sm:$0xff]  }
 0x15a   : > { %v5114_v6 = vpop.eup %5113  ;;  %5139 = vrcp.f32 %v860_v49  ;;  %v858_v8 = vadd.f32 1.0, %v5112_v57  ;;  %v5872_v9 = vadd.f32 %v5719_v26, %v717_v54  ;;  %v715_v13 = vmul.f32 %v5714_v24, %v665_v32  ;;  %4788 = vmatprep.subr.bf16.mxu0 %v5059_v48 }
 0x15b   : > { %v5116_v16 = vpop.eup %5115  ;;  %5141 = vrcp.f32 %v876_v60  ;;  %v874_v10 = vadd.f32 1.0, %v5114_v6  ;;  %v5876_v17 = vadd.f32 %v5719_v26, %v699_v63  ;;  %v702_v18 = vmul.f32 %v4931_v55, %v5714_v24  ;;  %v5060_v60 = vld [vmem:[#allocation8 + $0x38] sm:$0xff]  }
 0x15c   : > { %9287 = vst [vmem:[#allocation22_spill] sm:$0xff] %v5872_v9  ;;  %v5118_v20 = vpop.eup %5117  ;;  %5143 = vrcp.f32 %v858_v8  ;;  %v861_v23 = vadd.f32 1.0, %v5116_v16  ;;  %v5880_v25 = vmul.f32 -1.442695, %v5872_v9  ;;  %v5883_v29 = vadd.f32 %v5719_v26, %v715_v13  ;;  %4789 = vmatpush3.bf16.msra.mxu0 %v5060_v60 }
 0x15d   : > { %9288 = vst [vmem:[#allocation23_spill] sm:$0xff] %v5876_v17  ;;  %v5120_v35 = vpop.eup %5119  ;;  %5145 = vrcp.f32 %v874_v10  ;;  %v877_v32 = vadd.f32 1.0, %v5118_v20  ;;  %v5886_v36 = vmul.f32 -1.442695, %v5876_v17  ;;  %v5889_v45 = vadd.f32 %v5719_v26, %v702_v18 }
 0x15e   : > { %9289 = vst [vmem:[#allocation24_spill] sm:$0xff] %v5883_v29  ;;  %v5122_v49 = vpop.eup %5121  ;;  %5147 = vrcp.f32 %v861_v23  ;;  %v859_v54 = vadd.f32 1.0, %v5120_v35  ;;  %v5894_v55 = vmul.f32 -1.442695, %v5883_v29  ;;  %v718_v57 = vmul.f32 %v4947_v0, %v5714_v24  ;;  %v5061_v35 = vld [vmem:[#allocation8 + $0x70] sm:$0xff]  }
 0x15f   : > { %9290 = vst [vmem:[#allocation25_spill] sm:$0xff] %v5889_v45  ;;  %v5124_v63 = vpop.eup %5123  ;;  %v5898_v6 = vmul.f32 %v5122_v49, %v5724_v33  ;;  %5149 = vrcp.f32 %v877_v32  ;;  %v5904_v8 = vmul.f32 -1.442695, %v5889_v45  ;;  %v700_v13 = vmul.f32 %v5714_v24, %v604_v31  ;;  %4790 = vmatprep.subr.bf16.mxu0 %v5061_v35 }
 0x160   : > { %v5126_v16 = vpop.eup %5125  ;;  %v5908_v0 = vmul.f32 %v5124_v63, %v5727_v34  ;;  %5151 = vrcp.f32 %v859_v54  ;;  %v5913_v33 = vadd.f32 %v5719_v26, %v718_v57  ;;  %v5916_v10 = vmul.f32 %v5714_v24, %v668_v46  ;;  %v5062_v46 = vld [vmem:[#allocation8 + $0x30] sm:$0xff]  }
 0x161   : > { %v5128_v18 = vpop.eup %5127  ;;  %v1003_v20 = vrot.slane %v5898_v6, 1  ;;  %v1104_v23 = vrot.slane %v5898_v6, 7  ;;  %v1269_v34 = vrot.slane %v5898_v6, 2  ;;  %v5928_v60 = vmul.f32 %v5126_v16, %v5734_v41  ;;  %4791 = vmatpush3.bf16.msra.mxu0 %v5062_v46  ;;  %v5064_v46 = vld [vmem:[#allocation8 + $0x28] sm:$0xff]  }
 0x162   : > { %9291 = vst [vmem:[#allocation26_spill] sm:$0xff] %v5908_v0  ;;  %9292 = vst [vmem:[#allocation27_spill] sm:$0xff] %v5913_v33  ;;  %v5130_v32 = vpop.eup %5129  ;;  %v5931_v63 = vmul.f32 %v5128_v18, %v5737_v42  ;;  %5153 = vpow2.f32 %v5817_v53  ;;  %v5941_v24 = vmul.f32 -1.442695, %v5913_v33  ;;  %v5944_v41 = vadd.f32 %v5719_v26, %v700_v13 }
 0x163   : > { %v5132_v57 = vpop.eup %5131  ;;  %v5933_v31 = vadd.f32 1.0, %v5130_v32  ;;  %5155 = vpow2.f32 %v5821_v58  ;;  %v9296_v9 = vrot.slane %v5898_v6, 6  ;;  %v9302_v19 = vrot.slane %v5908_v0, 2 }
 0x164   : > { %9293 = vst [vmem:[#allocation28_spill] sm:$0xff] %v5931_v63  ;;  %v5134_v49 = vpop.eup %5133  ;;  %v5937_v54 = vmul.f32 %v5132_v57, %v5747_v51  ;;  %v5063_v51 = vld [vmem:[#allocation8 + $0x68] sm:$0xff]   ;;  %v9314_v39 = vrot.slane %v5928_v60, 6 }
 0x165   : > { %v5136_v42 = vpop.eup %5135  ;;  %4792 = vmatprep.subr.bf16.mxu0 %v5063_v51  ;;  %v5961_v58 = vmul.f32 %v5134_v49, %v5750_v52  ;;  %v9297_v47 = vmov %v9296_v9  ;;  %5157 = vrcp.f32 %v5933_v31  ;;  %v6345_v31 = vadd.f32 %v5719_v26, %v5916_v10  ;;  %v5087_v26 = vld [vmem:[#allocation8 + $0xc8] sm:$0xff]  }
 0x166   : > { %v5138_v32 = vpop.eup %5137  ;;  %v1019_v16 = vrot.slane %v5937_v54, 1  ;;  %v1120_v18 = vrot.slane %v5937_v54, 7  ;;  %v1285_v53 = vrot.slane %v5937_v54, 2  ;;  %v1386_v35 = vrot.slane %v5937_v54, 6  ;;  %4793 = vmatpush3.bf16.msra.mxu0 %v5064_v46 }
 0x167   : > { %v5140_v33 = vpop.eup %5139  ;;  %9294 = vst [vmem:[#allocation29_spill] sm:$0xff] %v5961_v58  ;;  %v5964_v48 = vmul.f32 %v5136_v42, %v5754_v56  ;;  %v5967_v13 = vmul.f32 %v5138_v32, %v5761_v61  ;;  %v5065_v61 = vld [vmem:[#allocation8 + $0x60] sm:$0xff]   ;;  %5159 = vpow2.f32 %v5833_v7  ;;  %v6361_v10 = vmul.f32 -1.442695, %v6345_v31 }
 0x168   : > { %v5958_v45 = vpop.eup %5141  ;;  %v5970_v57 = vmul.f32 %v5140_v33, %v5765_v1  ;;  %v1036_v51 = vsel %vm1034_vm0, %v1003_v20, %v1019_v16  ;;  %v1052_v17 = vsel %vm1034_vm0, %v1019_v16, %v1003_v20  ;;  %v1137_v52 = vsel %vm1135_vm1, %v1104_v23, %v1120_v18  ;;  %v5066_v16 = vld [vmem:[#allocation8 + $0x20] sm:$0xff]   ;;  %4794 = vmatprep.subr.bf16.mxu0 %v5065_v61 }
 0x169   : > { %9295 = vst [vmem:[#allocation30_spill] sm:$0xff] %v5967_v13  ;;  %v5972_v29 = vpop.eup %5143  ;;  %v1153_v56 = vsel %vm1135_vm1, %v1120_v18, %v1104_v23  ;;  %v1074_v1 = vsel %vm997_vm3, %v1052_v17, -inf  ;;  %v1302_v42 = vsel %vm1300_vm4, %v1269_v34, %v1285_v53  ;;  %v1318_v20 = vsel %vm1300_vm4, %v1285_v53, %v1269_v34 }
 0x16a   : > { %v5982_v49 = vpop.eup %5145  ;;  %v1174_v33 = vsel %vm994_vm2, %v1153_v56, -inf  ;;  %v1207_v23 = vmax.f32 %v1137_v52, %v1074_v1  ;;  %v1340_v18 = vsel %vm1001_vm5, %v1318_v20, -inf  ;;  %v1403_v17 = vsel %vm1401_vm6, %v9296_v9, %v1386_v35  ;;  %4795 = vmatpush3.bf16.msra.mxu0 %v5066_v16 }
 0x16b   : > { %v5992_v32 = vpop.eup %5147  ;;  %v1206_v46 = vmax.f32 %v1174_v33, %v1036_v51  ;;  %v1419_v34 = vsel %vm1401_vm6, %v1386_v35, %v9297_v47  ;;  %v1473_v53 = vmax.f32 %v1403_v17, %v1340_v18  ;;  %v1027_v51 = vrot.slane %v5961_v58, 1  ;;  %v5068_v17 = vld [vmem:[#allocation8 + $0x18] sm:$0xff]   ;;  %4796 = vmatprep.subr.bf16.mxu0 %v5067_v40 }
 0x16c   : > { %v6000_v56 = vpop.eup %5149  ;;  %v1128_v52 = vrot.slane %v5961_v58, 7  ;;  %v1239_v9 = vmax.f32 %v5937_v54, %v1207_v23  ;;  %v1440_v61 = vsel %vm998_vm7, %v1419_v34, -inf  ;;  %v1293_v20 = vrot.slane %v5961_v58, 2 }
 0x16d   : > { %v6008_v1 = vpop.eup %5151  ;;  %v1238_v33 = vmax.f32 %v5898_v6, %v1206_v46  ;;  %v1472_v30 = vmax.f32 %v1440_v61, %v1302_v42  ;;  %v9298_v47 = vrot.slane %v5908_v0, 1  ;;  %v9300_v46 = vrot.slane %v5908_v0, 7 }
 0x16e   : > { %v6027_v34 = vmax.f32 %v1239_v9, %v1473_v53  ;;  %4797 = vmatpush3.bf16.msra.mxu0 %v5068_v17  ;;  %v1394_v40 = vrot.slane %v5961_v58, 6  ;;  %v5070_v17 = vld [vmem:[#allocation8 + $0x10] sm:$0xff]  }
 0x16f   : > { %v1044_v35 = vsel %vm1034_vm0, %v9298_v47, %v1027_v51  ;;  %v9299_v16 = vmov %v9298_v47  ;;  %v1145_v23 = vsel %vm1135_vm1, %v9300_v46, %v1128_v52  ;;  %v9301_v61 = vmov %v9300_v46 }
 0x170   : > { %v1060_v18 = vsel %vm1034_vm0, %v1027_v51, %v9299_v16  ;;  %v1161_v47 = vsel %vm1135_vm1, %v1128_v52, %v9301_v61  ;;  %v1310_v51 = vsel %vm1300_vm4, %v9302_v19, %v1293_v20  ;;  %v6039_v16 = vpop.eup %5153  ;;  %v6041_v46 = vmax.f32 %v1238_v33, %v1472_v30  ;;  %v5069_v33 = vld [vmem:[#allocation8 + $0x50] sm:$0xff]  }
 0x171   : > { %v1090_v42 = vsel %vm997_vm3, %v1060_v18, -inf  ;;  %v1190_v53 = vsel %vm994_vm2, %v1161_v47, -inf  ;;  %v9303_v18 = vmov %v9302_v19  ;;  %v6049_v52 = vpop.eup %5155  ;;  %v1018_v30 = vrot.slane %v5964_v48, 1  ;;  %4798 = vmatprep.subr.bf16.mxu0 %v5069_v33 }
 0x172   : > { %v1223_v9 = vmax.f32 %v1145_v23, %v1090_v42  ;;  %v1326_v5 = vsel %vm1300_vm4, %v1293_v20, %v9303_v18  ;;  %v1222_v61 = vmax.f32 %v1190_v53, %v1044_v35  ;;  %v1119_v23 = vrot.slane %v5964_v48, 7  ;;  %4799 = vmatpush3.bf16.msra.mxu0 %v5070_v17 }
 0x173   : > { %v1356_v19 = vsel %vm1001_vm5, %v1326_v5, -inf  ;;  %v1284_v42 = vrot.slane %v5964_v48, 2  ;;  %v1385_v20 = vrot.slane %v5964_v48, 6  ;;  %v9304_v35 = vrot.slane %v5908_v0, 6 }
 0x174   : > { %v1255_v47 = vmax.f32 %v5961_v58, %v1223_v9  ;;  %v1254_v18 = vmax.f32 %v5908_v0, %v1222_v61  ;;  %v9306_v9 = vrot.slane %v5928_v60, 1  ;;  %v9308_v0 = vrot.slane %v5928_v60, 7 }
 0x175   : > { %v1411_v5 = vsel %vm1401_vm6, %v9304_v35, %v1394_v40  ;;  %v9305_v53 = vmov %v9304_v35 }
 0x176   : > { %v1427_v3 = vsel %vm1401_vm6, %v1394_v40, %v9305_v53  ;;  %v1035_v58 = vsel %vm1034_vm0, %v9306_v9, %v1018_v30  ;;  %v1489_v61 = vmax.f32 %v1411_v5, %v1356_v19  ;;  %v9307_v43 = vmov %v9306_v9 }
 0x177   : > { %v1456_v59 = vsel %vm998_vm7, %v1427_v3, -inf  ;;  %v1051_v35 = vsel %vm1034_vm0, %v1018_v30, %v9307_v43  ;;  %v1136_v40 = vsel %vm1135_vm1, %v9308_v0, %v1119_v23  ;;  %v9309_v33 = vmov %v9308_v0  ;;  %v5071_v30 = vld [vmem:[#allocation8 + $0x48] sm:$0xff]  }
 0x178   : > { %v1488_v53 = vmax.f32 %v1456_v59, %v1310_v51  ;;  %v1072_v9 = vsel %vm997_vm3, %v1051_v35, -inf  ;;  %v1152_v3 = vsel %vm1135_vm1, %v1119_v23, %v9309_v33  ;;  %v9310_v19 = vrot.slane %v5928_v60, 2  ;;  %v5072_v35 = vld [vmem:[#allocation8 + $0x8] sm:$0xff]   ;;  %4800 = vmatprep.subr.bf16.mxu0 %v5071_v30  ;;  %v5073_v30 = vld [vmem:[#allocation8 + $0x40] sm:$0xff]  }
 0x179   : > { %v6094_v5 = vmax.f32 %v1255_v47, %v1489_v61  ;;  %v1172_v59 = vsel %vm994_vm2, %v1152_v3, -inf  ;;  %v1205_v0 = vmax.f32 %v1136_v40, %v1072_v9  ;;  %v1402_v47 = vsel %vm1401_vm6, %v9314_v39, %v1385_v20  ;;  %4801 = vmatpush3.bf16.msra.mxu0 %v5072_v35 }
 0x17a   : > { %v6092_v43 = vsel %vm1300_vm4, %v9310_v19, %v1284_v42  ;;  %v9312_v51 = vmov %v9310_v19  ;;  %v6102_v23 = vmax.f32 %v1254_v18, %v1488_v53  ;;  %v1204_v33 = vmax.f32 %v1172_v59, %v1035_v58  ;;  %4802 = vmatprep.subr.bf16.mxu0 %v5073_v30 }
 0x17b   : > { %9311 = vst [vmem:[#allocation31_spill] sm:$0xff] %v6094_v5  ;;  %v1317_v17 = vsel %vm1300_vm4, %v1284_v42, %v9312_v51  ;;  %v1237_v61 = vmax.f32 %v5964_v48, %v1205_v0  ;;  %v9315_v40 = vmov %v9314_v39  ;;  %v1026_v18 = vrot.slane %v5967_v13, 1 }
 0x17c   : > { %9313 = vst [vmem:[#allocation32_spill] sm:$0xff] %v6102_v23  ;;  %v1338_v19 = vsel %vm1001_vm5, %v1317_v17, -inf  ;;  %v1418_v42 = vsel %vm1401_vm6, %v1385_v20, %v9315_v40  ;;  %v6117_v58 = vmax.f32 %v5928_v60, %v1204_v33  ;;  %v1127_v39 = vrot.slane %v5967_v13, 7  ;;  %v5074_v33 = vld [vmem:[#allocation8] sm:$0xff]  }
 0x17d   : > { %v1471_v9 = vmax.f32 %v1402_v47, %v1338_v19  ;;  %v6121_v53 = vsel %vm998_vm7, %v1418_v42, -inf  ;;  %v1292_v3 = vrot.slane %v5967_v13, 2  ;;  %v9316_v0 = vrot.slane %v5931_v63, 1  ;;  %4803 = vmatpush3.bf16.msra.mxu0 %v5074_v33 }
 0x17e   : > { %v9318_v47 = vrot.slane %v5931_v63, 7  ;;  %v1393_v59 = vrot.slane %v5967_v13, 6  ;;  %v1106_v30 = vrot.slane %v5970_v57, 7 }
 0x17f   : > { %v6127_v20 = vmax.f32 %v1237_v61, %v1471_v9  ;;  %v1043_v51 = vsel %vm1034_vm0, %v9316_v0, %v1026_v18  ;;  %v9317_v17 = vmov %v9316_v0  ;;  %v9320_v9 = vrot.slane %v5931_v63, 2 }
 0x180   : > { %v1059_v35 = vsel %vm1034_vm0, %v1026_v18, %v9317_v17  ;;  %v1144_v61 = vsel %vm1135_vm1, %v9318_v47, %v1127_v39  ;;  %v9319_v40 = vmov %v9318_v47 }
 0x181   : > { %v1088_v19 = vsel %vm997_vm3, %v1059_v35, -inf  ;;  %v1160_v42 = vsel %vm1135_vm1, %v1127_v39, %v9319_v40  ;;  %v1309_v0 = vsel %vm1300_vm4, %v9320_v9, %v1292_v3  ;;  %v9321_v35 = vmov %v9320_v9 }
 0x182   : > { %v1188_v18 = vsel %vm994_vm2, %v1160_v42, -inf  ;;  %v1221_v17 = vmax.f32 %v1144_v61, %v1088_v19  ;;  %v1325_v47 = vsel %vm1300_vm4, %v1292_v3, %v9321_v35  ;;  %v1005_v40 = vrot.slane %v5970_v57, 1 }
 0x183   : > { %v1220_v5 = vmax.f32 %v1188_v18, %v1043_v51  ;;  %v1354_v39 = vsel %vm1001_vm5, %v1325_v47, -inf  ;;  %v9322_v19 = vrot.slane %v5931_v63, 6  ;;  %v1271_v51 = vrot.slane %v5970_v57, 2 }
 0x184   : > { %v1253_v9 = vmax.f32 %v5967_v13, %v1221_v17  ;;  %v1372_v17 = vrot.slane %v5970_v57, 6  ;;  %v6178_v13 = vmul.f32 %v5958_v45, %v5768_v2  ;;  %v6200_v2 = vmul.f32 %v6008_v1, %v5797_v27  ;;  %v5076_v1 = vld [vmem:[#allocation8 + $0xb8] sm:$0xff]  }
 0x185   : > { %v1410_v61 = vsel %vm1401_vm6, %v9322_v19, %v1393_v59  ;;  %v9323_v3 = vmov %v9322_v19  ;;  %v1252_v42 = vmax.f32 %v5931_v63, %v1220_v5  ;;  %v6182_v19 = vmul.f32 %v5972_v29, %v5779_v11 }
 0x186   : > { %v1426_v33 = vsel %vm1401_vm6, %v1393_v59, %v9323_v3  ;;  %v1487_v35 = vmax.f32 %v1410_v61, %v1354_v39  ;;  %9324 = vst [vmem:[#allocation33_spill] sm:$0xff] %v6178_v13  ;;  %v6186_v59 = vmul.f32 %v5982_v49, %v5782_v12  ;;  %v6192_v39 = vmul.f32 %v5992_v32, %v5791_v21  ;;  %v5077_v21 = vld [vmem:[#allocation8 + $0xf0] sm:$0xff]  }
 0x187   : > { %v1454_v18 = vsel %vm998_vm7, %v1426_v33, -inf  ;;  %v1013_v29 = vrot.slane %v6178_v13, 1  ;;  %v1114_v12 = vrot.slane %v6178_v13, 7  ;;  %v1279_v45 = vrot.slane %v6178_v13, 2 }
 0x188   : > { %v1486_v47 = vmax.f32 %v1454_v18, %v1309_v0  ;;  %9325 = vst [vmem:[#allocation34_spill] sm:$0xff] %v6186_v59  ;;  %v6188_v5 = vmax.f32 %v1253_v9, %v1487_v35  ;;  %v6196_v0 = vmul.f32 %v6000_v56, %v5794_v22  ;;  %v1021_v3 = vrot.slane %v6192_v39, 1  ;;  %v5075_v18 = vld [vmem:[#allocation8 + $0xf8] sm:$0xff]  }
 0x189   : > { %v1122_v33 = vrot.slane %v6192_v39, 7  ;;  %v1388_v35 = vrot.slane %v6192_v39, 6  ;;  %4676 = vmatprep.subr.bf16.mxu1 %v5075_v18  ;;  %v1730_v7 = vmax.f32 %v6127_v20, %v6027_v34 }
 0x18a   : > { %9326 = vst [vmem:[#allocation35_spill] sm:$0xff] %v6188_v5  ;;  %9327 = vst [vmem:[#allocation36_spill] sm:$0xff] %v6196_v0  ;;  %v6202_v11 = vmax.f32 %v1252_v42, %v1486_v47  ;;  %v1287_v42 = vrot.slane %v6192_v39, 2  ;;  %v1029_v47 = vrot.slane %v6196_v0, 1  ;;  %v1130_v56 = vrot.slane %v6196_v0, 7  ;;  %4677 = vmatpush3.bf16.msra.mxu1 %v5076_v1 }
 0x18b   : > { %v1295_v27 = vrot.slane %v6196_v0, 2  ;;  %v1038_v9 = vsel %vm1034_vm0, %v1005_v40, %v1021_v3  ;;  %v1054_v61 = vsel %vm1034_vm0, %v1021_v3, %v1005_v40  ;;  %v1139_v22 = vsel %vm1135_vm1, %v1106_v30, %v1122_v33  ;;  %v5078_v3 = vld [vmem:[#allocation8 + $0xb0] sm:$0xff]   ;;  %4678 = vmatprep.subr.bf16.mxu1 %v5077_v21 }
 0x18c   : > { %9328 = vst [vmem:[#allocation37_spill] sm:$0xff] %v6202_v11  ;;  %v1155_v32 = vsel %vm1135_vm1, %v1122_v33, %v1106_v30  ;;  %v1078_v49 = vsel %vm997_vm3, %v1054_v61, -inf  ;;  %v1304_v23 = vsel %vm1300_vm4, %v1271_v51, %v1287_v42  ;;  %v1320_v40 = vsel %vm1300_vm4, %v1287_v42, %v1271_v51  ;;  %v5079_v61 = vld [vmem:[#allocation8 + $0xe8] sm:$0xff]  }
 0x18d   : > { %v1178_v63 = vsel %vm994_vm2, %v1155_v32, -inf  ;;  %v1211_v11 = vmax.f32 %v1139_v22, %v1078_v49  ;;  %v1344_v30 = vsel %vm1001_vm5, %v1320_v40, -inf  ;;  %v1405_v33 = vsel %vm1401_vm6, %v1372_v17, %v1388_v35 }
 0x18e   : > { %v1210_v5 = vmax.f32 %v1178_v63, %v1038_v9  ;;  %v1421_v32 = vsel %vm1401_vm6, %v1388_v35, %v1372_v17  ;;  %v1477_v18 = vmax.f32 %v1405_v33, %v1344_v30  ;;  %v1046_v59 = vsel %vm1034_vm0, %v1013_v29, %v1029_v47  ;;  %4679 = vmatpush3.bf16.msra.mxu1 %v5078_v3 }
 0x18f   : > { %v1062_v51 = vsel %vm1034_vm0, %v1029_v47, %v1013_v29  ;;  %v1243_v49 = vmax.f32 %v6192_v39, %v1211_v11  ;;  %v1444_v22 = vsel %vm998_vm7, %v1421_v32, -inf  ;;  %v1147_v17 = vsel %vm1135_vm1, %v1114_v12, %v1130_v56  ;;  %4680 = vmatprep.subr.bf16.mxu1 %v5079_v61  ;;  %v5081_v47 = vld [vmem:[#allocation8 + $0xe0] sm:$0xff]  }
 0x190   : > { %v1242_v63 = vmax.f32 %v5970_v57, %v1210_v5  ;;  %v1094_v21 = vsel %vm997_vm3, %v1062_v51, -inf  ;;  %v1476_v1 = vmax.f32 %v1444_v22, %v1304_v23  ;;  %v1163_v9 = vsel %vm1135_vm1, %v1130_v56, %v1114_v12  ;;  %v5080_v5 = vld [vmem:[#allocation8 + $0xa8] sm:$0xff]  }
 0x191   : > { %v1312_v29 = vsel %vm1300_vm4, %v1279_v45, %v1295_v27  ;;  %v6261_v42 = vmax.f32 %v1243_v49, %v1477_v18  ;;  %v1194_v11 = vsel %vm994_vm2, %v1163_v9, -inf  ;;  %v1227_v35 = vmax.f32 %v1147_v17, %v1094_v21  ;;  %v5082_v49 = vld [vmem:[#allocation8 + $0xa0] sm:$0xff]  }
 0x192   : > { %v1328_v23 = vsel %vm1300_vm4, %v1295_v27, %v1279_v45  ;;  %v6267_v40 = vmax.f32 %v1242_v63, %v1476_v1  ;;  %v1226_v30 = vmax.f32 %v1194_v11, %v1046_v59  ;;  %v1396_v56 = vrot.slane %v6196_v0, 6  ;;  %4681 = vmatpush3.bf16.msra.mxu1 %v5080_v5 }
 0x193   : > { %v1360_v12 = vsel %vm1001_vm5, %v1328_v23, -inf  ;;  %v1259_v3 = vmax.f32 %v6196_v0, %v1227_v35  ;;  %v1020_v33 = vrot.slane %v6200_v2, 1  ;;  %v1121_v32 = vrot.slane %v6200_v2, 7  ;;  %4682 = vmatprep.subr.bf16.mxu1 %v5081_v47  ;;  %v5083_v35 = vld [vmem:[#allocation8 + $0xd8] sm:$0xff]  }
 0x194   : > { %v1286_v18 = vrot.slane %v6200_v2, 2  ;;  %v1258_v45 = vmax.f32 %v6178_v13, %v1226_v30  ;;  %v9329_v27 = vrot.slane %v6178_v13, 6  ;;  %v1387_v63 = vrot.slane %v6200_v2, 6 }
 0x195   : > { %v9331_v1 = vrot.slane %v6182_v19, 1  ;;  %v9333_v30 = vrot.slane %v6182_v19, 7 }
 0x196   : > { %v1413_v59 = vsel %vm1401_vm6, %v9329_v27, %v1396_v56  ;;  %v9330_v61 = vmov %v9329_v27  ;;  %4683 = vmatpush3.bf16.msra.mxu1 %v5082_v49 }
 0x197   : > { %v1429_v51 = vsel %vm1401_vm6, %v1396_v56, %v9330_v61  ;;  %v1493_v21 = vmax.f32 %v1413_v59, %v1360_v12  ;;  %v1037_v17 = vsel %vm1034_vm0, %v9331_v1, %v1020_v33  ;;  %v9332_v9 = vmov %v9331_v1  ;;  %4684 = vmatprep.subr.bf16.mxu1 %v5083_v35 }
 0x198   : > { %v1460_v22 = vsel %vm998_vm7, %v1429_v51, -inf  ;;  %v1053_v11 = vsel %vm1034_vm0, %v1020_v33, %v9332_v9  ;;  %v1138_v12 = vsel %vm1135_vm1, %v9333_v30, %v1121_v32  ;;  %v9334_v56 = vmov %v9333_v30 }
 0x199   : > { %v1492_v23 = vmax.f32 %v1460_v22, %v1312_v29  ;;  %v1076_v5 = vsel %vm997_vm3, %v1053_v11, -inf  ;;  %v1154_v27 = vsel %vm1135_vm1, %v1121_v32, %v9334_v56  ;;  %v6306_v59 = vmax.f32 %v1259_v3, %v1493_v21  ;;  %v5084_v21 = vld [vmem:[#allocation8 + $0x98] sm:$0xff]  }
 0x19a   : > { %v1176_v47 = vsel %vm994_vm2, %v1154_v27, -inf  ;;  %v1209_v33 = vmax.f32 %v1138_v12, %v1076_v5  ;;  %v9336_v29 = vrot.slane %v6182_v19, 2  ;;  %v9339_v3 = vrot.slane %v6182_v19, 6  ;;  %v5085_v12 = vld [vmem:[#allocation8 + $0xd0] sm:$0xff]   ;;  %4685 = vmatpush3.bf16.msra.mxu1 %v5084_v21 }
 0x19b   : > { %9335 = vst [vmem:[#allocation38_spill] sm:$0xff] %v6306_v59  ;;  %v6314_v51 = vmax.f32 %v1258_v45, %v1492_v23  ;;  %v1208_v22 = vmax.f32 %v1176_v47, %v1037_v17  ;;  %v864_v30 = vadd.f32 1.0, %v6039_v16  ;;  %v880_v27 = vadd.f32 1.0, %v6049_v52  ;;  %v5086_v52 = vld [vmem:[#allocation8 + $0x90] sm:$0xff]   ;;  %4686 = vmatprep.subr.bf16.mxu1 %v5085_v12 }
 0x19c   : > { %v1303_v61 = vsel %vm1300_vm4, %v9336_v29, %v1286_v18  ;;  %v9338_v1 = vmov %v9336_v29  ;;  %v1404_v32 = vsel %vm1401_vm6, %v9339_v3, %v1387_v63  ;;  %v1241_v11 = vmax.f32 %v6200_v2, %v1209_v33 }
 0x19d   : > { %9337 = vst [vmem:[#allocation39_spill] sm:$0xff] %v6314_v51  ;;  %v1319_v9 = vsel %vm1300_vm4, %v1286_v18, %v9338_v1  ;;  %v9340_v45 = vmov %v9339_v3  ;;  %v1240_v18 = vmax.f32 %v6182_v19, %v1208_v22  ;;  %v6339_v47 = vmul.f32 -1.442695, %v5944_v41 }
 0x19e   : > { %v1342_v5 = vsel %vm1001_vm5, %v1319_v9, -inf  ;;  %v1420_v17 = vsel %vm1401_vm6, %v1387_v63, %v9340_v45  ;;  %5161 = vrcp.f32 %v864_v30  ;;  %v9341_v35 = vmax.f32 %v6121_v53, %v6092_v43  ;;  %4687 = vmatpush3.bf16.msra.mxu1 %v5086_v52  ;;  %v5089_v45 = vld [vmem:[#allocation8 + $0xc0] sm:$0xff]   ;;  %v5158_v30 = vpop.eup %5157 }
 0x19f   : > { %v1442_v23 = vsel %vm998_vm7, %v1420_v17, -inf  ;;  %v1475_v49 = vmax.f32 %v1404_v32, %v1342_v5  ;;  %5163 = vrcp.f32 %v880_v27  ;;  %v1858_v29 = vpack.c.bf16 %v5964_v48, %v5928_v60  ;;  %4688 = vmatprep.subr.bf16.mxu1 %v5087_v26 }
 0x1a0   : > { %v1474_v56 = vmax.f32 %v1442_v23, %v1303_v61  ;;  %v6351_v16 = vmax.f32 %v6117_v58, %v9341_v35  ;;  %5165 = vpow2.f32 %v5837_v14  ;;  %v1667_v48 = vmax.f32 %v6027_v34, %v6127_v20 }
 0x1a1   : > { %v6341_v63 = vmax.f32 %v1241_v11, %v1475_v49  ;;  %5167 = vpow2.f32 %v5840_v15  ;;  %v1860_v14 = vpack.c.bf16 %v5937_v54, %v5898_v6  ;;  %v5088_v15 = vld [vmem:[#allocation8 + $0x88] sm:$0xff]  }
 0x1a2   : > { %v6353_v33 = vmax.f32 %v1240_v18, %v1474_v56  ;;  %v1729_v43 = vmax.f32 %v6351_v16, %v6041_v46  ;;  %v1666_v58 = vmax.f32 %v6041_v46, %v6351_v16  ;;  %5169 = vpow2.f32 %v5852_v37  ;;  %4689 = vmatpush3.bf16.msra.mxu1 %v5088_v15  ;;  %v9343_v15 = vld [vmem:[#allocation13_spill] sm:$0xff] }
 0x1a3   : > { %v6369_v53 = vmax.f32 %v1730_v7, %v6341_v63  ;;  %5171 = vpow2.f32 %v5858_v38  ;;  %v1732_v49 = vmax.f32 %v1667_v48, %v6341_v63  ;;  %4690 = vmatprep.subr.bf16.mxu1 %v5089_v45  ;;  %v5160_v7 = vpop.eup %5159 }
 0x1a4   : > { %v6377_v60 = vmax.f32 %v1729_v43, %v6353_v33  ;;  %v1731_v61 = vmax.f32 %v1666_v58, %v6353_v33  ;;  %v1603_v22 = vmax.f32 %v6353_v33, %v6351_v16  ;;  %5173 = vpow2.f32 %v5864_v50 }
 0x1a5   : > { %v1906_v1 = vrot.slane %v6369_v53, 1  ;;  %v2002_v9 = vrot.slane %v6369_v53, 7  ;;  %5175 = vpow2.f32 %v5868_v62  ;;  %v5090_v62 = vld [vmem:[#allocation8 + $0x80] sm:$0xff]   ;;  %v6419_v52 = vmax.f32 %v1732_v49, %v6261_v42 }
 0x1a6   : > { %v1859_v37 = vpack.c.bf16 %v6369_v53, %v6377_v60  ;;  %v1890_v32 = vrot.slane %v6377_v60, 1  ;;  %v1986_v21 = vrot.slane %v6377_v60, 7  ;;  %5177 = vpow2.f32 %v5880_v25  ;;  %4691 = vmatpush3.bf16.msra.mxu1 %v5090_v62 }
 0x1a7   : > { %5179 = vpow2.f32 %v5886_v36  ;;  %v6412_v27 = vmax.f32 %v1731_v61, %v6267_v40  ;;  %v6415_v36 = vmul.f32 %v5158_v30, %v5800_v28 }
 0x1a8   : > { %v1922_v50 = vsel %vm1034_vm0, %v1890_v32, %v1906_v1  ;;  %v1938_v17 = vsel %vm1034_vm0, %v1906_v1, %v1890_v32  ;;  %v2018_v18 = vsel %vm1135_vm1, %v1986_v21, %v2002_v9  ;;  %3939 = vmatprep.mubr.bf16.mxu0 %v1859_v37  ;;  %v2034_v25 = vsel %vm1135_vm1, %v2002_v9, %v1986_v21  ;;  %v9344_v32 = vld [vmem:[#allocation34_spill] sm:$0xff] }
 0x1a9   : > { %v1955_v23 = vsel %vm997_vm3, %v1938_v17, -inf  ;;  %3940 = vmatmul.mubr.bf16.vlgmr.msra.gmra.mxu0 %v1858_v29  ;;  %5181 = vpow2.f32 %v5894_v55  ;;  %v2050_v12 = vsel %vm994_vm2, %v2034_v25, -inf  ;;  %9342 = vst [vmem:[#allocation40_spill] sm:$0xff] %v6415_v36  ;;  %v1891_v29 = vrot.slane %v6412_v27, 1 }
 0x1aa   : > { %v2083_v56 = vmax.f32 %v2018_v18, %v1955_v23  ;;  %5183 = vpow2.f32 %v5904_v8  ;;  %v2082_v35 = vmax.f32 %v2050_v12, %v1922_v50  ;;  %v1987_v26 = vrot.slane %v6412_v27, 7 }
 0x1ab   : > { %5185 = vpow2.f32 %v5941_v24  ;;  %v5162_v43 = vpop.eup %5161  ;;  %v1028_v28 = vrot.slane %v6415_v36, 1  ;;  %v1129_v8 = vrot.slane %v6415_v36, 7  ;;  %v1294_v58 = vrot.slane %v6415_v36, 2 }
 0x1ac   : > { %v6423_v55 = vmax.f32 %v6369_v53, %v2083_v56  ;;  %v1395_v48 = vrot.slane %v6415_v36, 6  ;;  %v5164_v61 = vpop.eup %5163  ;;  %v6432_v24 = vmul.f32 %v5162_v43, %v9343_v15  ;;  %v862_v1 = vadd.f32 1.0, %v5160_v7 }
 0x1ad   : > { %5187 = vpow2.f32 %v6339_v47  ;;  %v6436_v9 = vmax.f32 %v6377_v60, %v2082_v35  ;;  %v5166_v37 = vpop.eup %5165  ;;  %v9345_v21 = vrot.slane %v9344_v32, 1  ;;  %v9347_v18 = vrot.slane %v9344_v32, 7 }
 0x1ae   : > { %v5168_v25 = vpop.eup %5167  ;;  %v9349_v12 = vrot.slane %v9344_v32, 2  ;;  %v1374_v11 = vrot.slane %v6432_v24, 6  ;;  %5189 = vrcp.f32 %v862_v1  ;;  %v878_v5 = vadd.f32 1.0, %v5166_v37 }
 0x1af   : > { %v1045_v45 = vsel %vm1034_vm0, %v9345_v21, %v1028_v28  ;;  %v9346_v50 = vmov %v9345_v21  ;;  %v1146_v62 = vsel %vm1135_vm1, %v9347_v18, %v1129_v8  ;;  %v9348_v47 = vmov %v9347_v18  ;;  %v5170_v43 = vpop.eup %5169 }
 0x1b0   : > { %v1061_v17 = vsel %vm1034_vm0, %v1028_v28, %v9346_v50  ;;  %v1162_v23 = vsel %vm1135_vm1, %v1129_v8, %v9348_v47  ;;  %v1311_v56 = vsel %vm1300_vm4, %v9349_v12, %v1294_v58  ;;  %v9350_v35 = vmov %v9349_v12 }
 0x1b1   : > { %v1092_v49 = vsel %vm997_vm3, %v1061_v17, -inf  ;;  %v1192_v30 = vsel %vm994_vm2, %v1162_v23, -inf  ;;  %v1327_v7 = vsel %vm1300_vm4, %v1294_v58, %v9350_v35  ;;  %v9351_v21 = vrot.slane %v9344_v32, 6  ;;  %v5172_v17 = vpop.eup %5171 }
 0x1b2   : > { %v1224_v28 = vmax.f32 %v1192_v30, %v1045_v45  ;;  %v1225_v8 = vmax.f32 %v1146_v62, %v1092_v49  ;;  %v1358_v15 = vsel %vm1001_vm5, %v1327_v7, -inf  ;;  %v1007_v58 = vrot.slane %v6432_v24, 1  ;;  %v5174_v62 = vpop.eup %5173 }
 0x1b3   : > { %v1412_v50 = vsel %vm1401_vm6, %v9351_v21, %v1395_v48  ;;  %v9352_v18 = vmov %v9351_v21  ;;  %v1108_v45 = vrot.slane %v6432_v24, 7  ;;  %v5176_v7 = vpop.eup %5175  ;;  %v881_v38 = vadd.f32 1.0, %v5170_v43 }
 0x1b4   : > { %v1428_v47 = vsel %vm1401_vm6, %v1395_v48, %v9352_v18  ;;  %v1491_v23 = vmax.f32 %v1412_v50, %v1358_v15  ;;  %v1256_v49 = vmax.f32 %v9344_v32, %v1224_v28  ;;  %v1257_v30 = vmax.f32 %v6415_v36, %v1225_v8  ;;  %v9353_v48 = vld [vmem:[#allocation14_spill] sm:$0xff]  ;;  %v5178_v50 = vpop.eup %5177 }
 0x1b5   : > { %v1458_v12 = vsel %vm998_vm7, %v1428_v47, -inf  ;;  %v6485_v15 = vmul.f32 %v5164_v61, %v9353_v48  ;;  %v865_v28 = vadd.f32 1.0, %v5168_v25  ;;  %v5180_v8 = vpop.eup %5179  ;;  %5191 = vrcp.f32 %v878_v5 }
 0x1b6   : > { %v1490_v21 = vmax.f32 %v1458_v12, %v1311_v56  ;;  %v6487_v18 = vmax.f32 %v1257_v30, %v1491_v23  ;;  %v5182_v12 = vpop.eup %5181  ;;  %v863_v1 = vadd.f32 1.0, %v5172_v17  ;;  %v879_v48 = vadd.f32 1.0, %v5174_v62 }
 0x1b7   : > { %9354 = vst [vmem:[#allocation13_spill] sm:$0xff] %v6485_v15  ;;  %v5184_v23 = vpop.eup %5183  ;;  %5193 = vrcp.f32 %v865_v28  ;;  %v868_v37 = vadd.f32 1.0, %v5176_v7  ;;  %v884_v25 = vadd.f32 1.0, %v5178_v50  ;;  %v866_v43 = vadd.f32 1.0, %v5180_v8 }
 0x1b8   : > { %v6489_v3 = vmax.f32 %v1256_v49, %v1490_v21  ;;  %v5186_v30 = vpop.eup %5185  ;;  %5195 = vrcp.f32 %v881_v38  ;;  %v882_v49 = vadd.f32 1.0, %v5182_v12  ;;  %v869_v21 = vadd.f32 1.0, %v5184_v23 }
 0x1b9   : > { %v1861_v35 = vpack.c.bf16 %v6419_v52, %v6412_v27  ;;  %5197 = vrcp.f32 %v863_v1  ;;  %v885_v56 = vadd.f32 1.0, %v5186_v30  ;;  %v1907_v47 = vrot.slane %v6419_v52, 1 }
 0x1ba   : > { %v2003_v5 = vrot.slane %v6419_v52, 7  ;;  %v5188_v17 = vpop.eup %5187  ;;  %5199 = vrcp.f32 %v879_v48  ;;  %v2147_v62 = vrot.slane %v6412_v27, 2  ;;  %v2163_v7 = vrot.slane %v6419_v52, 2 }
 0x1bb   : > { %v2243_v50 = vrot.slane %v6412_v27, 6  ;;  %3947 = vmatprep.mubr.bf16.mxu0 %v1861_v35  ;;  %5201 = vrcp.f32 %v868_v37  ;;  %v867_v38 = vadd.f32 1.0, %v5188_v17  ;;  %v1923_v28 = vsel %vm1034_vm0, %v1891_v29, %v1907_v47 }
 0x1bc   : > { %v1939_v8 = vsel %vm1034_vm0, %v1907_v47, %v1891_v29  ;;  %3948 = vmatmul.mubr.bf16.gmra.mxu0 %v1860_v14  ;;  %5203 = vrcp.f32 %v884_v25  ;;  %v2019_v12 = vsel %vm1135_vm1, %v1987_v26, %v2003_v5  ;;  %v2035_v1 = vsel %vm1135_vm1, %v2003_v5, %v1987_v26  ;;  %v5190_v25 = vpop.eup %5189  ;;  %v9355_v5 = vld [vmem:[#allocation15_spill] sm:$0xff] }
 0x1bd   : > { %v1957_v35 = vsel %vm997_vm3, %v1939_v8, -inf  ;;  %5205 = vrcp.f32 %v866_v43  ;;  %v2052_v29 = vsel %vm994_vm2, %v2035_v1, -inf  ;;  %v2179_v54 = vsel %vm1300_vm4, %v2147_v62, %v2163_v7  ;;  %v9356_v8 = vld [vmem:[#allocation16_spill] sm:$0xff] }
 0x1be   : > { %v2085_v6 = vmax.f32 %v2019_v12, %v1957_v35  ;;  %5207 = vrcp.f32 %v882_v49  ;;  %v2084_v14 = vmax.f32 %v2052_v29, %v1923_v28  ;;  %v2195_v47 = vsel %vm1300_vm4, %v2163_v7, %v2147_v62  ;;  %v9358_v29 = vld [vmem:[#allocation17_spill] sm:$0xff] }
 0x1bf   : > { %v2259_v48 = vrot.slane %v6419_v52, 6  ;;  %5209 = vrcp.f32 %v869_v21  ;;  %v2213_v26 = vsel %vm1001_vm5, %v2195_v47, -inf  ;;  %v1604_v37 = vmax.f32 %v6341_v63, %v6127_v20 }
 0x1c0   : > { %v2117_v23 = vmax.f32 %v6419_v52, %v2085_v6  ;;  %5211 = vrcp.f32 %v885_v56  ;;  %v2116_v43 = vmax.f32 %v6412_v27, %v2084_v14  ;;  %v6541_v21 = vmul.f32 %v5190_v25, %v9355_v5 }
 0x1c1   : > { %v2275_v30 = vsel %vm1401_vm6, %v2243_v50, %v2259_v48  ;;  %v2291_v49 = vsel %vm1401_vm6, %v2259_v48, %v2243_v50  ;;  %5213 = vrcp.f32 %v867_v38  ;;  %v6550_v27 = vmax.f32 %v1603_v22, %v6041_v46 }
 0x1c2   : > { %v2308_v52 = vsel %vm998_vm7, %v2291_v49, -inf  ;;  %v2341_v17 = vmax.f32 %v2275_v30, %v2213_v26  ;;  %5215 = vpow2.f32 %v6361_v10  ;;  %v6553_v56 = vmax.f32 %v1604_v37, %v6027_v34  ;;  %v5192_v62 = vpop.eup %5191 }
 0x1c3   : > { %v2340_v20 = vmax.f32 %v2308_v52, %v2179_v54  ;;  %v6560_v35 = vmul.f32 %v5192_v62, %v9356_v8  ;;  %v9370_v7 = vrot.slane %v6485_v15, 2 }
 0x1c4   : > { %v5194_v10 = vpop.eup %5193  ;;  %v6564_v16 = vmax.f32 %v2117_v23, %v2341_v17 }
 0x1c5   : > { %9357 = vst [vmem:[#allocation14_spill] sm:$0xff] %v6560_v35  ;;  %v6562_v12 = vmax.f32 %v2116_v43, %v2340_v20  ;;  %v5196_v1 = vpop.eup %5195  ;;  %v6569_v6 = vmul.f32 %v5194_v10, %v9358_v29  ;;  %v9359_v20 = vld [vmem:[#allocation18_spill] sm:$0xff]  ;;  %v9361_v10 = vld [vmem:[#allocation19_spill] sm:$0xff]  ;;  %v9362_v29 = vld [vmem:[#allocation20_spill] sm:$0xff] }
 0x1c6   : > { %v5198_v48 = vpop.eup %5197  ;;  %v6588_v62 = vmul.f32 %v5196_v1, %v9359_v20 }
 0x1c7   : > { %v5200_v43 = vpop.eup %5199  ;;  %v1023_v30 = vrot.slane %v6569_v6, 1  ;;  %v1124_v49 = vrot.slane %v6569_v6, 7  ;;  %v1289_v5 = vrot.slane %v6569_v6, 2  ;;  %v1390_v52 = vrot.slane %v6569_v6, 6 }
 0x1c8   : > { %v6585_v17 = vpop.eup %5201  ;;  %9360 = vst [vmem:[#allocation15_spill] sm:$0xff] %v6588_v62  ;;  %v6591_v8 = vmul.f32 %v5198_v48, %v9361_v10  ;;  %v6594_v14 = vmul.f32 %v5200_v43, %v9362_v29  ;;  %v1297_v23 = vrot.slane %v6588_v62, 2 }
 0x1c9   : > { %v6598_v54 = vpop.eup %5203  ;;  %v1040_v22 = vsel %vm1034_vm0, %v1007_v58, %v1023_v30  ;;  %v1056_v1 = vsel %vm1034_vm0, %v1023_v30, %v1007_v58  ;;  %v1141_v48 = vsel %vm1135_vm1, %v1108_v45, %v1124_v49  ;;  %v1157_v43 = vsel %vm1135_vm1, %v1124_v49, %v1108_v45 }
 0x1ca   : > { %9363 = vst [vmem:[#allocation16_spill] sm:$0xff] %v6594_v14  ;;  %v6616_v20 = vpop.eup %5205  ;;  %v1082_v10 = vsel %vm997_vm3, %v1056_v1, -inf  ;;  %v1182_v29 = vsel %vm994_vm2, %v1157_v43, -inf  ;;  %v9364_v58 = vrot.slane %v6432_v24, 2  ;;  %v1407_v43 = vsel %vm1401_vm6, %v1374_v11, %v1390_v52 }
 0x1cb   : > { %v6630_v37 = vpop.eup %5207  ;;  %v1214_v45 = vmax.f32 %v1182_v29, %v1040_v22  ;;  %v1215_v49 = vmax.f32 %v1141_v48, %v1082_v10  ;;  %v1132_v22 = vrot.slane %v6588_v62, 7  ;;  %v1022_v0 = vrot.slane %v6591_v8, 1 }
 0x1cc   : > { %v1306_v30 = vsel %vm1300_vm4, %v9364_v58, %v1289_v5  ;;  %v9365_v47 = vmov %v9364_v58  ;;  %v6638_v26 = vpop.eup %5209  ;;  %v1423_v58 = vsel %vm1401_vm6, %v1390_v52, %v1374_v11  ;;  %v9366_v11 = vrot.slane %v6485_v15, 1 }
 0x1cd   : > { %v1322_v25 = vsel %vm1300_vm4, %v1289_v5, %v9365_v47  ;;  %v1031_v5 = vrot.slane %v6588_v62, 1  ;;  %v6646_v48 = vpop.eup %5211  ;;  %v1247_v10 = vmax.f32 %v6569_v6, %v1215_v49  ;;  %v1448_v29 = vsel %vm998_vm7, %v1423_v58, -inf }
 0x1ce   : > { %v1348_v1 = vsel %vm1001_vm5, %v1322_v25, -inf  ;;  %v1246_v25 = vmax.f32 %v6432_v24, %v1214_v45  ;;  %v6653_v28 = vpop.eup %5213  ;;  %v1480_v38 = vmax.f32 %v1448_v29, %v1306_v30  ;;  %v9368_v49 = vrot.slane %v6485_v15, 7 }
 0x1cf   : > { %v1481_v47 = vmax.f32 %v1407_v43, %v1348_v1  ;;  %v1048_v52 = vsel %vm1034_vm0, %v9366_v11, %v1031_v5  ;;  %v9367_v1 = vmov %v9366_v11  ;;  %v6667_v58 = vpop.eup %5215 }
 0x1d0   : > { %v1064_v45 = vsel %vm1034_vm0, %v1031_v5, %v9367_v1  ;;  %v1149_v43 = vsel %vm1135_vm1, %v9368_v49, %v1132_v22  ;;  %v9369_v29 = vmov %v9368_v49  ;;  %v1314_v5 = vsel %vm1300_vm4, %v9370_v7, %v1297_v23 }
 0x1d1   : > { %v6669_v50 = vmax.f32 %v1247_v10, %v1481_v47  ;;  %v1098_v30 = vsel %vm997_vm3, %v1064_v45, -inf  ;;  %v1165_v11 = vsel %vm1135_vm1, %v1132_v22, %v9369_v29  ;;  %v6681_v1 = vmax.f32 %v1246_v25, %v1480_v38 }
 0x1d2   : > { %v1198_v49 = vsel %vm994_vm2, %v1165_v11, -inf  ;;  %v1231_v47 = vmax.f32 %v1149_v43, %v1098_v30  ;;  %v9371_v10 = vmov %v9370_v7  ;;  %v1398_v29 = vrot.slane %v6588_v62, 6 }
 0x1d3   : > { %v1330_v45 = vsel %vm1300_vm4, %v1297_v23, %v9371_v10  ;;  %v1230_v61 = vmax.f32 %v1198_v49, %v1048_v52  ;;  %v1123_v38 = vrot.slane %v6591_v8, 7  ;;  %v1288_v25 = vrot.slane %v6591_v8, 2 }
 0x1d4   : > { %v1364_v22 = vsel %vm1001_vm5, %v1330_v45, -inf  ;;  %v1263_v7 = vmax.f32 %v6588_v62, %v1231_v47  ;;  %v1389_v43 = vrot.slane %v6591_v8, 6  ;;  %v9372_v23 = vrot.slane %v6485_v15, 6 }
 0x1d5   : > { %v1262_v30 = vmax.f32 %v6485_v15, %v1230_v61  ;;  %v9374_v47 = vrot.slane %v6541_v21, 1 }
 0x1d6   : > { %v1415_v52 = vsel %vm1401_vm6, %v9372_v23, %v1398_v29  ;;  %v9373_v11 = vmov %v9372_v23  ;;  %v9376_v23 = vrot.slane %v6541_v21, 7 }
 0x1d7   : > { %v1431_v49 = vsel %vm1401_vm6, %v1398_v29, %v9373_v11  ;;  %v1039_v10 = vsel %vm1034_vm0, %v9374_v47, %v1022_v0  ;;  %v1497_v62 = vmax.f32 %v1415_v52, %v1364_v22  ;;  %v9375_v61 = vmov %v9374_v47 }
 0x1d8   : > { %v1464_v45 = vsel %vm998_vm7, %v1431_v49, -inf  ;;  %v1055_v13 = vsel %vm1034_vm0, %v1022_v0, %v9375_v61  ;;  %v1140_v15 = vsel %vm1135_vm1, %v9376_v23, %v1123_v38  ;;  %v9377_v47 = vmov %v9376_v23 }
 0x1d9   : > { %v1496_v29 = vmax.f32 %v1464_v45, %v1314_v5  ;;  %v1080_v11 = vsel %vm997_vm3, %v1055_v13, -inf  ;;  %v1156_v49 = vsel %vm1135_vm1, %v1123_v38, %v9377_v47  ;;  %v9378_v22 = vrot.slane %v6541_v21, 2 }
 0x1da   : > { %v6730_v0 = vmax.f32 %v1263_v7, %v1497_v62  ;;  %v1180_v61 = vsel %vm994_vm2, %v1156_v49, -inf  ;;  %v1213_v23 = vmax.f32 %v1140_v15, %v1080_v11  ;;  %v9382_v47 = vrot.slane %v6541_v21, 6 }
 0x1db   : > { %v1305_v52 = vsel %vm1300_vm4, %v9378_v22, %v1288_v25  ;;  %v9380_v5 = vmov %v9378_v22  ;;  %v6738_v45 = vmax.f32 %v1262_v30, %v1496_v29  ;;  %v1212_v36 = vmax.f32 %v1180_v61, %v1039_v10 }
 0x1dc   : > { %9379 = vst [vmem:[#allocation17_spill] sm:$0xff] %v6730_v0  ;;  %v1321_v13 = vsel %vm1300_vm4, %v1288_v25, %v9380_v5  ;;  %v1406_v62 = vsel %vm1401_vm6, %v9382_v47, %v1389_v43  ;;  %v1245_v7 = vmax.f32 %v6591_v8, %v1213_v23  ;;  %v9383_v15 = vmov %v9382_v47 }
 0x1dd   : > { %9381 = vst [vmem:[#allocation18_spill] sm:$0xff] %v6738_v45  ;;  %v1346_v38 = vsel %vm1001_vm5, %v1321_v13, -inf  ;;  %v1422_v11 = vsel %vm1401_vm6, %v1389_v43, %v9383_v15  ;;  %v1030_v25 = vrot.slane %v6594_v14, 1  ;;  %v1244_v30 = vmax.f32 %v6541_v21, %v1212_v36  ;;  %v9400_v45 = vld [vmem:[#allocation25_spill] sm:$0xff] }
 0x1de   : > { %v1479_v49 = vmax.f32 %v1406_v62, %v1346_v38  ;;  %v1446_v10 = vsel %vm998_vm7, %v1422_v11, -inf  ;;  %v1131_v29 = vrot.slane %v6594_v14, 7  ;;  %v1296_v22 = vrot.slane %v6594_v14, 2 }
 0x1df   : > { %v1478_v61 = vmax.f32 %v1446_v10, %v1305_v52  ;;  %v9384_v23 = vrot.slane %v6560_v35, 1  ;;  %v9386_v47 = vrot.slane %v6560_v35, 7  ;;  %v9388_v15 = vrot.slane %v6560_v35, 2 }
 0x1e0   : > { %v6757_v5 = vmax.f32 %v1245_v7, %v1479_v49 }
 0x1e1   : > { %v1047_v43 = vsel %vm1034_vm0, %v9384_v23, %v1030_v25  ;;  %v9385_v13 = vmov %v9384_v23  ;;  %v1148_v52 = vsel %vm1135_vm1, %v9386_v47, %v1131_v29  ;;  %v9387_v62 = vmov %v9386_v47 }
 0x1e2   : > { %v1063_v36 = vsel %vm1034_vm0, %v1030_v25, %v9385_v13  ;;  %v1164_v7 = vsel %vm1135_vm1, %v1131_v29, %v9387_v62  ;;  %v1313_v11 = vsel %vm1300_vm4, %v9388_v15, %v1296_v22  ;;  %v6781_v49 = vmax.f32 %v1244_v30, %v1478_v61  ;;  %v9390_v62 = vld [vmem:[#allocation21_spill] sm:$0xff]  ;;  %v9391_v61 = vld [vmem:[#allocation22_spill] sm:$0xff] }
 0x1e3   : > { %v1096_v38 = vsel %vm997_vm3, %v1063_v36, -inf  ;;  %v1196_v25 = vsel %vm994_vm2, %v1164_v7, -inf  ;;  %v9389_v23 = vmov %v9388_v15  ;;  %v1397_v47 = vrot.slane %v6594_v14, 6 }
 0x1e4   : > { %v1229_v10 = vmax.f32 %v1148_v52, %v1096_v38  ;;  %v1329_v13 = vsel %vm1300_vm4, %v1296_v22, %v9389_v23  ;;  %v1228_v36 = vmax.f32 %v1196_v25, %v1047_v43  ;;  %v6794_v15 = vmul.f32 %v6585_v17, %v9390_v62  ;;  %v9393_v52 = vld [vmem:[#allocation23_spill] sm:$0xff]  ;;  %v9394_v22 = vld [vmem:[#allocation24_spill] sm:$0xff] }
 0x1e5   : > { %v1362_v29 = vsel %vm1001_vm5, %v1329_v13, -inf  ;;  %v6799_v38 = vmul.f32 %v6598_v54, %v9391_v61  ;;  %v6803_v7 = vmul.f32 %v6616_v20, %v9393_v52  ;;  %v6807_v43 = vmul.f32 %v6630_v37, %v9394_v22 }
 0x1e6   : > { %v1261_v30 = vmax.f32 %v6594_v14, %v1229_v10  ;;  %v1260_v25 = vmax.f32 %v6560_v35, %v1228_v36  ;;  %v9396_v23 = vrot.slane %v6560_v35, 6  ;;  %v1009_v13 = vrot.slane %v6794_v15, 1 }
 0x1e7   : > { %9392 = vst [vmem:[#allocation19_spill] sm:$0xff] %v6799_v38  ;;  %9395 = vst [vmem:[#allocation20_spill] sm:$0xff] %v6807_v43  ;;  %v1110_v37 = vrot.slane %v6794_v15, 7  ;;  %v1275_v36 = vrot.slane %v6794_v15, 2  ;;  %v1376_v52 = vrot.slane %v6794_v15, 6  ;;  %v1017_v22 = vrot.slane %v6799_v38, 1 }
 0x1e8   : > { %v1414_v17 = vsel %vm1401_vm6, %v9396_v23, %v1397_v47  ;;  %v9397_v10 = vmov %v9396_v23  ;;  %v1118_v23 = vrot.slane %v6799_v38, 7  ;;  %v6853_v35 = vadd.f32 1.0, %v6667_v58 }
 0x1e9   : > { %v1430_v54 = vsel %vm1401_vm6, %v1397_v47, %v9397_v10  ;;  %v1495_v62 = vmax.f32 %v1414_v17, %v1362_v29  ;;  %v1283_v47 = vrot.slane %v6799_v38, 2  ;;  %v1384_v10 = vrot.slane %v6799_v38, 6 }
 0x1ea   : > { %v1462_v20 = vsel %vm998_vm7, %v1430_v54, -inf  ;;  %v6842_v38 = vmul.f32 %v6638_v26, %v9400_v45  ;;  %v9404_v26 = vmax.f32 %v6553_v56, %v6261_v42  ;;  %5217 = vrcp.f32 %v6853_v35 }
 0x1eb   : > { %v1494_v61 = vmax.f32 %v1462_v20, %v1313_v11  ;;  %v6826_v14 = vmax.f32 %v1261_v30, %v1495_v62  ;;  %v6850_v11 = vmul.f32 %v6653_v28, %v5944_v41  ;;  %v9403_v30 = vmax.f32 %v6550_v27, %v6267_v40 }
 0x1ec   : > { %v6865_v45 = vmax.f32 %v9404_v26, %v6757_v5  ;;  %v9405_v41 = vmax.f32 %v6267_v40, %v6041_v46  ;;  %v1025_v27 = vrot.slane %v6842_v38, 1  ;;  %v1291_v56 = vrot.slane %v6842_v38, 2 }
 0x1ed   : > { %9398 = vst [vmem:[#allocation21_spill] sm:$0xff] %v6826_v14  ;;  %v6831_v29 = vmax.f32 %v1260_v25, %v1494_v61  ;;  %v9401_v25 = vld [vmem:[#allocation27_spill] sm:$0xff]  ;;  %v6859_v62 = vmax.f32 %v9403_v30, %v6781_v49  ;;  %v1126_v30 = vrot.slane %v6842_v38, 7 }
 0x1ee   : > { %v6846_v61 = vmul.f32 %v6646_v48, %v9401_v25  ;;  %v6871_v28 = vmax.f32 %v9405_v41, %v6353_v33  ;;  %v9406_v48 = vmax.f32 %v6261_v42, %v6027_v34  ;;  %v1392_v25 = vrot.slane %v6842_v38, 6 }
 0x1ef   : > { %9399 = vst [vmem:[#allocation22_spill] sm:$0xff] %v6831_v29  ;;  %v1042_v34 = vsel %vm1034_vm0, %v1009_v13, %v1025_v27  ;;  %v1143_v20 = vsel %vm1135_vm1, %v1110_v37, %v1126_v30  ;;  %v1159_v17 = vsel %vm1135_vm1, %v1126_v30, %v1110_v37  ;;  %v1308_v29 = vsel %vm1300_vm4, %v1275_v36, %v1291_v56 }
 0x1f0   : > { %9402 = vst [vmem:[#allocation23_spill] sm:$0xff] %v6846_v61  ;;  %v6877_v58 = vmax.f32 %v9406_v48, %v6341_v63  ;;  %v1033_v26 = vrot.slane %v6846_v61, 1  ;;  %v1134_v46 = vrot.slane %v6846_v61, 7  ;;  %v1299_v41 = vrot.slane %v6846_v61, 2 }
 0x1f1   : > { %v1400_v0 = vrot.slane %v6846_v61, 6  ;;  %v1058_v48 = vsel %vm1034_vm0, %v1025_v27, %v1009_v13  ;;  %v1186_v14 = vsel %vm994_vm2, %v1159_v17, -inf  ;;  %v1324_v32 = vsel %vm1300_vm4, %v1291_v56, %v1275_v36 }
 0x1f2   : > { %v1086_v54 = vsel %vm997_vm3, %v1058_v48, -inf  ;;  %v1218_v59 = vmax.f32 %v1186_v14, %v1042_v34  ;;  %v1352_v27 = vsel %vm1001_vm5, %v1324_v32, -inf  ;;  %v1409_v37 = vsel %vm1401_vm6, %v1376_v52, %v1392_v25 }
 0x1f3   : > { %v1219_v13 = vmax.f32 %v1143_v20, %v1086_v54  ;;  %v1425_v30 = vsel %vm1401_vm6, %v1392_v25, %v1376_v52  ;;  %v1485_v48 = vmax.f32 %v1409_v37, %v1352_v27  ;;  %v6911_v17 = vsel %vm1034_vm0, %v1017_v22, %v1033_v26 }
 0x1f4   : > { %9407 = vst [vmem:[#allocation24_spill] sm:$0xff] %v6911_v17  ;;  %v1066_v51 = vsel %vm1034_vm0, %v1033_v26, %v1017_v22  ;;  %v1250_v14 = vmax.f32 %v6794_v15, %v1218_v59  ;;  %v1452_v32 = vsel %vm998_vm7, %v1425_v30, -inf  ;;  %v1151_v52 = vsel %vm1135_vm1, %v1118_v23, %v1134_v46 }
 0x1f5   : > { %v1251_v36 = vmax.f32 %v6842_v38, %v1219_v13  ;;  %v1102_v54 = vsel %vm997_vm3, %v1066_v51, -inf  ;;  %v1484_v20 = vmax.f32 %v1452_v32, %v1308_v29  ;;  %v1167_v56 = vsel %vm1135_vm1, %v1134_v46, %v1118_v23 }
 0x1f6   : > { %v6927_v22 = vsel %vm1300_vm4, %v1283_v47, %v1299_v41  ;;  %v6933_v25 = vsel %vm994_vm2, %v1167_v56, -inf  ;;  %v1235_v26 = vmax.f32 %v1151_v52, %v1102_v54  ;;  %v1332_v51 = vsel %vm1300_vm4, %v1299_v41, %v1283_v47 }
 0x1f7   : > { %9408 = vst [vmem:[#allocation25_spill] sm:$0xff] %v6927_v22  ;;  %v6929_v59 = vmax.f32 %v1251_v36, %v1485_v48  ;;  %9409 = vst [vmem:[#allocation27_spill] sm:$0xff] %v6933_v25  ;;  %v6937_v29 = vmax.f32 %v1250_v14, %v1484_v20  ;;  %v1368_v23 = vsel %vm1001_vm5, %v1332_v51, -inf  ;;  %v1417_v46 = vsel %vm1401_vm6, %v1384_v10, %v1400_v0 }
 0x1f8   : > { %v1267_v13 = vmax.f32 %v6846_v61, %v1235_v26  ;;  %v1433_v27 = vsel %vm1401_vm6, %v1400_v0, %v1384_v10  ;;  %v1501_v37 = vmax.f32 %v1417_v46, %v1368_v23  ;;  %v1024_v30 = vrot.slane %v6850_v11, 1 }
 0x1f9   : > { %v6951_v47 = vsel %vm998_vm7, %v1433_v27, -inf  ;;  %v1125_v41 = vrot.slane %v6850_v11, 7  ;;  %v1290_v48 = vrot.slane %v6850_v11, 2  ;;  %v1391_v14 = vrot.slane %v6850_v11, 6 }
 0x1fa   : > { %9410 = vst [vmem:[#allocation41_spill] sm:$0xff] %v6951_v47  ;;  %v6958_v32 = vmax.f32 %v1267_v13, %v1501_v37  ;;  %v9412_v0 = vrot.slane %v6803_v7, 1  ;;  %v9414_v56 = vrot.slane %v6803_v7, 7  ;;  %v9416_v46 = vrot.slane %v6803_v7, 2 }
 0x1fb   : > { %v1988_v35 = vrot.slane %v6859_v62, 7  ;;  %v9424_v34 = vrot.slane %v6807_v43, 7 }
 0x1fc   : > { %9411 = vst [vmem:[#allocation42_spill] sm:$0xff] %v6958_v32  ;;  %v1041_v10 = vsel %vm1034_vm0, %v9412_v0, %v1024_v30  ;;  %v9413_v54 = vmov %v9412_v0  ;;  %v1142_v26 = vsel %vm1135_vm1, %v9414_v56, %v1125_v41  ;;  %v9415_v51 = vmov %v9414_v56 }
 0x1fd   : > { %v1057_v20 = vsel %vm1034_vm0, %v1024_v30, %v9413_v54  ;;  %v1158_v23 = vsel %vm1135_vm1, %v1125_v41, %v9415_v51  ;;  %v1307_v13 = vsel %vm1300_vm4, %v9416_v46, %v1290_v48  ;;  %v9417_v30 = vmov %v9416_v46 }
 0x1fe   : > { %v1084_v52 = vsel %vm997_vm3, %v1057_v20, -inf  ;;  %v1184_v27 = vsel %vm994_vm2, %v1158_v23, -inf  ;;  %v1323_v0 = vsel %vm1300_vm4, %v1290_v48, %v9417_v30  ;;  %v9418_v54 = vrot.slane %v6803_v7, 6 }
 0x1ff   : > { %v1217_v37 = vmax.f32 %v1142_v26, %v1084_v52  ;;  %v1216_v41 = vmax.f32 %v1184_v27, %v1041_v10  ;;  %v1350_v56 = vsel %vm1001_vm5, %v1323_v0, -inf  ;;  %v1863_v46 = vpack.c.bf16 %v6865_v45, %v6859_v62 }
 0x200   : > { %v1408_v20 = vsel %vm1401_vm6, %v9418_v54, %v1391_v14  ;;  %v9419_v51 = vmov %v9418_v54  ;;  %v1892_v30 = vrot.slane %v6859_v62, 1  ;;  %v1908_v0 = vrot.slane %v6865_v45, 1 }
 0x201   : > { %v1424_v23 = vsel %vm1401_vm6, %v1391_v14, %v9419_v51  ;;  %v1249_v52 = vmax.f32 %v6850_v11, %v1217_v37  ;;  %v1483_v26 = vmax.f32 %v1408_v20, %v1350_v56  ;;  %v1248_v10 = vmax.f32 %v6803_v7, %v1216_v41  ;;  %3955 = vmatprep.mubr.bf16.mxu0 %v1863_v46 }
 0x202   : > { %v1450_v48 = vsel %vm998_vm7, %v1424_v23, -inf  ;;  %v2004_v14 = vrot.slane %v6865_v45, 7  ;;  %v2148_v37 = vrot.slane %v6859_v62, 2  ;;  %v1924_v56 = vsel %vm1034_vm0, %v1892_v30, %v1908_v0 }
 0x203   : > { %v1482_v27 = vmax.f32 %v1450_v48, %v1307_v13  ;;  %v7007_v54 = vmax.f32 %v1249_v52, %v1483_v26  ;;  %v1940_v13 = vsel %vm1034_vm0, %v1908_v0, %v1892_v30  ;;  %v2164_v41 = vrot.slane %v6865_v45, 2 }
 0x204   : > { %v9420_v51 = vpack.c.bf16 %v6200_v2, %v6182_v19  ;;  %v1959_v23 = vsel %vm997_vm3, %v1940_v13, -inf  ;;  %v2020_v52 = vsel %vm1135_vm1, %v1988_v35, %v2004_v14  ;;  %v2036_v48 = vsel %vm1135_vm1, %v2004_v14, %v1988_v35 }
 0x205   : > { %v7012_v20 = vmax.f32 %v1248_v10, %v1482_v27  ;;  %v2244_v26 = vrot.slane %v6859_v62, 6  ;;  %v2054_v46 = vsel %vm994_vm2, %v2036_v48, -inf  ;;  %v2087_v10 = vmax.f32 %v2020_v52, %v1959_v23 }
 0x206   : > { %3956 = vmatmul.mubr.bf16.gmra.mxu0 %v9420_v51  ;;  %v2180_v27 = vsel %vm1300_vm4, %v2148_v37, %v2164_v41  ;;  %v2196_v19 = vsel %vm1300_vm4, %v2164_v41, %v2148_v37  ;;  %v2086_v2 = vmax.f32 %v2054_v46, %v1924_v56  ;;  %v2260_v0 = vrot.slane %v6865_v45, 6 }
 0x207   : > { %v2215_v30 = vsel %vm1001_vm5, %v2196_v19, -inf  ;;  %v1735_v35 = vmax.f32 %v6871_v28, %v6781_v49  ;;  %v2119_v14 = vmax.f32 %v6865_v45, %v2087_v10  ;;  %v1736_v13 = vmax.f32 %v6877_v58, %v6757_v5 }
 0x208   : > { %v1864_v51 = vpack.c.bf16 %v6192_v39, %v5970_v57  ;;  %v2118_v56 = vmax.f32 %v6859_v62, %v2086_v2  ;;  %v2276_v41 = vsel %vm1401_vm6, %v2244_v26, %v2260_v0  ;;  %v2292_v23 = vsel %vm1401_vm6, %v2260_v0, %v2244_v26  ;;  %v5218_v0 = vpop.eup %5217 }
 0x209   : > { %v1800_v28 = vmax.f32 %v1735_v35, %v6681_v1  ;;  %v2310_v45 = vsel %vm998_vm7, %v2292_v23, -inf  ;;  %v2343_v58 = vmax.f32 %v2276_v41, %v2215_v30  ;;  %v1801_v52 = vmax.f32 %v1736_v13, %v6669_v50 }
 0x20a   : > { %v1608_v57 = vmax.f32 %v6757_v5, %v6341_v63  ;;  %v2342_v39 = vmax.f32 %v2310_v45, %v2180_v27  ;;  %v7063_v13 = vmul.f32 %v5218_v0, %v6345_v31  ;;  %v9426_v37 = vrot.slane %v6807_v43, 2 }
 0x20b   : > { %v1893_v48 = vrot.slane %v1800_v28, 1  ;;  %v1989_v62 = vrot.slane %v1800_v28, 7  ;;  %v2149_v46 = vrot.slane %v1800_v28, 2  ;;  %v7058_v10 = vmax.f32 %v2119_v14, %v2343_v58 }
 0x20c   : > { %v1865_v19 = vpack.c.bf16 %v1801_v52, %v1800_v28  ;;  %v1909_v2 = vrot.slane %v1801_v52, 1  ;;  %v2005_v26 = vrot.slane %v1801_v52, 7  ;;  %v7060_v35 = vmax.f32 %v2118_v56, %v2342_v39  ;;  %9421 = vst [vmem:[#allocation43_spill] sm:$0xff] %v7063_v13 }
 0x20d   : > { %v2165_v36 = vrot.slane %v1801_v52, 2  ;;  %v2245_v23 = vrot.slane %v1800_v28, 6  ;;  %v2261_v30 = vrot.slane %v1801_v52, 6  ;;  %v1032_v58 = vrot.slane %v7063_v13, 1 }
 0x20e   : > { %v1925_v63 = vsel %vm1034_vm0, %v1893_v48, %v1909_v2  ;;  %v1941_v27 = vsel %vm1034_vm0, %v1909_v2, %v1893_v48  ;;  %v2021_v14 = vsel %vm1135_vm1, %v1989_v62, %v2005_v26  ;;  %3963 = vmatprep.mubr.bf16.mxu0 %v1865_v19  ;;  %v2037_v41 = vsel %vm1135_vm1, %v2005_v26, %v1989_v62 }
 0x20f   : > { %v1961_v56 = vsel %vm997_vm3, %v1941_v27, -inf  ;;  %v2181_v31 = vsel %vm1300_vm4, %v2149_v46, %v2165_v36  ;;  %v2197_v45 = vsel %vm1300_vm4, %v2165_v36, %v2149_v46  ;;  %3964 = vmatmul.mubr.bf16.gmra.mxu0 %v1864_v51  ;;  %v1133_v39 = vrot.slane %v7063_v13, 7 }
 0x210   : > { %v1298_v48 = vrot.slane %v7063_v13, 2  ;;  %v1399_v19 = vrot.slane %v7063_v13, 6  ;;  %v2056_v2 = vsel %vm994_vm2, %v2037_v41, -inf  ;;  %v2089_v0 = vmax.f32 %v2021_v14, %v1961_v56 }
 0x211   : > { %v2217_v62 = vsel %vm1001_vm5, %v2197_v45, -inf  ;;  %v2277_v26 = vsel %vm1401_vm6, %v2245_v23, %v2261_v30  ;;  %v9422_v36 = vrot.slane %v6807_v43, 1  ;;  %v1150_v14 = vsel %vm1135_vm1, %v9424_v34, %v1133_v39 }
 0x212   : > { %v9425_v56 = vmov %v9424_v34  ;;  %v2088_v47 = vmax.f32 %v2056_v2, %v1925_v63  ;;  %v2121_v17 = vmax.f32 %v1801_v52, %v2089_v0  ;;  %v2345_v52 = vmax.f32 %v2277_v26, %v2217_v62 }
 0x213   : > { %v1049_v51 = vsel %vm1034_vm0, %v9422_v36, %v1032_v58  ;;  %v9423_v46 = vmov %v9422_v36  ;;  %v1166_v41 = vsel %vm1135_vm1, %v1133_v39, %v9425_v56  ;;  %v1673_v0 = vmax.f32 %v1608_v57, %v6261_v42 }
 0x214   : > { %v1065_v27 = vsel %vm1034_vm0, %v1032_v58, %v9423_v46  ;;  %v1200_v36 = vsel %vm994_vm2, %v1166_v41, -inf  ;;  %v7113_v58 = vsel %vm1300_vm4, %v9426_v37, %v1298_v48  ;;  %v9427_v46 = vmov %v9426_v37 }
 0x215   : > { %v1100_v45 = vsel %vm997_vm3, %v1065_v27, -inf  ;;  %v1331_v34 = vsel %vm1300_vm4, %v1298_v48, %v9427_v46  ;;  %v1232_v61 = vmax.f32 %v1200_v36, %v1049_v51  ;;  %v9428_v27 = vrot.slane %v6807_v43, 6 }
 0x216   : > { %v1233_v32 = vmax.f32 %v1150_v14, %v1100_v45  ;;  %v1366_v39 = vsel %vm1001_vm5, %v1331_v34, -inf  ;;  %v2293_v45 = vsel %vm1401_vm6, %v2261_v30, %v2245_v23  ;;  %v2120_v46 = vmax.f32 %v1800_v28, %v2088_v47 }
 0x217   : > { %v1416_v56 = vsel %vm1401_vm6, %v9428_v27, %v1399_v19  ;;  %v9429_v41 = vmov %v9428_v27  ;;  %v7130_v48 = vmax.f32 %v6807_v43, %v1232_v61  ;;  %v2312_v63 = vsel %vm998_vm7, %v2293_v45, -inf }
 0x218   : > { %v1432_v37 = vsel %vm1401_vm6, %v1399_v19, %v9429_v41  ;;  %v1499_v22 = vmax.f32 %v1416_v56, %v1366_v39  ;;  %v1265_v51 = vmax.f32 %v7063_v13, %v1233_v32  ;;  %v2344_v61 = vmax.f32 %v2312_v63, %v2181_v31 }
 0x219   : > { %v7135_v14 = vsel %vm998_vm7, %v1432_v37, -inf  ;;  %v9431_v32 = vmax.f32 %v6781_v49, %v6353_v33  ;;  %v7150_v34 = vmax.f32 %v2121_v17, %v2345_v52  ;;  %v1866_v23 = vpack.c.bf16 %v6591_v8, %v6541_v21 }
 0x21a   : > { %v7143_v19 = vmax.f32 %v1265_v51, %v1499_v22  ;;  %v1609_v47 = vmax.f32 %v6681_v1, %v6267_v40  ;;  %v1610_v22 = vmax.f32 %v6669_v50, %v6261_v42  ;;  %v7158_v28 = vmax.f32 %v2120_v46, %v2344_v61 }
 0x21b   : > { %v1672_v2 = vmax.f32 %v9431_v32, %v6267_v40  ;;  %v1738_v33 = vmax.f32 %v1673_v0, %v6669_v50  ;;  %v9432_v31 = vrot.slane %v6369_v53, 2  ;;  %v9433_v17 = vrot.slane %v6377_v60, 2 }
 0x21c   : > { %9430 = vst [vmem:[#allocation44_spill] sm:$0xff] %v7143_v19  ;;  %v1674_v21 = vmax.f32 %v1609_v47, %v6781_v49  ;;  %v1675_v40 = vmax.f32 %v1610_v22, %v6757_v5  ;;  %v9436_v26 = vrot.slane %v6369_v53, 6  ;;  %v9437_v39 = vrot.slane %v6377_v60, 6 }
 0x21d   : > { %v1737_v30 = vmax.f32 %v1672_v2, %v6681_v1  ;;  %v7168_v57 = vsel %vm1300_vm4, %v9433_v17, %v9432_v31  ;;  %v9434_v42 = vmov %v9433_v17  ;;  %v9435_v8 = vmov %v9432_v31 }
 0x21e   : > { %v2194_v62 = vsel %vm1300_vm4, %v9435_v8, %v9434_v42  ;;  %v7184_v27 = vsel %vm1401_vm6, %v9437_v39, %v9436_v26  ;;  %v1803_v41 = vmax.f32 %v1738_v33, %v7007_v54  ;;  %v9438_v51 = vmov %v9437_v39 }
 0x21f   : > { %v1802_v56 = vmax.f32 %v1737_v30, %v7012_v20  ;;  %v7190_v37 = vsel %vm1001_vm5, %v2194_v62, -inf  ;;  %v9439_v45 = vmov %v9436_v26  ;;  %v1739_v63 = vmax.f32 %v1674_v21, %v7012_v20 }
 0x220   : > { %v2290_v46 = vsel %vm1401_vm6, %v9439_v45, %v9438_v51  ;;  %v1740_v52 = vmax.f32 %v1675_v40, %v7007_v54  ;;  %v2339_v32 = vmax.f32 %v7184_v27, %v7190_v37  ;;  %v1910_v47 = vrot.slane %v1803_v41, 1 }
 0x221   : > { %v7202_v61 = vsel %vm998_vm7, %v2290_v46, -inf  ;;  %v1867_v2 = vpack.c.bf16 %v1803_v41, %v1802_v56  ;;  %v1894_v0 = vrot.slane %v1802_v56, 1  ;;  %v1990_v60 = vrot.slane %v1802_v56, 7 }
 0x222   : > { %v2006_v22 = vrot.slane %v1803_v41, 7  ;;  %v2150_v53 = vrot.slane %v1802_v56, 2  ;;  %v2166_v30 = vrot.slane %v1803_v41, 2  ;;  %v2246_v33 = vrot.slane %v1802_v56, 6 }
 0x223   : > { %v1926_v31 = vsel %vm1034_vm0, %v1894_v0, %v1910_v47  ;;  %v1942_v17 = vsel %vm1034_vm0, %v1910_v47, %v1894_v0  ;;  %v2262_v21 = vrot.slane %v1803_v41, 6  ;;  %3971 = vmatprep.mubr.bf16.mxu0 %v1867_v2  ;;  %v1804_v40 = vmax.f32 %v1739_v63, %v6937_v29 }
 0x224   : > { %v1963_v42 = vsel %vm997_vm3, %v1942_v17, -inf  ;;  %v2022_v8 = vsel %vm1135_vm1, %v1990_v60, %v2006_v22  ;;  %v2038_v62 = vsel %vm1135_vm1, %v2006_v22, %v1990_v60  ;;  %v2182_v26 = vsel %vm1300_vm4, %v2150_v53, %v2166_v30  ;;  %3972 = vmatmul.mubr.bf16.gmra.mxu0 %v1866_v23 }
 0x225   : > { %v2058_v39 = vsel %vm994_vm2, %v2038_v62, -inf  ;;  %v2091_v27 = vmax.f32 %v2022_v8, %v1963_v42  ;;  %v2198_v37 = vsel %vm1300_vm4, %v2166_v30, %v2150_v53  ;;  %v2278_v51 = vsel %vm1401_vm6, %v2246_v33, %v2262_v21 }
 0x226   : > { %v2090_v45 = vmax.f32 %v2058_v39, %v1926_v31  ;;  %v2219_v46 = vsel %vm1001_vm5, %v2198_v37, -inf  ;;  %v2294_v63 = vsel %vm1401_vm6, %v2262_v21, %v2246_v33  ;;  %v1805_v2 = vmax.f32 %v1740_v52, %v6929_v59 }
 0x227   : > { %v2123_v23 = vmax.f32 %v1803_v41, %v2091_v27  ;;  %v2314_v0 = vsel %vm998_vm7, %v2294_v63, -inf  ;;  %v2347_v47 = vmax.f32 %v2278_v51, %v2219_v46  ;;  %v1895_v60 = vrot.slane %v1804_v40, 1 }
 0x228   : > { %v2122_v22 = vmax.f32 %v1802_v56, %v2090_v45  ;;  %v2346_v53 = vmax.f32 %v2314_v0, %v2182_v26  ;;  %v1869_v30 = vpack.c.bf16 %v1805_v2, %v1804_v40  ;;  %v1911_v17 = vrot.slane %v1805_v2, 1 }
 0x229   : > { %v7232_v42 = vmax.f32 %v2123_v23, %v2347_v47  ;;  %v1991_v31 = vrot.slane %v1804_v40, 7  ;;  %v2007_v8 = vrot.slane %v1805_v2, 7  ;;  %v2151_v62 = vrot.slane %v1804_v40, 2 }
 0x22a   : > { %v7234_v39 = vmax.f32 %v2122_v22, %v2346_v53  ;;  %v1927_v52 = vsel %vm1034_vm0, %v1895_v60, %v1911_v17  ;;  %v1943_v41 = vsel %vm1034_vm0, %v1911_v17, %v1895_v60  ;;  %v2167_v33 = vrot.slane %v1805_v2, 2  ;;  %3979 = vmatprep.mubr.bf16.mxu0 %v1869_v30 }
 0x22b   : > { %v1965_v56 = vsel %vm997_vm3, %v1943_v41, -inf  ;;  %v2023_v21 = vsel %vm1135_vm1, %v1991_v31, %v2007_v8  ;;  %v2039_v26 = vsel %vm1135_vm1, %v2007_v8, %v1991_v31  ;;  %v2247_v27 = vrot.slane %v1804_v40, 6 }
 0x22c   : > { %v2060_v37 = vsel %vm994_vm2, %v2039_v26, -inf  ;;  %v2093_v51 = vmax.f32 %v2023_v21, %v1965_v56  ;;  %v2183_v45 = vsel %vm1300_vm4, %v2151_v62, %v2167_v33  ;;  %v2199_v46 = vsel %vm1300_vm4, %v2167_v33, %v2151_v62 }
 0x22d   : > { %v2092_v63 = vmax.f32 %v2060_v37, %v1927_v52  ;;  %v2221_v23 = vsel %vm1001_vm5, %v2199_v46, -inf  ;;  %v2263_v0 = vrot.slane %v1805_v2, 6  ;;  %v2338_v47 = vmax.f32 %v7202_v61, %v7168_v57 }
 0x22e   : > { %v2125_v60 = vmax.f32 %v1805_v2, %v2093_v51  ;;  %v2371_v22 = vmax.f32 %v6423_v55, %v2339_v32  ;;  %v1868_v53 = vpack.c.bf16 %v6569_v6, %v6432_v24 }
 0x22f   : > { %v2124_v17 = vmax.f32 %v1804_v40, %v2092_v63  ;;  %v2279_v31 = vsel %vm1401_vm6, %v2247_v27, %v2263_v0  ;;  %v2295_v8 = vsel %vm1401_vm6, %v2263_v0, %v2247_v27  ;;  %v2370_v62 = vmax.f32 %v6436_v9, %v2338_v47 }
 0x230   : > { %v2316_v57 = vsel %vm998_vm7, %v2295_v8, -inf  ;;  %v2349_v61 = vmax.f32 %v2279_v31, %v2221_v23  ;;  %v2471_v55 = vmax.f32 %v7058_v10, %v2371_v22  ;;  %v2533_v24 = vmax.f32 %v6564_v16, %v2371_v22  ;;  %3980 = vmatmul.mubr.bf16.gmra.mxu0 %v1868_v53 }
 0x231   : > { %v2348_v6 = vmax.f32 %v2316_v57, %v2183_v45  ;;  %v2470_v32 = vmax.f32 %v7060_v35, %v2370_v62  ;;  %v2532_v40 = vmax.f32 %v6562_v12, %v2370_v62  ;;  %v2594_v2 = vmax.f32 %v2370_v62, %v6562_v12 }
 0x232   : > { %v7273_v52 = vmax.f32 %v2125_v60, %v2349_v61  ;;  %v2535_v9 = vmax.f32 %v2471_v55, %v6564_v16  ;;  %v2595_v41 = vmax.f32 %v2371_v22, %v6564_v16  ;;  %v2597_v33 = vmax.f32 %v2533_v24, %v7058_v10 }
 0x233   : > { %v7278_v56 = vmax.f32 %v2124_v17, %v2348_v6  ;;  %v2534_v21 = vmax.f32 %v2470_v32, %v6562_v12  ;;  %v2596_v26 = vmax.f32 %v2532_v40, %v7060_v35  ;;  %v7283_v27 = vmax.f32 %v2594_v2, %v7060_v35 }
 0x234   : > { %v2599_v37 = vmax.f32 %v2535_v9, %v7150_v34  ;;  %v7287_v51 = vmax.f32 %v2595_v41, %v7058_v10  ;;  %v7290_v45 = vmax.f32 %v2597_v33, %v7150_v34 }
 0x235   : > { %v2598_v63 = vmax.f32 %v2534_v21, %v7158_v28  ;;  %v7296_v23 = vmax.f32 %v2596_v26, %v7158_v28  ;;  %v2690_v0 = vrot.slane %v7283_v27, 1  ;;  %v2786_v47 = vrot.slane %v7283_v27, 7 }
 0x236   : > { %v7301_v60 = vmax.f32 %v2599_v37, %v7232_v42  ;;  %v2706_v22 = vrot.slane %v7287_v51, 1  ;;  %v2707_v53 = vrot.slane %v7290_v45, 1  ;;  %v2802_v17 = vrot.slane %v7287_v51, 7 }
 0x237   : > { %v7307_v31 = vmax.f32 %v2598_v63, %v7234_v39  ;;  %v2691_v8 = vrot.slane %v7296_v23, 1  ;;  %v2787_v62 = vrot.slane %v7296_v23, 7  ;;  %v2803_v57 = vrot.slane %v7290_v45, 7 }
 0x238   : > { %v2708_v61 = vrot.slane %v7301_v60, 1  ;;  %v2722_v55 = vsel %vm1034_vm0, %v2690_v0, %v2706_v22  ;;  %v2738_v24 = vsel %vm1034_vm0, %v2706_v22, %v2690_v0  ;;  %v2804_v6 = vrot.slane %v7301_v60, 7 }
 0x239   : > { %v2692_v32 = vrot.slane %v7307_v31, 1  ;;  %v2723_v40 = vsel %vm1034_vm0, %v2691_v8, %v2707_v53  ;;  %v2739_v2 = vsel %vm1034_vm0, %v2707_v53, %v2691_v8  ;;  %v2755_v9 = vsel %vm997_vm3, %v2738_v24, -inf }
 0x23a   : > { %v2757_v41 = vsel %vm997_vm3, %v2739_v2, -inf  ;;  %v2788_v33 = vrot.slane %v7307_v31, 7  ;;  %v2818_v21 = vsel %vm1135_vm1, %v2786_v47, %v2802_v17  ;;  %v2819_v26 = vsel %vm1135_vm1, %v2787_v62, %v2803_v57 }
 0x23b   : > { %v2724_v37 = vsel %vm1034_vm0, %v2692_v32, %v2708_v61  ;;  %v2740_v63 = vsel %vm1034_vm0, %v2708_v61, %v2692_v32  ;;  %v2834_v0 = vsel %vm1135_vm1, %v2802_v17, %v2786_v47  ;;  %v2835_v22 = vsel %vm1135_vm1, %v2803_v57, %v2787_v62 }
 0x23c   : > { %v2759_v53 = vsel %vm997_vm3, %v2740_v63, -inf  ;;  %v2820_v8 = vsel %vm1135_vm1, %v2788_v33, %v2804_v6  ;;  %v2836_v24 = vsel %vm1135_vm1, %v2804_v6, %v2788_v33  ;;  %v2850_v2 = vsel %vm994_vm2, %v2834_v0, -inf }
 0x23d   : > { %v2852_v61 = vsel %vm994_vm2, %v2835_v22, -inf  ;;  %v2854_v47 = vsel %vm994_vm2, %v2836_v24, -inf  ;;  %v2882_v17 = vmax.f32 %v2850_v2, %v2722_v55  ;;  %v2883_v62 = vmax.f32 %v2818_v21, %v2755_v9 }
 0x23e   : > { %v2884_v57 = vmax.f32 %v2852_v61, %v2723_v40  ;;  %v2885_v32 = vmax.f32 %v2819_v26, %v2757_v41  ;;  %v2886_v63 = vmax.f32 %v2854_v47, %v2724_v37  ;;  %v2887_v36 = vmax.f32 %v2820_v8, %v2759_v53 }
 0x23f   : > { %v2914_v46 = vmax.f32 %v7283_v27, %v2882_v17  ;;  %v2915_v30 = vmax.f32 %v7287_v51, %v2883_v62  ;;  %v2946_v6 = vrot.slane %v7283_v27, 2  ;;  %v2947_v33 = vrot.slane %v7296_v23, 2 }
 0x240   : > { %v2916_v0 = vmax.f32 %v7296_v23, %v2884_v57  ;;  %v2917_v22 = vmax.f32 %v7290_v45, %v2885_v32  ;;  %v2918_v24 = vmax.f32 %v7307_v31, %v2886_v63  ;;  %v2919_v55 = vmax.f32 %v7301_v60, %v2887_v36 }
 0x241   : > { %v2948_v40 = vrot.slane %v7307_v31, 2  ;;  %v2962_v9 = vrot.slane %v7287_v51, 2  ;;  %v2963_v41 = vrot.slane %v7290_v45, 2  ;;  %v2964_v21 = vrot.slane %v7301_v60, 2 }
 0x242   : > { %v3042_v26 = vrot.slane %v7283_v27, 6  ;;  %v3043_v37 = vrot.slane %v7296_v23, 6  ;;  %v3044_v53 = vrot.slane %v7307_v31, 6  ;;  %v3058_v8 = vrot.slane %v7287_v51, 6 }
 0x243   : > { %v2978_v2 = vsel %vm1300_vm4, %v2946_v6, %v2962_v9  ;;  %v2979_v36 = vsel %vm1300_vm4, %v2947_v33, %v2963_v41  ;;  %v2980_v61 = vsel %vm1300_vm4, %v2948_v40, %v2964_v21  ;;  %v2994_v47 = vsel %vm1300_vm4, %v2962_v9, %v2946_v6 }
 0x244   : > { %v2995_v17 = vsel %vm1300_vm4, %v2963_v41, %v2947_v33  ;;  %v2996_v62 = vsel %vm1300_vm4, %v2964_v21, %v2948_v40  ;;  %v3011_v57 = vsel %vm1001_vm5, %v2994_v47, -inf  ;;  %v3059_v32 = vrot.slane %v7290_v45, 6 }
 0x245   : > { %v3013_v63 = vsel %vm1001_vm5, %v2995_v17, -inf  ;;  %v3015_v13 = vsel %vm1001_vm5, %v2996_v62, -inf  ;;  %v3060_v43 = vrot.slane %v7301_v60, 6  ;;  %v3074_v6 = vsel %vm1401_vm6, %v3042_v26, %v3058_v8 }
 0x246   : > { %v3075_v33 = vsel %vm1401_vm6, %v3043_v37, %v3059_v32  ;;  %v3090_v40 = vsel %vm1401_vm6, %v3058_v8, %v3042_v26  ;;  %v3091_v9 = vsel %vm1401_vm6, %v3059_v32, %v3043_v37  ;;  %v3139_v41 = vmax.f32 %v3074_v6, %v3011_v57 }
 0x247   : > { %v3076_v21 = vsel %vm1401_vm6, %v3044_v53, %v3060_v43  ;;  %v3092_v47 = vsel %vm1401_vm6, %v3060_v43, %v3044_v53  ;;  %v3106_v17 = vsel %vm998_vm7, %v3090_v40, -inf  ;;  %v3108_v62 = vsel %vm998_vm7, %v3091_v9, -inf }
 0x248   : > { %v3110_v25 = vsel %vm998_vm7, %v3092_v47, -inf  ;;  %v3138_v26 = vmax.f32 %v3106_v17, %v2978_v2  ;;  %v3140_v8 = vmax.f32 %v3108_v62, %v2979_v36  ;;  %v3141_v19 = vmax.f32 %v3075_v33, %v3013_v63 }
 0x249   : > { %v3142_v37 = vmax.f32 %v3110_v25, %v2980_v61  ;;  %v3143_v57 = vmax.f32 %v3076_v21, %v3015_v13  ;;  %v7406_v32 = vmax.f32 %v2915_v30, %v3139_v41  ;;  %v3522_v6 = vpack.c.bf16 %v7287_v51, %v7283_v27 }
 0x24a   : > { %v7410_v43 = vmax.f32 %v2914_v46, %v3138_v26  ;;  %v7412_v53 = vmax.f32 %v2916_v0, %v3140_v8  ;;  %v7414_v40 = vmax.f32 %v2917_v22, %v3141_v19  ;;  %v9440_v9 = vmax.f32 %v7158_v28, %v6562_v12 }
 0x24b   : > { %v7420_v36 = vmax.f32 %v2918_v24, %v3142_v37  ;;  %v7422_v25 = vmax.f32 %v2919_v55, %v3143_v57  ;;  %v9441_v13 = vmax.f32 %v7150_v34, %v6564_v16  ;;  %v1611_v27 = vmax.f32 %v7012_v20, %v6781_v49 }
 0x24c   : > { %v2536_v2 = vmax.f32 %v9440_v9, %v7060_v35  ;;  %v3394_v19 = vmax.f32 %v7410_v43, %v7412_v53  ;;  %v3395_v51 = vmax.f32 %v7406_v32, %v7414_v40  ;;  %v3332_v46 = vmax.f32 %v7412_v53, %v7410_v43 }
 0x24d   : > { %v2537_v30 = vmax.f32 %v9441_v13, %v7058_v10  ;;  %v3333_v16 = vmax.f32 %v7414_v40, %v7406_v32  ;;  %v1612_v22 = vmax.f32 %v7007_v54, %v6757_v5  ;;  %v1676_v49 = vmax.f32 %v1611_v27, %v6681_v1 }
 0x24e   : > { %v2600_v12 = vmax.f32 %v2536_v2, %v7234_v39  ;;  %v3458_v24 = vmax.f32 %v3394_v19, %v7420_v36  ;;  %v3459_v55 = vmax.f32 %v3395_v51, %v7422_v25  ;;  %v7449_v63 = vmax.f32 %v3332_v46, %v7420_v36 }
 0x24f   : > { %v2601_v0 = vmax.f32 %v2537_v30, %v7232_v42  ;;  %v7455_v41 = vmax.f32 %v3333_v16, %v7422_v25  ;;  %v1677_v5 = vmax.f32 %v1612_v22, %v6669_v50  ;;  %v1741_v21 = vmax.f32 %v1676_v49, %v6937_v29  ;;  %v9442_v30 = vld [vmem:[#allocation37_spill] sm:$0xff] }
 0x250   : > { %v7446_v61 = vmax.f32 %v2600_v12, %v7278_v56  ;;  %v3523_v47 = vpack.c.bf16 %v3459_v55, %v3458_v24  ;;  %v3524_v19 = vpack.c.bf16 %v7290_v45, %v7296_v23 }
 0x251   : > { %v7452_v33 = vmax.f32 %v2601_v0, %v7273_v52  ;;  %v1742_v13 = vmax.f32 %v1677_v5, %v6929_v59  ;;  %v1806_v27 = vmax.f32 %v1741_v21, %v9442_v30 }
 0x252   : > { %v2693_v17 = vrot.slane %v7446_v61, 1  ;;  %v2789_v62 = vrot.slane %v7446_v61, 7  ;;  %v2949_v26 = vrot.slane %v7446_v61, 2  ;;  %v3045_v9 = vrot.slane %v7446_v61, 6  ;;  %3682 = vmatprep.mubr.bf16.mxu1 %v3523_v47  ;;  %v9443_v47 = vld [vmem:[#allocation35_spill] sm:$0xff] }
 0x253   : > { %v2709_v8 = vrot.slane %v7452_v33, 1  ;;  %v2805_v37 = vrot.slane %v7452_v33, 7  ;;  %v2965_v57 = vrot.slane %v7452_v33, 2  ;;  %v3061_v2 = vrot.slane %v7452_v33, 6  ;;  %3683 = vmatmul.mubr.bf16.vlgmr.msra.gmra.mxu1 %v3522_v6 }
 0x255   : > { %v2725_v51 = vsel %vm1034_vm0, %v2693_v17, %v2709_v8  ;;  %v2741_v12 = vsel %vm1034_vm0, %v2709_v8, %v2693_v17  ;;  %v2821_v46 = vsel %vm1135_vm1, %v2789_v62, %v2805_v37  ;;  %v2837_v0 = vsel %vm1135_vm1, %v2805_v37, %v2789_v62 }
 0x256   : > { %v2761_v16 = vsel %vm997_vm3, %v2741_v12, -inf  ;;  %v2856_v22 = vsel %vm994_vm2, %v2837_v0, -inf  ;;  %v2981_v45 = vsel %vm1300_vm4, %v2949_v26, %v2965_v57  ;;  %v2997_v23 = vsel %vm1300_vm4, %v2965_v57, %v2949_v26 }
 0x257   : > { %v2888_v6 = vmax.f32 %v2856_v22, %v2725_v51  ;;  %v2889_v49 = vmax.f32 %v2821_v46, %v2761_v16  ;;  %v3017_v24 = vsel %vm1001_vm5, %v2997_v23, -inf  ;;  %v3077_v55 = vsel %vm1401_vm6, %v3045_v9, %v3061_v2 }
 0x258   : > { %v3093_v5 = vsel %vm1401_vm6, %v3061_v2, %v3045_v9  ;;  %v3145_v21 = vmax.f32 %v3077_v55, %v3017_v24  ;;  %v1807_v17 = vmax.f32 %v1742_v13, %v9443_v47  ;;  %v1896_v62 = vrot.slane %v1806_v27, 1 }
 0x259   : > { %v2920_v8 = vmax.f32 %v7446_v61, %v2888_v6  ;;  %v2921_v37 = vmax.f32 %v7452_v33, %v2889_v49  ;;  %v3112_v26 = vsel %vm998_vm7, %v3093_v5, -inf  ;;  %v1992_v57 = vrot.slane %v1806_v27, 7 }
 0x25a   : > { %v3144_v51 = vmax.f32 %v3112_v26, %v2981_v45  ;;  %v1871_v12 = vpack.c.bf16 %v1807_v17, %v1806_v27  ;;  %v1912_v46 = vrot.slane %v1807_v17, 1  ;;  %v2008_v0 = vrot.slane %v1807_v17, 7 }
 0x25b   : > { %v7498_v16 = vmax.f32 %v2921_v37, %v3145_v21  ;;  %v2152_v22 = vrot.slane %v1806_v27, 2  ;;  %v2168_v9 = vrot.slane %v1807_v17, 2  ;;  %v2248_v2 = vrot.slane %v1806_v27, 6 }
 0x25c   : > { %v7500_v23 = vmax.f32 %v2920_v8, %v3144_v51  ;;  %v1928_v13 = vsel %vm1034_vm0, %v1896_v62, %v1912_v46  ;;  %v1944_v6 = vsel %vm1034_vm0, %v1912_v46, %v1896_v62  ;;  %v2024_v49 = vsel %vm1135_vm1, %v1992_v57, %v2008_v0  ;;  %3987 = vmatprep.mubr.bf16.mxu0 %v1871_v12 }
 0x25d   : > { %v3461_v45 = vmax.f32 %v7455_v41, %v7498_v16  ;;  %v1967_v24 = vsel %vm997_vm3, %v1944_v6, -inf  ;;  %v2040_v55 = vsel %vm1135_vm1, %v2008_v0, %v1992_v57  ;;  %v2184_v5 = vsel %vm1300_vm4, %v2152_v22, %v2168_v9 }
 0x25e   : > { %v3460_v21 = vmax.f32 %v7449_v63, %v7500_v23  ;;  %v2062_v62 = vsel %vm994_vm2, %v2040_v55, -inf  ;;  %v2095_v8 = vmax.f32 %v2024_v49, %v1967_v24  ;;  %v2200_v37 = vsel %vm1300_vm4, %v2168_v9, %v2152_v22 }
 0x25f   : > { %v2094_v41 = vmax.f32 %v2062_v62, %v1928_v13  ;;  %v2223_v26 = vsel %vm1001_vm5, %v2200_v37, -inf  ;;  %v2264_v51 = vrot.slane %v1807_v17, 6  ;;  %v1870_v57 = vpack.c.bf16 %v6850_v11, %v6803_v7 }
 0x260   : > { %v3525_v12 = vpack.c.bf16 %v3461_v45, %v3460_v21  ;;  %v2127_v46 = vmax.f32 %v1807_v17, %v2095_v8  ;;  %v2474_v63 = vmax.f32 %v7234_v39, %v7060_v35  ;;  %v2475_v0 = vmax.f32 %v7232_v42, %v7058_v10 }
 0x261   : > { %v2126_v6 = vmax.f32 %v1806_v27, %v2094_v41  ;;  %v2280_v22 = vsel %vm1401_vm6, %v2248_v2, %v2264_v51  ;;  %v2296_v9 = vsel %vm1401_vm6, %v2264_v51, %v2248_v2  ;;  %3988 = vmatmul.mubr.bf16.gmra.mxu0 %v1870_v57  ;;  %v3270_v13 = vmax.f32 %v7420_v36, %v7410_v43 }
 0x262   : > { %3690 = vmatprep.mubr.bf16.mxu1 %v3525_v12  ;;  %v2318_v7 = vsel %vm998_vm7, %v2296_v9, -inf  ;;  %v2351_v11 = vmax.f32 %v2280_v22, %v2223_v26  ;;  %v2538_v35 = vmax.f32 %v2474_v63, %v7158_v28  ;;  %v2539_v10 = vmax.f32 %v2475_v0, %v7150_v34  ;;  %v9444_v9 = vld [vmem:[#allocation32_spill] sm:$0xff] }
 0x263   : > { %v2350_v27 = vmax.f32 %v2318_v7, %v2184_v5  ;;  %3691 = vmatmul.mubr.bf16.gmra.mxu1 %v3524_v19  ;;  %v3271_v17 = vmax.f32 %v7422_v25, %v7406_v32  ;;  %v7543_v2 = vmax.f32 %v3270_v13, %v7412_v53  ;;  %v1613_v43 = vmax.f32 %v6937_v29, %v6681_v1 }
 0x264   : > { %v7547_v49 = vmax.f32 %v2127_v46, %v2351_v11  ;;  %v2602_v45 = vmax.f32 %v2538_v35, %v7278_v56  ;;  %v2603_v24 = vmax.f32 %v2539_v10, %v7273_v52  ;;  %v1614_v55 = vmax.f32 %v6929_v59, %v6669_v50 }
 0x265   : > { %v7553_v5 = vmax.f32 %v2126_v6, %v2350_v27  ;;  %v3335_v19 = vmax.f32 %v3271_v17, %v7414_v40  ;;  %v3398_v32 = vmax.f32 %v7543_v2, %v7500_v23  ;;  %v1678_v21 = vmax.f32 %v1613_v43, %v7012_v20 }
 0x266   : > { %v7560_v1 = vmax.f32 %v2603_v24, %v7547_v49  ;;  %v1679_v62 = vmax.f32 %v1614_v55, %v7007_v54  ;;  %v3526_v8 = vpack.c.bf16 %v7301_v60, %v7307_v31  ;;  %v1872_v50 = vpack.c.bf16 %v6842_v38, %v6794_v15 }
 0x267   : > { %v7568_v37 = vmax.f32 %v2602_v45, %v7553_v5  ;;  %v3399_v41 = vmax.f32 %v3335_v19, %v7498_v16  ;;  %v1743_v26 = vmax.f32 %v1678_v21, %v9442_v30  ;;  %v2476_v51 = vmax.f32 %v7278_v56, %v7158_v28 }
 0x268   : > { %v2710_v57 = vrot.slane %v7560_v1, 1  ;;  %v2806_v12 = vrot.slane %v7560_v1, 7  ;;  %v2966_v46 = vrot.slane %v7560_v1, 2  ;;  %v3062_v63 = vrot.slane %v7560_v1, 6 }
 0x269   : > { %v2694_v15 = vrot.slane %v7568_v37, 1  ;;  %v2790_v38 = vrot.slane %v7568_v37, 7  ;;  %v2950_v0 = vrot.slane %v7568_v37, 2  ;;  %v3046_v6 = vrot.slane %v7568_v37, 6 }
 0x26a   : > { %v1744_v22 = vmax.f32 %v1679_v62, %v9443_v47  ;;  %v1808_v28 = vmax.f32 %v1743_v26, %v9444_v9  ;;  %v2477_v13 = vmax.f32 %v7273_v52, %v7150_v34  ;;  %v7587_v7 = vmax.f32 %v2476_v51, %v7234_v39  ;;  %v9445_v26 = vld [vmem:[#allocation31_spill] sm:$0xff] }
 0x26b   : > { %v2726_v11 = vsel %vm1034_vm0, %v2694_v15, %v2710_v57  ;;  %v2742_v35 = vsel %vm1034_vm0, %v2710_v57, %v2694_v15  ;;  %v2822_v10 = vsel %vm1135_vm1, %v2790_v38, %v2806_v12  ;;  %v2838_v27 = vsel %vm1135_vm1, %v2806_v12, %v2790_v38 }
 0x26c   : > { %v2763_v17 = vsel %vm997_vm3, %v2742_v35, -inf  ;;  %v2858_v34 = vsel %vm994_vm2, %v2838_v27, -inf  ;;  %v2982_v2 = vsel %vm1300_vm4, %v2950_v0, %v2966_v46  ;;  %v2998_v43 = vsel %vm1300_vm4, %v2966_v46, %v2950_v0 }
 0x26d   : > { %v2890_v45 = vmax.f32 %v2858_v34, %v2726_v11  ;;  %v2891_v24 = vmax.f32 %v2822_v10, %v2763_v17  ;;  %v3019_v55 = vsel %vm1001_vm5, %v2998_v43, -inf  ;;  %v3078_v19 = vsel %vm1401_vm6, %v3046_v6, %v3062_v63 }
 0x26e   : > { %v3094_v21 = vsel %vm1401_vm6, %v3062_v63, %v3046_v6  ;;  %v3147_v62 = vmax.f32 %v3078_v19, %v3019_v55  ;;  %v1809_v51 = vmax.f32 %v1744_v22, %v9445_v26  ;;  %v1897_v57 = vrot.slane %v1808_v28, 1 }
 0x26f   : > { %v2922_v12 = vmax.f32 %v7568_v37, %v2890_v45  ;;  %v2923_v15 = vmax.f32 %v7560_v1, %v2891_v24  ;;  %v3114_v46 = vsel %vm998_vm7, %v3094_v21, -inf  ;;  %v1993_v38 = vrot.slane %v1808_v28, 7 }
 0x270   : > { %v3146_v0 = vmax.f32 %v3114_v46, %v2982_v2  ;;  %v1873_v11 = vpack.c.bf16 %v1809_v51, %v1808_v28  ;;  %v1913_v35 = vrot.slane %v1809_v51, 1  ;;  %v2009_v10 = vrot.slane %v1809_v51, 7 }
 0x271   : > { %v7616_v27 = vmax.f32 %v2923_v15, %v3147_v62  ;;  %v2153_v17 = vrot.slane %v1808_v28, 2  ;;  %v2169_v63 = vrot.slane %v1809_v51, 2  ;;  %v2249_v6 = vrot.slane %v1808_v28, 6 }
 0x272   : > { %v7618_v34 = vmax.f32 %v2922_v12, %v3146_v0  ;;  %v1929_v22 = vsel %vm1034_vm0, %v1897_v57, %v1913_v35  ;;  %v1945_v43 = vsel %vm1034_vm0, %v1913_v35, %v1897_v57  ;;  %v2025_v45 = vsel %vm1135_vm1, %v1993_v38, %v2009_v10  ;;  %3995 = vmatprep.mubr.bf16.mxu0 %v1873_v11 }
 0x273   : > { %v3463_v2 = vmax.f32 %v3399_v41, %v7616_v27  ;;  %v1969_v24 = vsel %vm997_vm3, %v1945_v43, -inf  ;;  %v2041_v55 = vsel %vm1135_vm1, %v2009_v10, %v1993_v38  ;;  %v2185_v19 = vsel %vm1300_vm4, %v2153_v17, %v2169_v63  ;;  %3996 = vmatmul.mubr.bf16.gmra.mxu0 %v1872_v50 }
 0x274   : > { %v3462_v21 = vmax.f32 %v3398_v32, %v7618_v34  ;;  %v2064_v62 = vsel %vm994_vm2, %v2041_v55, -inf  ;;  %v2097_v57 = vmax.f32 %v2025_v45, %v1969_v24  ;;  %v2201_v12 = vsel %vm1300_vm4, %v2169_v63, %v2153_v17  ;;  %v9446_v24 = vld [vmem:[#allocation28_spill] sm:$0xff]  ;;  %v9447_v55 = vld [vmem:[#allocation30_spill] sm:$0xff] }
 0x275   : > { %v2096_v41 = vmax.f32 %v2064_v62, %v1929_v22  ;;  %v2225_v15 = vsel %vm1001_vm5, %v2201_v12, -inf  ;;  %v2265_v46 = vrot.slane %v1809_v51, 6  ;;  %v2541_v38 = vmax.f32 %v2477_v13, %v7232_v42 }
 0x276   : > { %v3527_v0 = vpack.c.bf16 %v3463_v2, %v3462_v21  ;;  %v2129_v11 = vmax.f32 %v1809_v51, %v2097_v57  ;;  %v2604_v50 = vmax.f32 %v7587_v7, %v7553_v5  ;;  %v3272_v32 = vmax.f32 %v7500_v23, %v7412_v53 }
 0x277   : > { %v2128_v35 = vmax.f32 %v1808_v28, %v2096_v41  ;;  %v2281_v10 = vsel %vm1401_vm6, %v2249_v6, %v2265_v46  ;;  %v2297_v17 = vsel %vm1401_vm6, %v2265_v46, %v2249_v6  ;;  %v2605_v63 = vmax.f32 %v2541_v38, %v7547_v49 }
 0x278   : > { %3698 = vmatprep.mubr.bf16.mxu1 %v3527_v0  ;;  %v2320_v13 = vsel %vm998_vm7, %v2297_v17, -inf  ;;  %v2353_v51 = vmax.f32 %v2281_v10, %v2225_v15  ;;  %v3273_v7 = vmax.f32 %v7498_v16, %v7414_v40  ;;  %v7655_v22 = vmax.f32 %v3272_v32, %v7420_v36 }
 0x279   : > { %v2352_v53 = vmax.f32 %v2320_v13, %v2185_v19  ;;  %3699 = vmatmul.mubr.bf16.gmra.mxu1 %v3526_v8  ;;  %v1615_v28 = vmax.f32 %v9442_v30, %v7012_v20  ;;  %v1616_v6 = vmax.f32 %v9443_v47, %v7007_v54  ;;  %v3528_v43 = vpack.c.bf16 %v7452_v33, %v7446_v61 }
 0x27a   : > { %v7666_v45 = vmax.f32 %v2129_v11, %v2353_v51  ;;  %v3337_v40 = vmax.f32 %v3273_v7, %v7422_v25  ;;  %v3400_v2 = vmax.f32 %v7655_v22, %v7618_v34  ;;  %v1874_v60 = vpack.c.bf16 %v9447_v55, %v9446_v24 }
 0x27b   : > { %v7673_v31 = vmax.f32 %v2128_v35, %v2352_v53  ;;  %v1680_v20 = vmax.f32 %v1615_v28, %v6937_v29  ;;  %v1681_v8 = vmax.f32 %v1616_v6, %v6929_v59  ;;  %v2478_v54 = vmax.f32 %v7553_v5, %v7234_v39 }
 0x27c   : > { %v7680_v19 = vmax.f32 %v2605_v63, %v7666_v45  ;;  %v3401_v21 = vmax.f32 %v3337_v40, %v7616_v27  ;;  %v2479_v62 = vmax.f32 %v7547_v49, %v7232_v42  ;;  %v3274_v57 = vmax.f32 %v7618_v34, %v7420_v36 }
 0x27d   : > { %v7688_v12 = vmax.f32 %v2604_v50, %v7673_v31  ;;  %v1745_v41 = vmax.f32 %v1680_v20, %v9444_v9  ;;  %v1746_v15 = vmax.f32 %v1681_v8, %v9445_v26  ;;  %v7693_v39 = vmax.f32 %v2478_v54, %v7278_v56 }
 0x27e   : > { %v2711_v46 = vrot.slane %v7680_v19, 1  ;;  %v2807_v38 = vrot.slane %v7680_v19, 7  ;;  %v2967_v0 = vrot.slane %v7680_v19, 2  ;;  %v3063_v42 = vrot.slane %v7680_v19, 6 }
 0x27f   : > { %v2695_v11 = vrot.slane %v7688_v12, 1  ;;  %v2791_v50 = vrot.slane %v7688_v12, 7  ;;  %v2951_v32 = vrot.slane %v7688_v12, 2  ;;  %v3047_v35 = vrot.slane %v7688_v12, 6 }
 0x280   : > { %v1810_v10 = vmax.f32 %v1745_v41, %v6489_v3  ;;  %v1811_v17 = vmax.f32 %v1746_v15, %v6487_v18  ;;  %v7706_v63 = vmax.f32 %v2479_v62, %v7273_v52  ;;  %v2606_v13 = vmax.f32 %v7693_v39, %v7673_v31 }
 0x281   : > { %v2727_v51 = vsel %vm1034_vm0, %v2695_v11, %v2711_v46  ;;  %v2743_v7 = vsel %vm1034_vm0, %v2711_v46, %v2695_v11  ;;  %v2823_v53 = vsel %vm1135_vm1, %v2791_v50, %v2807_v38  ;;  %v2839_v28 = vsel %vm1135_vm1, %v2807_v38, %v2791_v50 }
 0x282   : > { %v2765_v6 = vsel %vm997_vm3, %v2743_v7, -inf  ;;  %v2860_v40 = vsel %vm994_vm2, %v2839_v28, -inf  ;;  %v2983_v24 = vsel %vm1300_vm4, %v2951_v32, %v2967_v0  ;;  %v2999_v55 = vsel %vm1300_vm4, %v2967_v0, %v2951_v32 }
 0x283   : > { %v2892_v20 = vmax.f32 %v2860_v40, %v2727_v51  ;;  %v2893_v8 = vmax.f32 %v2823_v53, %v2765_v6  ;;  %v3021_v54 = vsel %vm1001_vm5, %v2999_v55, -inf  ;;  %v3079_v62 = vsel %vm1401_vm6, %v3047_v35, %v3063_v42 }
 0x284   : > { %v3095_v41 = vsel %vm1401_vm6, %v3063_v42, %v3047_v35  ;;  %v3149_v15 = vmax.f32 %v3079_v62, %v3021_v54  ;;  %v1875_v46 = vpack.c.bf16 %v1811_v17, %v1810_v10  ;;  %v1898_v38 = vrot.slane %v1810_v10, 1 }
 0x285   : > { %v2924_v11 = vmax.f32 %v7688_v12, %v2892_v20  ;;  %v2925_v50 = vmax.f32 %v7680_v19, %v2893_v8  ;;  %v3116_v0 = vsel %vm998_vm7, %v3095_v41, -inf  ;;  %v1914_v32 = vrot.slane %v1811_v17, 1 }
 0x286   : > { %v3148_v51 = vmax.f32 %v3116_v0, %v2983_v24  ;;  %v1994_v7 = vrot.slane %v1810_v10, 7  ;;  %v2010_v53 = vrot.slane %v1811_v17, 7  ;;  %v2154_v28 = vrot.slane %v1810_v10, 2  ;;  %4003 = vmatprep.mubr.bf16.mxu0 %v1875_v46 }
 0x287   : > { %v7736_v6 = vmax.f32 %v2925_v50, %v3149_v15  ;;  %v1930_v42 = vsel %vm1034_vm0, %v1898_v38, %v1914_v32  ;;  %v1946_v35 = vsel %vm1034_vm0, %v1914_v32, %v1898_v38  ;;  %v2170_v40 = vrot.slane %v1811_v17, 2  ;;  %4004 = vmatmul.mubr.bf16.gmra.mxu0 %v1874_v60 }
 0x288   : > { %v7742_v55 = vmax.f32 %v2924_v11, %v3148_v51  ;;  %v1971_v20 = vsel %vm997_vm3, %v1946_v35, -inf  ;;  %v2026_v24 = vsel %vm1135_vm1, %v1994_v7, %v2010_v53  ;;  %v2042_v8 = vsel %vm1135_vm1, %v2010_v53, %v1994_v7 }
 0x289   : > { %v3465_v54 = vmax.f32 %v3401_v21, %v7736_v6  ;;  %v2066_v62 = vsel %vm994_vm2, %v2042_v8, -inf  ;;  %v2099_v41 = vmax.f32 %v2026_v24, %v1971_v20  ;;  %v2186_v60 = vsel %vm1300_vm4, %v2154_v28, %v2170_v40  ;;  %v9448_v24 = vld [vmem:[#allocation26_spill] sm:$0xff]  ;;  %v9449_v8 = vld [vmem:[#allocation29_spill] sm:$0xff] }
 0x28a   : > { %v3464_v15 = vmax.f32 %v3400_v2, %v7742_v55  ;;  %v2098_v46 = vmax.f32 %v2066_v62, %v1930_v42  ;;  %v2202_v38 = vsel %vm1300_vm4, %v2170_v40, %v2154_v28  ;;  %v2250_v11 = vrot.slane %v1810_v10, 6 }
 0x28b   : > { %v2131_v50 = vmax.f32 %v1811_v17, %v2099_v41  ;;  %v2227_v21 = vsel %vm1001_vm5, %v2202_v38, -inf  ;;  %v2266_v0 = vrot.slane %v1811_v17, 6  ;;  %v2607_v32 = vmax.f32 %v7706_v63, %v7666_v45 }
 0x28c   : > { %v3529_v51 = vpack.c.bf16 %v3465_v54, %v3464_v15  ;;  %v2130_v7 = vmax.f32 %v1810_v10, %v2098_v46  ;;  %v3275_v53 = vmax.f32 %v7616_v27, %v7422_v25  ;;  %v7771_v22 = vmax.f32 %v3274_v57, %v7500_v23 }
 0x28d   : > { %v2282_v2 = vsel %vm1401_vm6, %v2250_v11, %v2266_v0  ;;  %v2298_v17 = vsel %vm1401_vm6, %v2266_v0, %v2250_v11  ;;  %v1617_v63 = vmax.f32 %v9444_v9, %v6937_v29  ;;  %v1618_v10 = vmax.f32 %v9445_v26, %v6929_v59  ;;  %v9450_v11 = vld [vmem:[#allocation39_spill] sm:$0xff] }
 0x28e   : > { %3706 = vmatprep.mubr.bf16.mxu1 %v3529_v51  ;;  %v2322_v25 = vsel %vm998_vm7, %v2298_v17, -inf  ;;  %v2355_v28 = vmax.f32 %v2282_v2, %v2227_v21  ;;  %v7784_v36 = vmax.f32 %v3275_v53, %v7498_v16  ;;  %v3402_v57 = vmax.f32 %v7771_v22, %v7742_v55 }
 0x28f   : > { %v2354_v42 = vmax.f32 %v2322_v25, %v2186_v60  ;;  %3707 = vmatmul.mubr.bf16.gmra.mxu1 %v3528_v43  ;;  %v1682_v29 = vmax.f32 %v1617_v63, %v9442_v30  ;;  %v1683_v59 = vmax.f32 %v1618_v10, %v9443_v47  ;;  %v3530_v35 = vpack.c.bf16 %v7560_v1, %v7568_v37 }
 0x290   : > { %v7795_v40 = vmax.f32 %v2131_v50, %v2355_v28  ;;  %v3403_v20 = vmax.f32 %v7784_v36, %v7736_v6  ;;  %v1876_v54 = vpack.c.bf16 %v9449_v8, %v9448_v24  ;;  %v2480_v62 = vmax.f32 %v7673_v31, %v7278_v56  ;;  %v9451_v50 = vld [vmem:[#allocation38_spill] sm:$0xff] }
 0x291   : > { %v7803_v61 = vmax.f32 %v2130_v7, %v2354_v42  ;;  %v1747_v33 = vmax.f32 %v1682_v29, %v6489_v3  ;;  %v1748_v43 = vmax.f32 %v1683_v59, %v6487_v18  ;;  %v2481_v41 = vmax.f32 %v7666_v45, %v7273_v52 }
 0x292   : > { %v7810_v60 = vmax.f32 %v2607_v32, %v7795_v40  ;;  %v7813_v15 = vmax.f32 %v2480_v62, %v7553_v5  ;;  %v3276_v46 = vmax.f32 %v7742_v55, %v7500_v23  ;;  %v3277_v56 = vmax.f32 %v7736_v6, %v7498_v16 }
 0x293   : > { %v7823_v38 = vmax.f32 %v2606_v13, %v7803_v61  ;;  %v1812_v52 = vmax.f32 %v1747_v33, %v9450_v11  ;;  %v1813_v21 = vmax.f32 %v1748_v43, %v9451_v50  ;;  %v7828_v0 = vmax.f32 %v2481_v41, %v7547_v49 }
 0x294   : > { %v2712_v32 = vrot.slane %v7810_v60, 1  ;;  %v2808_v51 = vrot.slane %v7810_v60, 7  ;;  %v2968_v7 = vrot.slane %v7810_v60, 2  ;;  %v3064_v53 = vrot.slane %v7810_v60, 6 }
 0x295   : > { %v2696_v2 = vrot.slane %v7823_v38, 1  ;;  %v2792_v39 = vrot.slane %v7823_v38, 7  ;;  %v2952_v13 = vrot.slane %v7823_v38, 2  ;;  %v3048_v17 = vrot.slane %v7823_v38, 6 }
 0x296   : > { %v1877_v63 = vpack.c.bf16 %v1813_v21, %v1812_v52  ;;  %v1899_v10 = vrot.slane %v1812_v52, 1  ;;  %v1915_v25 = vrot.slane %v1813_v21, 1  ;;  %v1995_v28 = vrot.slane %v1812_v52, 7 }
 0x297   : > { %v2728_v36 = vsel %vm1034_vm0, %v2696_v2, %v2712_v32  ;;  %v2744_v42 = vsel %vm1034_vm0, %v2712_v32, %v2696_v2  ;;  %v2824_v29 = vsel %vm1135_vm1, %v2792_v39, %v2808_v51  ;;  %v2840_v59 = vsel %vm1135_vm1, %v2808_v51, %v2792_v39 }
 0x298   : > { %v2767_v24 = vsel %vm997_vm3, %v2744_v42, -inf  ;;  %v2862_v8 = vsel %vm994_vm2, %v2840_v59, -inf  ;;  %v2984_v62 = vsel %vm1300_vm4, %v2952_v13, %v2968_v7  ;;  %v3000_v33 = vsel %vm1300_vm4, %v2968_v7, %v2952_v13  ;;  %4011 = vmatprep.mubr.bf16.mxu0 %v1877_v63 }
 0x299   : > { %v2894_v43 = vmax.f32 %v2862_v8, %v2728_v36  ;;  %v2895_v41 = vmax.f32 %v2824_v29, %v2767_v24  ;;  %v3023_v32 = vsel %vm1001_vm5, %v3000_v33, -inf  ;;  %v3080_v51 = vsel %vm1401_vm6, %v3048_v17, %v3064_v53  ;;  %4012 = vmatmul.mubr.bf16.gmra.mxu0 %v1876_v54 }
 0x29a   : > { %v3096_v2 = vsel %vm1401_vm6, %v3064_v53, %v3048_v17  ;;  %v3151_v39 = vmax.f32 %v3080_v51, %v3023_v32  ;;  %v1931_v42 = vsel %vm1034_vm0, %v1899_v10, %v1915_v25  ;;  %v1947_v7 = vsel %vm1034_vm0, %v1915_v25, %v1899_v10 }
 0x29b   : > { %v2926_v13 = vmax.f32 %v7823_v38, %v2894_v43  ;;  %v2927_v63 = vmax.f32 %v7810_v60, %v2895_v41  ;;  %v3118_v36 = vsel %vm998_vm7, %v3096_v2, -inf  ;;  %v1973_v54 = vsel %vm997_vm3, %v1947_v7, -inf }
 0x29c   : > { %v3150_v29 = vmax.f32 %v3118_v36, %v2984_v62  ;;  %v2011_v59 = vrot.slane %v1813_v21, 7  ;;  %v2155_v53 = vrot.slane %v1812_v52, 2  ;;  %v2171_v17 = vrot.slane %v1813_v21, 2 }
 0x29d   : > { %v7870_v24 = vmax.f32 %v2927_v63, %v3151_v39  ;;  %v2251_v8 = vrot.slane %v1812_v52, 6  ;;  %v2267_v33 = vrot.slane %v1813_v21, 6  ;;  %v2608_v10 = vmax.f32 %v7813_v15, %v7803_v61 }
 0x29e   : > { %v7874_v25 = vmax.f32 %v2926_v13, %v3150_v29  ;;  %v2027_v43 = vsel %vm1135_vm1, %v1995_v28, %v2011_v59  ;;  %v2043_v41 = vsel %vm1135_vm1, %v2011_v59, %v1995_v28  ;;  %v2187_v62 = vsel %vm1300_vm4, %v2155_v53, %v2171_v17 }
 0x29f   : > { %v3467_v32 = vmax.f32 %v3403_v20, %v7870_v24  ;;  %v2068_v51 = vsel %vm994_vm2, %v2043_v41, -inf  ;;  %v2101_v2 = vmax.f32 %v2027_v43, %v1973_v54  ;;  %v2203_v15 = vsel %vm1300_vm4, %v2171_v17, %v2155_v53  ;;  %v9452_v17 = vld [vmem:[#allocation34_spill] sm:$0xff] }
 0x2a0   : > { %v3466_v39 = vmax.f32 %v3402_v57, %v7874_v25  ;;  %v2100_v7 = vmax.f32 %v2068_v51, %v1931_v42  ;;  %v2229_v28 = vsel %vm1001_vm5, %v2203_v15, -inf  ;;  %v2283_v13 = vsel %vm1401_vm6, %v2251_v8, %v2267_v33 }
 0x2a1   : > { %v2133_v20 = vmax.f32 %v1813_v21, %v2101_v2  ;;  %v2299_v63 = vsel %vm1401_vm6, %v2267_v33, %v2251_v8  ;;  %v2357_v36 = vmax.f32 %v2283_v13, %v2229_v28  ;;  %v2609_v54 = vmax.f32 %v7828_v0, %v7795_v40  ;;  %v9453_v8 = vld [vmem:[#allocation40_spill] sm:$0xff]  ;;  %v9454_v13 = vld [vmem:[#allocation22_spill] sm:$0xff] }
 0x2a2   : > { %v3531_v29 = vpack.c.bf16 %v3467_v32, %v3466_v39  ;;  %v2132_v59 = vmax.f32 %v1812_v52, %v2100_v7  ;;  %v2324_v22 = vsel %vm998_vm7, %v2299_v63, -inf  ;;  %v7905_v57 = vmax.f32 %v3276_v46, %v7618_v34  ;;  %v9455_v63 = vld [vmem:[#allocation21_spill] sm:$0xff] }
 0x2a3   : > { %v2356_v42 = vmax.f32 %v2324_v22, %v2187_v62  ;;  %v7907_v21 = vmax.f32 %v2133_v20, %v2357_v36  ;;  %v7913_v53 = vmax.f32 %v3277_v56, %v7616_v27  ;;  %v1619_v52 = vmax.f32 %v6489_v3, %v9442_v30 }
 0x2a4   : > { %3714 = vmatprep.mubr.bf16.mxu1 %v3531_v29  ;;  %v3404_v0 = vmax.f32 %v7905_v57, %v7874_v25  ;;  %v1620_v23 = vmax.f32 %v6487_v18, %v9443_v47  ;;  %v3532_v46 = vpack.c.bf16 %v7680_v19, %v7688_v12  ;;  %v1878_v33 = vpack.c.bf16 %v9453_v8, %v9452_v17 }
 0x2a5   : > { %v7925_v43 = vmax.f32 %v2132_v59, %v2356_v42  ;;  %3715 = vmatmul.mubr.bf16.gmra.mxu1 %v3530_v35  ;;  %v7931_v30 = vmax.f32 %v2609_v54, %v7907_v21  ;;  %v3405_v16 = vmax.f32 %v7913_v53, %v7870_v24  ;;  %v1684_v47 = vmax.f32 %v1619_v52, %v9444_v9 }
 0x2a6   : > { %v1685_v56 = vmax.f32 %v1620_v23, %v9445_v26  ;;  %v2482_v41 = vmax.f32 %v7803_v61, %v7553_v5  ;;  %v2483_v62 = vmax.f32 %v7795_v40, %v7547_v49  ;;  %v3278_v1 = vmax.f32 %v7874_v25, %v7618_v34 }
 0x2a7   : > { %v7944_v37 = vmax.f32 %v2608_v10, %v7925_v43  ;;  %v2713_v35 = vrot.slane %v7931_v30, 1  ;;  %v2809_v32 = vrot.slane %v7931_v30, 7  ;;  %v2969_v51 = vrot.slane %v7931_v30, 2 }
 0x2a8   : > { %v3065_v2 = vrot.slane %v7931_v30, 6  ;;  %v1749_v15 = vmax.f32 %v1684_v47, %v9450_v11  ;;  %v1750_v5 = vmax.f32 %v1685_v56, %v9451_v50  ;;  %v7953_v49 = vmax.f32 %v2482_v41, %v7673_v31 }
 0x2a9   : > { %v2697_v39 = vrot.slane %v7944_v37, 1  ;;  %v2793_v10 = vrot.slane %v7944_v37, 7  ;;  %v2953_v7 = vrot.slane %v7944_v37, 2  ;;  %v3049_v28 = vrot.slane %v7944_v37, 6 }
 0x2aa   : > { %v1814_v20 = vmax.f32 %v1749_v15, %v9454_v13  ;;  %v1815_v36 = vmax.f32 %v1750_v5, %v9455_v63  ;;  %v7962_v54 = vmax.f32 %v2483_v62, %v7666_v45  ;;  %v2610_v29 = vmax.f32 %v7953_v49, %v7925_v43 }
 0x2ab   : > { %v2729_v59 = vsel %vm1034_vm0, %v2697_v39, %v2713_v35  ;;  %v2745_v22 = vsel %vm1034_vm0, %v2713_v35, %v2697_v39  ;;  %v2825_v42 = vsel %vm1135_vm1, %v2793_v10, %v2809_v32  ;;  %v2841_v53 = vsel %vm1135_vm1, %v2809_v32, %v2793_v10 }
 0x2ac   : > { %v2769_v52 = vsel %vm997_vm3, %v2745_v22, -inf  ;;  %v2864_v23 = vsel %vm994_vm2, %v2841_v53, -inf  ;;  %v2985_v17 = vsel %vm1300_vm4, %v2953_v7, %v2969_v51  ;;  %v3001_v8 = vsel %vm1300_vm4, %v2969_v51, %v2953_v7 }
 0x2ad   : > { %v2896_v47 = vmax.f32 %v2864_v23, %v2729_v59  ;;  %v2897_v56 = vmax.f32 %v2825_v42, %v2769_v52  ;;  %v3025_v41 = vsel %vm1001_vm5, %v3001_v8, -inf  ;;  %v3081_v62 = vsel %vm1401_vm6, %v3049_v28, %v3065_v2 }
 0x2ae   : > { %v3097_v35 = vsel %vm1401_vm6, %v3065_v2, %v3049_v28  ;;  %v3153_v32 = vmax.f32 %v3081_v62, %v3025_v41  ;;  %v1879_v15 = vpack.c.bf16 %v1815_v36, %v1814_v20  ;;  %v1900_v5 = vrot.slane %v1814_v20, 1 }
 0x2af   : > { %v2928_v39 = vmax.f32 %v7944_v37, %v2896_v47  ;;  %v2929_v10 = vmax.f32 %v7931_v30, %v2897_v56  ;;  %v3120_v51 = vsel %vm998_vm7, %v3097_v35, -inf  ;;  %v1916_v7 = vrot.slane %v1815_v36, 1 }
 0x2b0   : > { %v3152_v59 = vmax.f32 %v3120_v51, %v2985_v17  ;;  %v1996_v22 = vrot.slane %v1814_v20, 7  ;;  %v2012_v42 = vrot.slane %v1815_v36, 7  ;;  %v2156_v53 = vrot.slane %v1814_v20, 2  ;;  %4019 = vmatprep.mubr.bf16.mxu0 %v1879_v15 }
 0x2b1   : > { %v7992_v52 = vmax.f32 %v2929_v10, %v3153_v32  ;;  %v1932_v2 = vsel %vm1034_vm0, %v1900_v5, %v1916_v7  ;;  %v1948_v28 = vsel %vm1034_vm0, %v1916_v7, %v1900_v5  ;;  %v2172_v23 = vrot.slane %v1815_v36, 2  ;;  %4020 = vmatmul.mubr.bf16.gmra.mxu0 %v1878_v33 }
 0x2b2   : > { %v7998_v8 = vmax.f32 %v2928_v39, %v3152_v59  ;;  %v1975_v47 = vsel %vm997_vm3, %v1948_v28, -inf  ;;  %v2028_v17 = vsel %vm1135_vm1, %v1996_v22, %v2012_v42  ;;  %v2044_v56 = vsel %vm1135_vm1, %v2012_v42, %v1996_v22 }
 0x2b3   : > { %v3469_v41 = vmax.f32 %v3405_v16, %v7992_v52  ;;  %v2070_v62 = vsel %vm994_vm2, %v2044_v56, -inf  ;;  %v2103_v35 = vmax.f32 %v2028_v17, %v1975_v47  ;;  %v2188_v33 = vsel %vm1300_vm4, %v2156_v53, %v2172_v23  ;;  %v9456_v17 = vld [vmem:[#allocation33_spill] sm:$0xff]  ;;  %v9457_v56 = vld [vmem:[#allocation36_spill] sm:$0xff] }
 0x2b4   : > { %v3468_v32 = vmax.f32 %v3404_v0, %v7998_v8  ;;  %v2102_v15 = vmax.f32 %v2070_v62, %v1932_v2  ;;  %v2204_v5 = vsel %vm1300_vm4, %v2172_v23, %v2156_v53  ;;  %v2252_v39 = vrot.slane %v1814_v20, 6 }
 0x2b5   : > { %v2135_v10 = vmax.f32 %v1815_v36, %v2103_v35  ;;  %v2231_v16 = vsel %vm1001_vm5, %v2204_v5, -inf  ;;  %v2268_v51 = vrot.slane %v1815_v36, 6  ;;  %v2611_v7 = vmax.f32 %v7962_v54, %v7907_v21 }
 0x2b6   : > { %v3533_v59 = vpack.c.bf16 %v3469_v41, %v3468_v32  ;;  %v2134_v22 = vmax.f32 %v1814_v20, %v2102_v15  ;;  %v3279_v42 = vmax.f32 %v7870_v24, %v7616_v27  ;;  %v8027_v57 = vmax.f32 %v3278_v1, %v7742_v55 }
 0x2b7   : > { %v2284_v0 = vsel %vm1401_vm6, %v2252_v39, %v2268_v51  ;;  %v2300_v36 = vsel %vm1401_vm6, %v2268_v51, %v2252_v39  ;;  %v1621_v54 = vmax.f32 %v9450_v11, %v9444_v9  ;;  %v1622_v20 = vmax.f32 %v9451_v50, %v9445_v26  ;;  %v9458_v39 = vld [vmem:[#allocation18_spill] sm:$0xff] }
 0x2b8   : > { %3722 = vmatprep.mubr.bf16.mxu1 %v3533_v59  ;;  %v2326_v27 = vsel %vm998_vm7, %v2300_v36, -inf  ;;  %v2359_v53 = vmax.f32 %v2284_v0, %v2231_v16  ;;  %v8040_v34 = vmax.f32 %v3279_v42, %v7736_v6  ;;  %v3406_v1 = vmax.f32 %v8027_v57, %v7998_v8 }
 0x2b9   : > { %v2358_v2 = vmax.f32 %v2326_v27, %v2188_v33  ;;  %3723 = vmatmul.mubr.bf16.gmra.mxu1 %v3532_v46  ;;  %v1686_v9 = vmax.f32 %v1621_v54, %v6489_v3  ;;  %v1687_v26 = vmax.f32 %v1622_v20, %v6487_v18  ;;  %v3534_v28 = vpack.c.bf16 %v7810_v60, %v7823_v38 }
 0x2ba   : > { %v8051_v23 = vmax.f32 %v2135_v10, %v2359_v53  ;;  %v3407_v47 = vmax.f32 %v8040_v34, %v7992_v52  ;;  %v1880_v41 = vpack.c.bf16 %v9457_v56, %v9456_v17  ;;  %v2484_v62 = vmax.f32 %v7925_v43, %v7673_v31  ;;  %v9459_v10 = vld [vmem:[#allocation17_spill] sm:$0xff] }
 0x2bb   : > { %v8059_v19 = vmax.f32 %v2134_v22, %v2358_v2  ;;  %v1751_v12 = vmax.f32 %v1686_v9, %v9454_v13  ;;  %v1752_v46 = vmax.f32 %v1687_v26, %v9455_v63  ;;  %v2485_v35 = vmax.f32 %v7907_v21, %v7666_v45 }
 0x2bc   : > { %v8066_v33 = vmax.f32 %v2611_v7, %v8051_v23  ;;  %v8069_v32 = vmax.f32 %v2484_v62, %v7803_v61  ;;  %v3280_v15 = vmax.f32 %v7998_v8, %v7742_v55  ;;  %v3281_v31 = vmax.f32 %v7992_v52, %v7736_v6 }
 0x2bd   : > { %v8079_v5 = vmax.f32 %v2610_v29, %v8059_v19  ;;  %v1816_v45 = vmax.f32 %v1751_v12, %v9458_v39  ;;  %v1817_v16 = vmax.f32 %v1752_v46, %v9459_v10  ;;  %v8084_v51 = vmax.f32 %v2485_v35, %v7795_v40 }
 0x2be   : > { %v2714_v7 = vrot.slane %v8066_v33, 1  ;;  %v2810_v59 = vrot.slane %v8066_v33, 7  ;;  %v2970_v22 = vrot.slane %v8066_v33, 2  ;;  %v3066_v42 = vrot.slane %v8066_v33, 6 }
 0x2bf   : > { %v2698_v0 = vrot.slane %v8079_v5, 1  ;;  %v2794_v49 = vrot.slane %v8079_v5, 7  ;;  %v2954_v29 = vrot.slane %v8079_v5, 2  ;;  %v3050_v36 = vrot.slane %v8079_v5, 6 }
 0x2c0   : > { %v1881_v54 = vpack.c.bf16 %v1817_v16, %v1816_v45  ;;  %v1901_v20 = vrot.slane %v1816_v45, 1  ;;  %v1917_v27 = vrot.slane %v1817_v16, 1  ;;  %v1997_v53 = vrot.slane %v1816_v45, 7 }
 0x2c1   : > { %v2730_v34 = vsel %vm1034_vm0, %v2698_v0, %v2714_v7  ;;  %v2746_v2 = vsel %vm1034_vm0, %v2714_v7, %v2698_v0  ;;  %v2826_v9 = vsel %vm1135_vm1, %v2794_v49, %v2810_v59  ;;  %v2842_v26 = vsel %vm1135_vm1, %v2810_v59, %v2794_v49 }
 0x2c2   : > { %v2771_v17 = vsel %vm997_vm3, %v2746_v2, -inf  ;;  %v2866_v56 = vsel %vm994_vm2, %v2842_v26, -inf  ;;  %v2986_v62 = vsel %vm1300_vm4, %v2954_v29, %v2970_v22  ;;  %v3002_v12 = vsel %vm1300_vm4, %v2970_v22, %v2954_v29  ;;  %4027 = vmatprep.mubr.bf16.mxu0 %v1881_v54 }
 0x2c3   : > { %v2898_v46 = vmax.f32 %v2866_v56, %v2730_v34  ;;  %v2899_v35 = vmax.f32 %v2826_v9, %v2771_v17  ;;  %v3027_v7 = vsel %vm1001_vm5, %v3002_v12, -inf  ;;  %v3082_v59 = vsel %vm1401_vm6, %v3050_v36, %v3066_v42  ;;  %4028 = vmatmul.mubr.bf16.gmra.mxu0 %v1880_v41 }
 0x2c4   : > { %v3098_v0 = vsel %vm1401_vm6, %v3066_v42, %v3050_v36  ;;  %v3155_v49 = vmax.f32 %v3082_v59, %v3027_v7  ;;  %v1933_v2 = vsel %vm1034_vm0, %v1901_v20, %v1917_v27  ;;  %v1949_v22 = vsel %vm1034_vm0, %v1917_v27, %v1901_v20 }
 0x2c5   : > { %v2930_v29 = vmax.f32 %v8079_v5, %v2898_v46  ;;  %v2931_v54 = vmax.f32 %v8066_v33, %v2899_v35  ;;  %v3122_v34 = vsel %vm998_vm7, %v3098_v0, -inf  ;;  %v1977_v41 = vsel %vm997_vm3, %v1949_v22, -inf }
 0x2c6   : > { %v3154_v9 = vmax.f32 %v3122_v34, %v2986_v62  ;;  %v2013_v26 = vrot.slane %v1817_v16, 7  ;;  %v2157_v42 = vrot.slane %v1816_v45, 2  ;;  %v2173_v36 = vrot.slane %v1817_v16, 2 }
 0x2c7   : > { %v8126_v17 = vmax.f32 %v2931_v54, %v3155_v49  ;;  %v2253_v56 = vrot.slane %v1816_v45, 6  ;;  %v2269_v12 = vrot.slane %v1817_v16, 6  ;;  %v2612_v20 = vmax.f32 %v8069_v32, %v8059_v19 }
 0x2c8   : > { %v8130_v27 = vmax.f32 %v2930_v29, %v3154_v9  ;;  %v2029_v46 = vsel %vm1135_vm1, %v1997_v53, %v2013_v26  ;;  %v2045_v35 = vsel %vm1135_vm1, %v2013_v26, %v1997_v53  ;;  %v2189_v62 = vsel %vm1300_vm4, %v2157_v42, %v2173_v36 }
 0x2c9   : > { %v3471_v7 = vmax.f32 %v3407_v47, %v8126_v17  ;;  %v2072_v59 = vsel %vm994_vm2, %v2045_v35, -inf  ;;  %v2105_v0 = vmax.f32 %v2029_v46, %v1977_v41  ;;  %v2205_v32 = vsel %vm1300_vm4, %v2173_v36, %v2157_v42 }
 0x2ca   : > { %v3470_v49 = vmax.f32 %v3406_v1, %v8130_v27  ;;  %v2104_v22 = vmax.f32 %v2072_v59, %v1933_v2  ;;  %v2233_v53 = vsel %vm1001_vm5, %v2205_v32, -inf  ;;  %v2285_v29 = vsel %vm1401_vm6, %v2253_v56, %v2269_v12 }
 0x2cb   : > { %v2137_v47 = vmax.f32 %v1817_v16, %v2105_v0  ;;  %v2301_v54 = vsel %vm1401_vm6, %v2269_v12, %v2253_v56  ;;  %v2361_v34 = vmax.f32 %v2285_v29, %v2233_v53  ;;  %v2613_v41 = vmax.f32 %v8084_v51, %v8051_v23  ;;  %v9463_v53 = vld [vmem:[#allocation44_spill] sm:$0xff] }
 0x2cc   : > { %v3535_v9 = vpack.c.bf16 %v3471_v7, %v3470_v49  ;;  %v2136_v26 = vmax.f32 %v1816_v45, %v2104_v22  ;;  %v2328_v57 = vsel %vm998_vm7, %v2301_v54, -inf  ;;  %v8161_v1 = vmax.f32 %v3280_v15, %v7874_v25 }
 0x2cd   : > { %v2360_v2 = vmax.f32 %v2328_v57, %v2189_v62  ;;  %v8163_v16 = vmax.f32 %v2137_v47, %v2361_v34  ;;  %v8169_v42 = vmax.f32 %v3281_v31, %v7870_v24  ;;  %v9460_v45 = vmax.f32 %v7135_v14, %v7113_v58  ;;  %v9461_v14 = vld [vmem:[#allocation14_spill] sm:$0xff] }
 0x2ce   : > { %3730 = vmatprep.mubr.bf16.mxu1 %v3535_v9  ;;  %v3408_v55 = vmax.f32 %v8161_v1, %v8130_v27  ;;  %v1623_v15 = vmax.f32 %v9454_v13, %v6489_v3  ;;  %v1624_v36 = vmax.f32 %v9455_v63, %v6487_v18  ;;  %v3536_v6 = vpack.c.bf16 %v7931_v30, %v7944_v37  ;;  %v9462_v3 = vld [vmem:[#allocation16_spill] sm:$0xff] }
 0x2cf   : > { %v8175_v51 = vmax.f32 %v7130_v48, %v9460_v45  ;;  %v8185_v31 = vmax.f32 %v2136_v26, %v2360_v2  ;;  %3731 = vmatmul.mubr.bf16.gmra.mxu1 %v3534_v28  ;;  %v8191_v58 = vmax.f32 %v2613_v41, %v8163_v16  ;;  %v3409_v48 = vmax.f32 %v8169_v42, %v8126_v17 }
 0x2d0   : > { %v1882_v56 = vpack.c.bf16 %v9462_v3, %v9461_v14  ;;  %v1688_v18 = vmax.f32 %v1623_v15, %v9450_v11  ;;  %v1689_v12 = vmax.f32 %v1624_v36, %v9451_v50  ;;  %v2486_v46 = vmax.f32 %v8059_v19, %v7803_v61 }
 0x2d1   : > { %v2487_v60 = vmax.f32 %v8051_v23, %v7795_v40  ;;  %v8204_v38 = vmax.f32 %v2612_v20, %v8185_v31  ;;  %v2715_v28 = vrot.slane %v8191_v58, 1  ;;  %v2811_v35 = vrot.slane %v8191_v58, 7 }
 0x2d2   : > { %v2971_v62 = vrot.slane %v8191_v58, 2  ;;  %v3067_v7 = vrot.slane %v8191_v58, 6  ;;  %v1753_v59 = vmax.f32 %v1688_v18, %v9458_v39  ;;  %v1754_v0 = vmax.f32 %v1689_v12, %v9459_v10 }
 0x2d3   : > { %v8213_v61 = vmax.f32 %v2486_v46, %v7925_v43  ;;  %v2699_v40 = vrot.slane %v8204_v38, 1  ;;  %v2795_v20 = vrot.slane %v8204_v38, 7  ;;  %v2955_v32 = vrot.slane %v8204_v38, 2 }
 0x2d4   : > { %v3051_v49 = vrot.slane %v8204_v38, 6  ;;  %v1818_v22 = vmax.f32 %v1753_v59, %v8175_v51  ;;  %v1819_v29 = vmax.f32 %v1754_v0, %v9463_v53  ;;  %v8222_v47 = vmax.f32 %v2487_v60, %v7907_v21 }
 0x2d5   : > { %v2614_v54 = vmax.f32 %v8213_v61, %v8185_v31  ;;  %v2731_v34 = vsel %vm1034_vm0, %v2699_v40, %v2715_v28  ;;  %v2747_v41 = vsel %vm1034_vm0, %v2715_v28, %v2699_v40  ;;  %v2827_v9 = vsel %vm1135_vm1, %v2795_v20, %v2811_v35 }
 0x2d6   : > { %v2843_v26 = vsel %vm1135_vm1, %v2811_v35, %v2795_v20  ;;  %v2773_v57 = vsel %vm997_vm3, %v2747_v41, -inf  ;;  %v2987_v42 = vsel %vm1300_vm4, %v2955_v32, %v2971_v62  ;;  %v3003_v45 = vsel %vm1300_vm4, %v2971_v62, %v2955_v32 }
 0x2d7   : > { %v2868_v2 = vsel %vm994_vm2, %v2843_v26, -inf  ;;  %v2901_v36 = vmax.f32 %v2827_v9, %v2773_v57  ;;  %v3029_v14 = vsel %vm1001_vm5, %v3003_v45, -inf  ;;  %v3083_v3 = vsel %vm1401_vm6, %v3051_v49, %v3067_v7 }
 0x2d8   : > { %v2900_v15 = vmax.f32 %v2868_v2, %v2731_v34  ;;  %v3099_v18 = vsel %vm1401_vm6, %v3067_v7, %v3051_v49  ;;  %v3157_v12 = vmax.f32 %v3083_v3, %v3029_v14  ;;  %v1883_v46 = vpack.c.bf16 %v1819_v29, %v1818_v22 }
 0x2d9   : > { %v1902_v60 = vrot.slane %v1818_v22, 1  ;;  %v2933_v35 = vmax.f32 %v8191_v58, %v2901_v36  ;;  %v3124_v62 = vsel %vm998_vm7, %v3099_v18, -inf  ;;  %v1918_v59 = vrot.slane %v1819_v29, 1 }
 0x2da   : > { %v2932_v28 = vmax.f32 %v8204_v38, %v2900_v15  ;;  %v3156_v0 = vmax.f32 %v3124_v62, %v2987_v42  ;;  %v1998_v40 = vrot.slane %v1818_v22, 7  ;;  %v2014_v20 = vrot.slane %v1819_v29, 7  ;;  %4035 = vmatprep.mubr.bf16.mxu0 %v1883_v46 }
 0x2db   : > { %v2158_v32 = vrot.slane %v1818_v22, 2  ;;  %v8252_v34 = vmax.f32 %v2933_v35, %v3157_v12  ;;  %v1934_v7 = vsel %vm1034_vm0, %v1902_v60, %v1918_v59  ;;  %v1950_v49 = vsel %vm1034_vm0, %v1918_v59, %v1902_v60  ;;  %4036 = vmatmul.mubr.bf16.gmra.mxu0 %v1882_v56 }
 0x2dc   : > { %v2174_v41 = vrot.slane %v1819_v29, 2  ;;  %v8258_v9 = vmax.f32 %v2932_v28, %v3156_v0  ;;  %v1979_v26 = vsel %vm997_vm3, %v1950_v49, -inf  ;;  %v2030_v57 = vsel %vm1135_vm1, %v1998_v40, %v2014_v20  ;;  %v9464_v0 = vld [vmem:[#allocation27_spill] sm:$0xff] }
 0x2dd   : > { %v2046_v2 = vsel %vm1135_vm1, %v2014_v20, %v1998_v40  ;;  %v3473_v42 = vmax.f32 %v3409_v48, %v8252_v34  ;;  %v2107_v15 = vmax.f32 %v2030_v57, %v1979_v26  ;;  %v2254_v18 = vrot.slane %v1818_v22, 6  ;;  %v9465_v40 = vld [vmem:[#allocation24_spill] sm:$0xff]  ;;  %v9467_v20 = vld [vmem:[#allocation19_spill] sm:$0xff]  ;;  %v9469_v26 = vld [vmem:[#allocation25_spill] sm:$0xff] }
 0x2de   : > { %v2074_v45 = vsel %vm994_vm2, %v2046_v2, -inf  ;;  %v2190_v56 = vsel %vm1300_vm4, %v2158_v32, %v2174_v41  ;;  %v3472_v36 = vmax.f32 %v3408_v55, %v8258_v9  ;;  %v2206_v3 = vsel %vm1300_vm4, %v2174_v41, %v2158_v32  ;;  %v9468_v41 = vld [vmem:[#allocation41_spill] sm:$0xff] }
 0x2df   : > { %v2106_v14 = vmax.f32 %v2074_v45, %v1934_v7  ;;  %v2139_v12 = vmax.f32 %v1819_v29, %v2107_v15  ;;  %v2235_v48 = vsel %vm1001_vm5, %v2206_v3, -inf  ;;  %v2270_v46 = vrot.slane %v1819_v29, 6 }
 0x2e0   : > { %v2615_v60 = vmax.f32 %v8222_v47, %v8163_v16  ;;  %v3537_v28 = vpack.c.bf16 %v3473_v42, %v3472_v36  ;;  %v3282_v62 = vmax.f32 %v8130_v27, %v7874_v25  ;;  %v3283_v1 = vmax.f32 %v8126_v17, %v7870_v24 }
 0x2e1   : > { %v2138_v35 = vmax.f32 %v1818_v22, %v2106_v14  ;;  %v2286_v55 = vsel %vm1401_vm6, %v2254_v18, %v2270_v46  ;;  %v2302_v59 = vsel %vm1401_vm6, %v2270_v46, %v2254_v18  ;;  %v9466_v29 = vmax.f32 %v9464_v0, %v9465_v40  ;;  %v9472_v14 = vld [vmem:[#allocation15_spill] sm:$0xff]  ;;  %v9473_v0 = vld [vmem:[#allocation42_spill] sm:$0xff] }
 0x2e2   : > { %v1625_v22 = vmax.f32 %v9458_v39, %v9450_v11  ;;  %3738 = vmatprep.mubr.bf16.mxu1 %v3537_v28  ;;  %v2330_v25 = vsel %vm998_vm7, %v2302_v59, -inf  ;;  %v2363_v47 = vmax.f32 %v2286_v55, %v2235_v48  ;;  %v8298_v24 = vmax.f32 %v3282_v62, %v7998_v8 }
 0x2e3   : > { %v1266_v32 = vmax.f32 %v9467_v20, %v9466_v29  ;;  %v8301_v7 = vmax.f32 %v3283_v1, %v7992_v52  ;;  %v2362_v49 = vmax.f32 %v2330_v25, %v2190_v56  ;;  %3739 = vmatmul.mubr.bf16.gmra.mxu1 %v3536_v6  ;;  %v9470_v57 = vmax.f32 %v9468_v41, %v9469_v26 }
 0x2e4   : > { %v1626_v2 = vmax.f32 %v9459_v10, %v9451_v50  ;;  %v1690_v42 = vmax.f32 %v1625_v22, %v9454_v13  ;;  %v8314_v45 = vmax.f32 %v2139_v12, %v2363_v47  ;;  %v3410_v15 = vmax.f32 %v8298_v24, %v8258_v9  ;;  %v9471_v50 = vld [vmem:[#allocation13_spill] sm:$0xff] }
 0x2e5   : > { %v8309_v11 = vmax.f32 %v1266_v32, %v9470_v57  ;;  %v3411_v56 = vmax.f32 %v8301_v7, %v8252_v34  ;;  %v3538_v30 = vpack.c.bf16 %v8066_v33, %v8079_v5  ;;  %v8322_v37 = vmax.f32 %v2138_v35, %v2362_v49 }
 0x2e6   : > { %v1691_v6 = vmax.f32 %v1626_v2, %v9455_v63  ;;  %v1755_v36 = vmax.f32 %v1690_v42, %v8175_v51  ;;  %v1884_v3 = vpack.c.bf16 %v9472_v14, %v9471_v50  ;;  %v8329_v18 = vmax.f32 %v2615_v60, %v8314_v45 }
 0x2e7   : > { %v2488_v12 = vmax.f32 %v8185_v31, %v7925_v43  ;;  %v2489_v48 = vmax.f32 %v8163_v16, %v7907_v21  ;;  %v3284_v46 = vmax.f32 %v8258_v9, %v7998_v8  ;;  %v8341_v28 = vmax.f32 %v2614_v54, %v8322_v37 }
 0x2e8   : > { %v1756_v35 = vmax.f32 %v1691_v6, %v9463_v53  ;;  %v8345_v60 = vmax.f32 %v1755_v36, %v8309_v11  ;;  %v3285_v43 = vmax.f32 %v8252_v34, %v7992_v52  ;;  %v2716_v62 = vrot.slane %v8329_v18, 1 }
 0x2e9   : > { %v2812_v21 = vrot.slane %v8329_v18, 7  ;;  %v2972_v8 = vrot.slane %v8329_v18, 2  ;;  %v3068_v1 = vrot.slane %v8329_v18, 6  ;;  %v2700_v61 = vrot.slane %v8341_v28, 1 }
 0x2ea   : > { %v2796_v54 = vrot.slane %v8341_v28, 7  ;;  %v2956_v55 = vrot.slane %v8341_v28, 2  ;;  %v3052_v59 = vrot.slane %v8341_v28, 6  ;;  %v1821_v40 = vmax.f32 %v1756_v35, %v9473_v0 }
 0x2eb   : > { %v1903_v29 = vrot.slane %v8345_v60, 1  ;;  %v1999_v32 = vrot.slane %v8345_v60, 7  ;;  %v2159_v22 = vrot.slane %v8345_v60, 2  ;;  %v2732_v25 = vsel %vm1034_vm0, %v2700_v61, %v2716_v62 }
 0x2ec   : > { %v2748_v47 = vsel %vm1034_vm0, %v2716_v62, %v2700_v61  ;;  %v2828_v7 = vsel %vm1135_vm1, %v2796_v54, %v2812_v21  ;;  %v2844_v49 = vsel %vm1135_vm1, %v2812_v21, %v2796_v54  ;;  %v2988_v57 = vsel %vm1300_vm4, %v2956_v55, %v2972_v8 }
 0x2ed   : > { %v2775_v41 = vsel %vm997_vm3, %v2748_v47, -inf  ;;  %v2870_v26 = vsel %vm994_vm2, %v2844_v49, -inf  ;;  %v3004_v2 = vsel %vm1300_vm4, %v2972_v8, %v2956_v55  ;;  %v3084_v50 = vsel %vm1401_vm6, %v3052_v59, %v3068_v1 }
 0x2ee   : > { %v2902_v42 = vmax.f32 %v2870_v26, %v2732_v25  ;;  %v2903_v6 = vmax.f32 %v2828_v7, %v2775_v41  ;;  %v3031_v36 = vsel %vm1001_vm5, %v3004_v2, -inf  ;;  %v3100_v14 = vsel %vm1401_vm6, %v3068_v1, %v3052_v59 }
 0x2ef   : > { %v3159_v35 = vmax.f32 %v3084_v50, %v3031_v36  ;;  %v1885_v62 = vpack.c.bf16 %v1821_v40, %v8345_v60  ;;  %v1919_v21 = vrot.slane %v1821_v40, 1  ;;  %v3126_v8 = vsel %vm998_vm7, %v3100_v14, -inf }
 0x2f0   : > { %v2934_v61 = vmax.f32 %v8341_v28, %v2902_v42  ;;  %v2935_v54 = vmax.f32 %v8329_v18, %v2903_v6  ;;  %v2015_v55 = vrot.slane %v1821_v40, 7  ;;  %v3158_v25 = vmax.f32 %v3126_v8, %v2988_v57 }
 0x2f1   : > { %v1935_v47 = vsel %vm1034_vm0, %v1903_v29, %v1919_v21  ;;  %v1951_v7 = vsel %vm1034_vm0, %v1919_v21, %v1903_v29  ;;  %v2175_v1 = vrot.slane %v1821_v40, 2  ;;  %4043 = vmatprep.mubr.bf16.mxu0 %v1885_v62  ;;  %v2255_v14 = vrot.slane %v8345_v60, 6 }
 0x2f2   : > { %v8392_v59 = vmax.f32 %v2935_v54, %v3159_v35  ;;  %v1981_v49 = vsel %vm997_vm3, %v1951_v7, -inf  ;;  %v2031_v41 = vsel %vm1135_vm1, %v1999_v32, %v2015_v55  ;;  %v2047_v26 = vsel %vm1135_vm1, %v2015_v55, %v1999_v32  ;;  %4044 = vmatmul.mubr.bf16.gmra.mxu0 %v1884_v3 }
 0x2f3   : > { %v8400_v57 = vmax.f32 %v2934_v61, %v3158_v25  ;;  %v2076_v2 = vsel %vm994_vm2, %v2047_v26, -inf  ;;  %v2109_v29 = vmax.f32 %v2031_v41, %v1981_v49  ;;  %v2191_v42 = vsel %vm1300_vm4, %v2159_v22, %v2175_v1  ;;  %v9475_v49 = vld [vmem:[#allocation43_spill] sm:$0xff] }
 0x2f4   : > { %v3475_v6 = vmax.f32 %v3411_v56, %v8392_v59  ;;  %v2108_v36 = vmax.f32 %v2076_v2, %v1935_v47  ;;  %v2207_v50 = vsel %vm1300_vm4, %v2175_v1, %v2159_v22  ;;  %v2271_v62 = vrot.slane %v1821_v40, 6  ;;  %v9474_v1 = vld [vmem:[#allocation20_spill] sm:$0xff] }
 0x2f5   : > { %v3474_v3 = vmax.f32 %v3410_v15, %v8400_v57  ;;  %v2141_v32 = vmax.f32 %v1821_v40, %v2109_v29  ;;  %v2237_v35 = vsel %vm1001_vm5, %v2207_v50, -inf  ;;  %v2552_v56 = vmax.f32 %v2488_v12, %v8059_v19 }
 0x2f6   : > { %v2140_v21 = vmax.f32 %v8345_v60, %v2108_v36  ;;  %v2553_v61 = vmax.f32 %v2489_v48, %v8051_v23  ;;  %v8420_v22 = vmax.f32 %v3284_v46, %v8130_v27  ;;  %v2287_v8 = vsel %vm1401_vm6, %v2255_v14, %v2271_v62 }
 0x2f7   : > { %v3539_v54 = vpack.c.bf16 %v3475_v6, %v3474_v3  ;;  %v2303_v24 = vsel %vm1401_vm6, %v2271_v62, %v2255_v14  ;;  %v8430_v15 = vmax.f32 %v3285_v43, %v8126_v17  ;;  %v2365_v48 = vmax.f32 %v2287_v8, %v2237_v35 }
 0x2f8   : > { %v2332_v12 = vsel %vm998_vm7, %v2303_v24, -inf  ;;  %v2616_v46 = vmax.f32 %v2552_v56, %v8322_v37  ;;  %v2617_v60 = vmax.f32 %v2553_v61, %v8314_v45  ;;  %v3412_v55 = vmax.f32 %v8420_v22, %v8400_v57 }
 0x2f9   : > { %3746 = vmatprep.mubr.bf16.mxu1 %v3539_v54  ;;  %v2364_v40 = vmax.f32 %v2332_v12, %v2191_v42  ;;  %v3413_v25 = vmax.f32 %v8430_v15, %v8392_v59  ;;  %v1627_v52 = vmax.f32 %v8175_v51, %v9454_v13  ;;  %v8442_v43 = vmax.f32 %v2141_v32, %v2365_v48 }
 0x2fa   : > { %3747 = vmatmul.mubr.bf16.gmra.mxu1 %v3538_v30  ;;  %v1628_v47 = vmax.f32 %v9463_v53, %v9455_v63  ;;  %v3540_v7 = vpack.c.bf16 %v8191_v58, %v8204_v38  ;;  %v1886_v41 = vpack.c.bf16 %v9475_v49, %v9474_v1  ;;  %v2490_v13 = vmax.f32 %v8322_v37, %v8059_v19 }
 0x2fb   : > { %v8453_v26 = vmax.f32 %v2140_v21, %v2364_v40  ;;  %v1692_v2 = vmax.f32 %v1627_v52, %v9458_v39  ;;  %v2491_v33 = vmax.f32 %v8314_v45, %v8051_v23  ;;  %v8461_v5 = vmax.f32 %v2617_v60, %v8442_v43 }
 0x2fc   : > { %v1693_v63 = vmax.f32 %v1628_v47, %v9459_v10  ;;  %v3286_v30 = vmax.f32 %v8400_v57, %v8130_v27  ;;  %v3287_v29 = vmax.f32 %v8392_v59, %v8126_v17  ;;  %v8475_v19 = vmax.f32 %v2490_v13, %v8185_v31 }
 0x2fd   : > { %v8469_v42 = vmax.f32 %v2616_v46, %v8453_v26  ;;  %v8472_v6 = vmax.f32 %v1692_v2, %v8309_v11  ;;  %v8478_v23 = vmax.f32 %v2491_v33, %v8163_v16  ;;  %v2717_v36 = vrot.slane %v8461_v5, 1 }
 0x2fe   : > { %v2813_v50 = vrot.slane %v8461_v5, 7  ;;  %v2973_v14 = vrot.slane %v8461_v5, 2  ;;  %v3069_v3 = vrot.slane %v8461_v5, 6  ;;  %v1758_v56 = vmax.f32 %v1693_v63, %v9473_v0 }
 0x2ff   : > { %v2701_v32 = vrot.slane %v8469_v42, 1  ;;  %v2797_v35 = vrot.slane %v8469_v42, 7  ;;  %v2957_v62 = vrot.slane %v8469_v42, 2  ;;  %v3053_v21 = vrot.slane %v8469_v42, 6 }
 0x300   : > { %v1904_v61 = vrot.slane %v8472_v6, 1  ;;  %v2000_v54 = vrot.slane %v8472_v6, 7  ;;  %v2160_v8 = vrot.slane %v8472_v6, 2  ;;  %v2618_v15 = vmax.f32 %v8475_v19, %v8453_v26 }
 0x301   : > { %v2733_v24 = vsel %vm1034_vm0, %v2701_v32, %v2717_v36  ;;  %v2749_v12 = vsel %vm1034_vm0, %v2717_v36, %v2701_v32  ;;  %v2829_v48 = vsel %vm1135_vm1, %v2797_v35, %v2813_v50  ;;  %v2845_v46 = vsel %vm1135_vm1, %v2813_v50, %v2797_v35 }
 0x302   : > { %v2777_v60 = vsel %vm997_vm3, %v2749_v12, -inf  ;;  %v2872_v40 = vsel %vm994_vm2, %v2845_v46, -inf  ;;  %v2989_v52 = vsel %vm1300_vm4, %v2957_v62, %v2973_v14  ;;  %v3005_v47 = vsel %vm1300_vm4, %v2973_v14, %v2957_v62 }
 0x303   : > { %v2904_v1 = vmax.f32 %v2872_v40, %v2733_v24  ;;  %v2905_v49 = vmax.f32 %v2829_v48, %v2777_v60  ;;  %v3033_v2 = vsel %vm1001_vm5, %v3005_v47, -inf  ;;  %v3085_v13 = vsel %vm1401_vm6, %v3053_v21, %v3069_v3 }
 0x304   : > { %v3101_v33 = vsel %vm1401_vm6, %v3069_v3, %v3053_v21  ;;  %v3161_v63 = vmax.f32 %v3085_v13, %v3033_v2  ;;  %v1887_v36 = vpack.c.bf16 %v1758_v56, %v8472_v6  ;;  %v1920_v50 = vrot.slane %v1758_v56, 1 }
 0x305   : > { %v2936_v32 = vmax.f32 %v8469_v42, %v2904_v1  ;;  %v2937_v35 = vmax.f32 %v8461_v5, %v2905_v49  ;;  %v3128_v14 = vsel %vm998_vm7, %v3101_v33, -inf  ;;  %v2016_v62 = vrot.slane %v1758_v56, 7 }
 0x306   : > { %v3160_v24 = vmax.f32 %v3128_v14, %v2989_v52  ;;  %v1936_v12 = vsel %vm1034_vm0, %v1904_v61, %v1920_v50  ;;  %v1952_v48 = vsel %vm1034_vm0, %v1920_v50, %v1904_v61  ;;  %v2176_v3 = vrot.slane %v1758_v56, 2  ;;  %4051 = vmatprep.mubr.bf16.mxu0 %v1887_v36 }
 0x307   : > { %v8523_v21 = vmax.f32 %v2937_v35, %v3161_v63  ;;  %v1983_v46 = vsel %vm997_vm3, %v1952_v48, -inf  ;;  %v2032_v60 = vsel %vm1135_vm1, %v2000_v54, %v2016_v62  ;;  %v2048_v40 = vsel %vm1135_vm1, %v2016_v62, %v2000_v54  ;;  %4052 = vmatmul.mubr.bf16.gmra.mxu0 %v1886_v41 }
 0x308   : > { %v8531_v52 = vmax.f32 %v2936_v32, %v3160_v24  ;;  %v2078_v47 = vsel %vm994_vm2, %v2048_v40, -inf  ;;  %v2111_v61 = vmax.f32 %v2032_v60, %v1983_v46  ;;  %v2192_v1 = vsel %vm1300_vm4, %v2160_v8, %v2176_v3 }
 0x309   : > { %v3477_v49 = vmax.f32 %v3413_v25, %v8523_v21  ;;  %v2110_v2 = vmax.f32 %v2078_v47, %v1936_v12  ;;  %v2208_v13 = vsel %vm1300_vm4, %v2176_v3, %v2160_v8  ;;  %v2256_v41 = vrot.slane %v8472_v6, 6 }
 0x30a   : > { %v3476_v54 = vmax.f32 %v3412_v55, %v8531_v52  ;;  %v2143_v33 = vmax.f32 %v1758_v56, %v2111_v61  ;;  %v2239_v63 = vsel %vm1001_vm5, %v2208_v13, -inf  ;;  %v2272_v36 = vrot.slane %v1758_v56, 6 }
 0x30b   : > { %v2142_v50 = vmax.f32 %v8472_v6, %v2110_v2  ;;  %v2619_v25 = vmax.f32 %v8478_v23, %v8442_v43  ;;  %v8559_v8 = vmax.f32 %v3286_v30, %v8258_v9  ;;  %v8569_v6 = vmax.f32 %v3287_v29, %v8252_v34 }
 0x30c   : > { %v3541_v22 = vpack.c.bf16 %v3477_v49, %v3476_v54  ;;  %v2288_v55 = vsel %vm1401_vm6, %v2256_v41, %v2272_v36  ;;  %v2304_v56 = vsel %vm1401_vm6, %v2272_v36, %v2256_v41  ;;  %v1629_v30 = vmax.f32 %v8309_v11, %v9458_v39  ;;  %v9476_v39 = vld [vmem:[#allocation23_spill] sm:$0xff] }
 0x30d   : > { %v2334_v19 = vsel %vm998_vm7, %v2304_v56, -inf  ;;  %v2367_v23 = vmax.f32 %v2288_v55, %v2239_v63  ;;  %v3414_v27 = vmax.f32 %v8559_v8, %v8531_v52  ;;  %v3415_v35 = vmax.f32 %v8569_v6, %v8523_v21 }
 0x30e   : > { %3754 = vmatprep.mubr.bf16.mxu1 %v3541_v22  ;;  %v2366_v32 = vmax.f32 %v2334_v19, %v2192_v1  ;;  %v1630_v17 = vmax.f32 %v9473_v0, %v9459_v10  ;;  %v3542_v29 = vpack.c.bf16 %v8329_v18, %v8341_v28  ;;  %v8589_v62 = vmax.f32 %v1629_v30, %v8175_v51 }
 0x30f   : > { %v8583_v14 = vmax.f32 %v2143_v33, %v2367_v23  ;;  %3755 = vmatmul.mubr.bf16.gmra.mxu1 %v3540_v7  ;;  %v1888_v11 = vpack.c.bf16 %v9476_v39, %v9467_v20  ;;  %v2492_v24 = vmax.f32 %v8453_v26, %v8185_v31  ;;  %v2493_v0 = vmax.f32 %v8442_v43, %v8163_v16 }
 0x310   : > { %v8595_v12 = vmax.f32 %v2142_v50, %v2366_v32  ;;  %v8598_v10 = vmax.f32 %v1630_v17, %v9463_v53  ;;  %v3288_v58 = vmax.f32 %v8531_v52, %v8258_v9  ;;  %v1905_v38 = vrot.slane %v8589_v62, 1  ;;  %v8653_v17 = vpop.f32.mrf.mxu0 }
 0x311   : > { %v8605_v51 = vmax.f32 %v2619_v25, %v8583_v14  ;;  %v2001_v20 = vrot.slane %v8589_v62, 7  ;;  %v2161_v31 = vrot.slane %v8589_v62, 2  ;;  %v2557_v6 = vmax.f32 %v2493_v0, %v8314_v45 }
 0x312   : > { %v8611_v7 = vmax.f32 %v2618_v15, %v8595_v12  ;;  %v1889_v53 = vpack.c.bf16 %v8598_v10, %v8589_v62  ;;  %v1921_v48 = vrot.slane %v8598_v10, 1  ;;  %v2017_v3 = vrot.slane %v8598_v10, 7 }
 0x313   : > { %v2718_v46 = vrot.slane %v8605_v51, 1  ;;  %v2814_v60 = vrot.slane %v8605_v51, 7  ;;  %v2974_v40 = vrot.slane %v8605_v51, 2  ;;  %v3070_v47 = vrot.slane %v8605_v51, 6 }
 0x314   : > { %v2702_v61 = vrot.slane %v8611_v7, 1  ;;  %v2798_v1 = vrot.slane %v8611_v7, 7  ;;  %v2958_v49 = vrot.slane %v8611_v7, 2  ;;  %v3054_v2 = vrot.slane %v8611_v7, 6  ;;  %4059 = vmatprep.mubr.bf16.mxu0 %v1889_v53 }
 0x315   : > { %v1937_v13 = vsel %vm1034_vm0, %v1905_v38, %v1921_v48  ;;  %v1953_v41 = vsel %vm1034_vm0, %v1921_v48, %v1905_v38  ;;  %v2033_v54 = vsel %vm1135_vm1, %v2001_v20, %v2017_v3  ;;  %v2049_v33 = vsel %vm1135_vm1, %v2017_v3, %v2001_v20  ;;  %4060 = vmatmul.mubr.bf16.gmra.mxu0 %v1888_v11 }
 0x316   : > { %v2734_v63 = vsel %vm1034_vm0, %v2702_v61, %v2718_v46  ;;  %v2750_v36 = vsel %vm1034_vm0, %v2718_v46, %v2702_v61  ;;  %v2830_v50 = vsel %vm1135_vm1, %v2798_v1, %v2814_v60  ;;  %v2846_v15 = vsel %vm1135_vm1, %v2814_v60, %v2798_v1 }
 0x317   : > { %v2779_v25 = vsel %vm997_vm3, %v2750_v36, -inf  ;;  %v2874_v22 = vsel %vm994_vm2, %v2846_v15, -inf  ;;  %v2990_v55 = vsel %vm1300_vm4, %v2958_v49, %v2974_v40  ;;  %v3006_v56 = vsel %vm1300_vm4, %v2974_v40, %v2958_v49 }
 0x318   : > { %v2906_v19 = vmax.f32 %v2874_v22, %v2734_v63  ;;  %v2907_v23 = vmax.f32 %v2830_v50, %v2779_v25  ;;  %v3035_v30 = vsel %vm1001_vm5, %v3006_v56, -inf  ;;  %v3086_v32 = vsel %vm1401_vm6, %v3054_v2, %v3070_v47  ;;  %v8674_v63 = vpop.f32.mrf.mxu1 }
 0x319   : > { %v3102_v39 = vsel %vm1401_vm6, %v3070_v47, %v3054_v2  ;;  %v3163_v11 = vmax.f32 %v3086_v32, %v3035_v30  ;;  %v1985_v38 = vsel %vm997_vm3, %v1953_v41, -inf  ;;  %v2080_v20 = vsel %vm994_vm2, %v2049_v33, -inf  ;;  %v8672_v33 = vpop.f32.mrf.mxu0 }
 0x31a   : > { %v2938_v53 = vmax.f32 %v8611_v7, %v2906_v19  ;;  %v2939_v48 = vmax.f32 %v8605_v51, %v2907_v23  ;;  %v3130_v3 = vsel %vm998_vm7, %v3102_v39, -inf  ;;  %v2112_v46 = vmax.f32 %v2080_v20, %v1937_v13  ;;  %v8714_v19 = vpop.f32.mrf.mxu1 }
 0x31b   : > { %v3162_v60 = vmax.f32 %v3130_v3, %v2990_v55  ;;  %v2113_v40 = vmax.f32 %v2033_v54, %v1985_v38  ;;  %v2177_v61 = vrot.slane %v8598_v10, 2  ;;  %v2257_v47 = vrot.slane %v8589_v62, 6 }
 0x31c   : > { %v8667_v1 = vmax.f32 %v2939_v48, %v3163_v11  ;;  %v2144_v49 = vmax.f32 %v8589_v62, %v2112_v46  ;;  %v2273_v2 = vrot.slane %v8598_v10, 6  ;;  %v2556_v41 = vmax.f32 %v2492_v24, %v8322_v37 }
 0x31d   : > { %v8676_v36 = vmax.f32 %v2938_v53, %v3162_v60  ;;  %v2145_v13 = vmax.f32 %v8598_v10, %v2113_v40  ;;  %v2193_v54 = vsel %vm1300_vm4, %v2161_v31, %v2177_v61  ;;  %v2209_v50 = vsel %vm1300_vm4, %v2177_v61, %v2161_v31 }
 0x31e   : > { %v3479_v62 = vmax.f32 %v3415_v35, %v8667_v1  ;;  %v2241_v24 = vsel %vm1001_vm5, %v2209_v50, -inf  ;;  %v2289_v15 = vsel %vm1401_vm6, %v2257_v47, %v2273_v2  ;;  %v2305_v10 = vsel %vm1401_vm6, %v2273_v2, %v2257_v47 }
 0x31f   : > { %v3478_v25 = vmax.f32 %v3414_v27, %v8676_v36  ;;  %v2336_v31 = vsel %vm998_vm7, %v2305_v10, -inf  ;;  %v2369_v22 = vmax.f32 %v2289_v15, %v2241_v24  ;;  %v2620_v55 = vmax.f32 %v2556_v41, %v8595_v12  ;;  %v8712_v27 = vpop.f32.mrf.mxu0 }
 0x320   : > { %v2368_v35 = vmax.f32 %v2336_v31, %v2193_v54  ;;  %v3289_v56 = vmax.f32 %v8523_v21, %v8252_v34  ;;  %v8710_v8 = vmax.f32 %v3288_v58, %v8400_v57  ;;  %v2621_v16 = vmax.f32 %v2557_v6, %v8583_v14 }
 0x321   : > { %v3543_v23 = vpack.c.bf16 %v3479_v62, %v3478_v25  ;;  %v8716_v30 = vmax.f32 %v2145_v13, %v2369_v22  ;;  %v3544_v0 = vpack.c.bf16 %v8461_v5, %v8469_v42  ;;  %v2494_v58 = vmax.f32 %v8595_v12, %v8322_v37  ;;  %v8750_v3 = vpop.f32.mrf.mxu0 }
 0x322   : > { %v8721_v32 = vmax.f32 %v2144_v49, %v2368_v35  ;;  %v8724_v34 = vmax.f32 %v3289_v56, %v8392_v59  ;;  %v3416_v9 = vmax.f32 %v8710_v8, %v8676_v36  ;;  %v2495_v11 = vmax.f32 %v8583_v14, %v8314_v45 }
 0x323   : > { %3762 = vmatprep.mubr.bf16.mxu1 %v3543_v23  ;;  %v8731_v39 = vmax.f32 %v2621_v16, %v8716_v30  ;;  %v3290_v38 = vmax.f32 %v8676_v36, %v8400_v57  ;;  %v3291_v20 = vmax.f32 %v8667_v1, %v8392_v59  ;;  %v2558_v48 = vmax.f32 %v2494_v58, %v8453_v26  ;;  %v8752_v57 = vpop.f32.mrf.mxu1  ;;  %v8780_v24 = vpop.f32.mrf.mxu0 }
 0x324   : > { %3763 = vmatmul.mubr.bf16.gmra.mxu1 %v3542_v29  ;;  %v8743_v53 = vmax.f32 %v2620_v55, %v8721_v32  ;;  %v3417_v37 = vmax.f32 %v8724_v34, %v8667_v1  ;;  %v3546_v45 = vpack.c.bf16 %v8605_v51, %v8611_v7  ;;  %v2559_v47 = vmax.f32 %v2495_v11, %v8442_v43 }
 0x325   : > { %v2719_v59 = vrot.slane %v8731_v39, 1  ;;  %v2815_v18 = vrot.slane %v8731_v39, 7  ;;  %v2975_v28 = vrot.slane %v8731_v39, 2  ;;  %v3071_v29 = vrot.slane %v8731_v39, 6  ;;  %v8782_v15 = vpop.f32.mrf.mxu1 }
 0x326   : > { %v2703_v46 = vrot.slane %v8743_v53, 1  ;;  %v2799_v60 = vrot.slane %v8743_v53, 7  ;;  %v2959_v40 = vrot.slane %v8743_v53, 2  ;;  %v3055_v61 = vrot.slane %v8743_v53, 6 }
 0x327   : > { %v8764_v49 = vmax.f32 %v2558_v48, %v8721_v32  ;;  %v8767_v2 = vmax.f32 %v3290_v38, %v8531_v52  ;;  %v8770_v41 = vmax.f32 %v3291_v20, %v8523_v21  ;;  %v8799_v34 = vmax.f32 %v2559_v47, %v8716_v30 }
 0x328   : > { %v2735_v13 = vsel %vm1034_vm0, %v2703_v46, %v2719_v59  ;;  %v2751_v54 = vsel %vm1034_vm0, %v2719_v59, %v2703_v46  ;;  %v2831_v50 = vsel %vm1135_vm1, %v2799_v60, %v2815_v18  ;;  %v2847_v62 = vsel %vm1135_vm1, %v2815_v18, %v2799_v60  ;;  %v8807_v59 = vpop.f32.mrf.mxu0  ;;  %v8809_v18 = vpop.f32.mrf.mxu1 }
 0x329   : > { %v2781_v10 = vsel %vm997_vm3, %v2751_v54, -inf  ;;  %v2876_v25 = vsel %vm994_vm2, %v2847_v62, -inf  ;;  %v2991_v31 = vsel %vm1300_vm4, %v2959_v40, %v2975_v28  ;;  %v3007_v22 = vsel %vm1300_vm4, %v2975_v28, %v2959_v40 }
 0x32a   : > { %v2908_v6 = vmax.f32 %v2876_v25, %v2735_v13  ;;  %v2909_v35 = vmax.f32 %v2831_v50, %v2781_v10  ;;  %v3037_v55 = vsel %vm1001_vm5, %v3007_v22, -inf  ;;  %v3087_v56 = vsel %vm1401_vm6, %v3055_v61, %v3071_v29 }
 0x32b   : > { %v3103_v23 = vsel %vm1401_vm6, %v3071_v29, %v3055_v61  ;;  %v3165_v16 = vmax.f32 %v3087_v56, %v3037_v55  ;;  %v2704_v58 = vrot.slane %v8764_v49, 1  ;;  %v2800_v48 = vrot.slane %v8764_v49, 7  ;;  %v8836_v55 = vpop.f32.mrf.mxu1 }
 0x32c   : > { %v2940_v11 = vmax.f32 %v8743_v53, %v2908_v6  ;;  %v2941_v38 = vmax.f32 %v8731_v39, %v2909_v35  ;;  %v3132_v20 = vsel %vm998_vm7, %v3103_v23, -inf  ;;  %v2720_v29 = vrot.slane %v8799_v34, 1  ;;  %v8834_v35 = vpop.f32.mrf.mxu0 }
 0x32d   : > { %v3164_v28 = vmax.f32 %v3132_v20, %v2991_v31  ;;  %v2816_v46 = vrot.slane %v8799_v34, 7  ;;  %v2960_v60 = vrot.slane %v8764_v49, 2  ;;  %v2976_v61 = vrot.slane %v8799_v34, 2 }
 0x32e   : > { %v8814_v40 = vmax.f32 %v2941_v38, %v3165_v16  ;;  %v3056_v47 = vrot.slane %v8764_v49, 6  ;;  %v3072_v13 = vrot.slane %v8799_v34, 6  ;;  %v2736_v50 = vsel %vm1034_vm0, %v2704_v58, %v2720_v29 }
 0x32f   : > { %v8819_v54 = vmax.f32 %v2940_v11, %v3164_v28  ;;  %v2752_v62 = vsel %vm1034_vm0, %v2720_v29, %v2704_v58  ;;  %v2832_v10 = vsel %vm1135_vm1, %v2800_v48, %v2816_v46  ;;  %v2848_v22 = vsel %vm1135_vm1, %v2816_v46, %v2800_v48 }
 0x330   : > { %v3481_v25 = vmax.f32 %v3417_v37, %v8814_v40  ;;  %v2783_v31 = vsel %vm997_vm3, %v2752_v62, -inf  ;;  %v2992_v6 = vsel %vm1300_vm4, %v2960_v60, %v2976_v61  ;;  %v2878_v37 = vsel %vm994_vm2, %v2848_v22, -inf  ;;  %v8862_v62 = vpop.f32.mrf.mxu1 }
 0x331   : > { %v3480_v56 = vmax.f32 %v3416_v9, %v8819_v54  ;;  %v2911_v23 = vmax.f32 %v2832_v10, %v2783_v31  ;;  %v3008_v16 = vsel %vm1300_vm4, %v2976_v61, %v2960_v60  ;;  %v2910_v58 = vmax.f32 %v2878_v37, %v2736_v50  ;;  %v8860_v50 = vpop.f32.mrf.mxu0 }
 0x332   : > { %v3039_v11 = vsel %vm1001_vm5, %v3008_v16, -inf  ;;  %v3088_v38 = vsel %vm1401_vm6, %v3056_v47, %v3072_v13  ;;  %v3104_v20 = vsel %vm1401_vm6, %v3072_v13, %v3056_v47  ;;  %v3418_v60 = vmax.f32 %v8767_v2, %v8819_v54 }
 0x333   : > { %v3545_v48 = vpack.c.bf16 %v3481_v25, %v3480_v56  ;;  %v2943_v8 = vmax.f32 %v8799_v34, %v2911_v23  ;;  %v3134_v9 = vsel %vm998_vm7, %v3104_v20, -inf  ;;  %v3167_v28 = vmax.f32 %v3088_v38, %v3039_v11  ;;  %v8897_v22 = vpop.f32.mrf.mxu0 }
 0x334   : > { %v2942_v29 = vmax.f32 %v8764_v49, %v2910_v58  ;;  %v3166_v46 = vmax.f32 %v3134_v9, %v2992_v6  ;;  %v3419_v61 = vmax.f32 %v8770_v41, %v8814_v40  ;;  %v2496_v13 = vmax.f32 %v8721_v32, %v8453_v26  ;;  %v8899_v6 = vpop.f32.mrf.mxu1 }
 0x335   : > { %3770 = vmatprep.mubr.bf16.mxu1 %v3545_v48  ;;  %v8864_v47 = vmax.f32 %v2943_v8, %v3167_v28  ;;  %v2497_v10 = vmax.f32 %v8716_v30, %v8442_v43  ;;  %v3292_v25 = vmax.f32 %v8819_v54, %v8531_v52  ;;  %v3293_v41 = vmax.f32 %v8814_v40, %v8523_v21 }
 0x336   : > { %3771 = vmatmul.mubr.bf16.gmra.mxu1 %v3544_v0  ;;  %v8875_v2 = vmax.f32 %v2942_v29, %v3166_v46  ;;  %v3548_v31 = vpack.c.bf16 %v8731_v39, %v8743_v53  ;;  %v3550_v26 = vpack.c.bf16 %v8799_v34, %v8764_v49  ;;  %v8885_v30 = vmax.f32 %v2496_v13, %v8595_v12  ;;  %v4817_v29 = vpop.f32.mrf.mxu0 }
 0x337   : > { %v3483_v43 = vmax.f32 %v3419_v61, %v8864_v47  ;;  %v8888_v52 = vmax.f32 %v2497_v10, %v8583_v14  ;;  %v3356_v5 = vmax.f32 %v3292_v25, %v8676_v36  ;;  %v3357_v21 = vmax.f32 %v3293_v41, %v8667_v1 }
 0x338   : > { %v3482_v42 = vmax.f32 %v3418_v60, %v8875_v2  ;;  %v3294_v0 = vmax.f32 %v8875_v2, %v8676_v36  ;;  %v3295_v32 = vmax.f32 %v8864_v47, %v8667_v1  ;;  %v2705_v12 = vrot.slane %v8885_v30, 1 }
 0x339   : > { %v2721_v14 = vrot.slane %v8888_v52, 1  ;;  %v2801_v56 = vrot.slane %v8885_v30, 7  ;;  %v2817_v37 = vrot.slane %v8888_v52, 7  ;;  %v2961_v16 = vrot.slane %v8885_v30, 2  ;;  %v4704_v46 = vpop.f32.mrf.mxu1 }
 0x33a   : > { %v3547_v23 = vpack.c.bf16 %v3483_v43, %v3482_v42  ;;  %v2977_v36 = vrot.slane %v8888_v52, 2  ;;  %v3057_v58 = vrot.slane %v8885_v30, 6  ;;  %v3073_v10 = vrot.slane %v8888_v52, 6 }
 0x33b   : > { %v2737_v1 = vsel %vm1034_vm0, %v2705_v12, %v2721_v14  ;;  %v2753_v11 = vsel %vm1034_vm0, %v2721_v14, %v2705_v12  ;;  %v2833_v38 = vsel %vm1135_vm1, %v2801_v56, %v2817_v37  ;;  %v2849_v20 = vsel %vm1135_vm1, %v2817_v37, %v2801_v56 }
 0x33c   : > { %3778 = vmatprep.mubr.bf16.mxu1 %v3547_v23  ;;  %v2785_v48 = vsel %vm997_vm3, %v2753_v11, -inf  ;;  %v2880_v8 = vsel %vm994_vm2, %v2849_v20, -inf  ;;  %v2993_v9 = vsel %vm1300_vm4, %v2961_v16, %v2977_v36  ;;  %v3009_v28 = vsel %vm1300_vm4, %v2977_v36, %v2961_v16 }
 0x33d   : > { %v2912_v60 = vmax.f32 %v2880_v8, %v2737_v1  ;;  %v2913_v61 = vmax.f32 %v2833_v38, %v2785_v48  ;;  %v3041_v13 = vsel %vm1001_vm5, %v3009_v28, -inf  ;;  %v3420_v25 = vmax.f32 %v3356_v5, %v8875_v2  ;;  %v4705_v5 = vpop.f32.mrf.mxu1 }
 0x33e   : > { %3779 = vmatmul.mubr.bf16.gmra.mxu1 %v3546_v45  ;;  %v3421_v41 = vmax.f32 %v3357_v21, %v8864_v47  ;;  %v3358_v43 = vmax.f32 %v3294_v0, %v8819_v54  ;;  %v3359_v42 = vmax.f32 %v3295_v32, %v8814_v40  ;;  %v3089_v4 = vsel %vm1401_vm6, %v3057_v58, %v3073_v10  ;;  %v4819_v45 = vpop.f32.mrf.mxu0 }
 0x33f   : > { %v2944_v12 = vmax.f32 %v8885_v30, %v2912_v60  ;;  %v2945_v14 = vmax.f32 %v8888_v52, %v2913_v61  ;;  %v3105_v56 = vsel %vm1401_vm6, %v3073_v10, %v3057_v58  ;;  %v3169_v7 = vmax.f32 %v3089_v4, %v3041_v13  ;;  %v4707_v11 = vpop.f32.mrf.mxu1 }
 0x340   : > { %v3136_v51 = vsel %vm998_vm7, %v3105_v56, -inf  ;;  %v4806_v32 = vadd.f32 %v8672_v33, %v8653_v17  ;;  %v4820_v1 = vpop.f32.mrf.mxu0  ;;  %v4694_v58 = vadd.f32 %v8714_v19, %v8674_v63  ;;  %v4809_v48 = vadd.f32 %v8750_v3, %v8712_v27  ;;  %v8953_v17 = vld [vmem:[%s9206_s5] ss:$0 sm:$0xff] }
 0x341   : > { %v3168_v21 = vmax.f32 %v3136_v51, %v2993_v9  ;;  %v3201_v0 = vmax.f32 %v2945_v14, %v3169_v7  ;;  %v4697_v63 = vadd.f32 %v8782_v15, %v8752_v57  ;;  %v8964_v27 = vld [vmem:[%s9207_s6] ss:$0 sm:$0xff]  ;;  %v4700_v3 = vadd.f32 %v8836_v55, %v8809_v18  ;;  %v4708_v15 = vpop.f32.mrf.mxu1 }
 0x342   : > { %v3942_v8 = vadd.f32 %v4806_v32, %v4694_v58  ;;  %v4703_v57 = vadd.f32 %v8899_v6, %v8862_v62  ;;  %v4818_v60 = vadd.f32 %v4817_v29, %v8897_v22  ;;  %v4706_v13 = vadd.f32 %v4705_v5, %v4704_v46 }
 0x343   : > { %v3200_v37 = vmax.f32 %v2944_v12, %v3168_v21  ;;  %v3485_v23 = vmax.f32 %v3421_v41, %v3201_v0  ;;  %v3423_v16 = vmax.f32 %v3359_v42, %v3201_v0  ;;  %v3297_v36 = vmax.f32 %v3201_v0, %v8814_v40 }
 0x344   : > { %v4812_v40 = vadd.f32 %v8807_v59, %v8780_v24  ;;  %v4822_v24 = vpop.f32.mrf.mxu0  ;;  %v4075_v59 = vmul.f32 %v8953_v17, %v3942_v8  ;;  %v3945_v28 = vadd.f32 %v4809_v48, %v4697_v63  ;;  %v3958_v6 = vadd.f32 %v4818_v60, %v4706_v13 }
 0x345   : > { %v3484_v44 = vmax.f32 %v3420_v25, %v3200_v37  ;;  %v3422_v38 = vmax.f32 %v3358_v43, %v3200_v37  ;;  %v3296_v20 = vmax.f32 %v3200_v37, %v8819_v54  ;;  %v3361_v33 = vmax.f32 %v3297_v36, %v8864_v47 }
 0x346   : > { %v4815_v47 = vadd.f32 %v8860_v50, %v8834_v35  ;;  %v3950_v61 = vadd.f32 %v4812_v40, %v4700_v3  ;;  %v8978_v18 = vadd.f32 %v8964_v27, %v4075_v59  ;;  %v4076_v35 = vmul.f32 %v8953_v17, %v3945_v28  ;;  %v4823_v25 = vpop.f32.mrf.mxu0 }
 0x347   : > { %v3549_v19 = vpack.c.bf16 %v3485_v23, %v3484_v44  ;;  %v3551_v9 = vpack.c.bf16 %v3423_v16, %v3422_v38  ;;  %v3360_v54 = vmax.f32 %v3296_v20, %v8875_v2  ;;  %v4821_v50 = vadd.f32 %v4820_v1, %v4819_v45 }
 0x348   : > { %v3953_v55 = vadd.f32 %v4815_v47, %v4703_v57  ;;  %v4077_v62 = vmul.f32 %v8953_v17, %v3950_v61  ;;  %v4709_v10 = vadd.f32 %v4708_v15, %v4707_v11  ;;  %v4613_v22 = vmul.f32 -1.442695, %v8978_v18  ;;  %v4825_v4 = vpop.f32.mrf.mxu0 }
 0x349   : > { %3786 = vmatprep.mubr.bf16.mxu1 %v3549_v19  ;;  %v3553_v2 = vpack.c.bf16 %v3361_v33, %v3360_v54  ;;  %v8984_v29 = vadd.f32 %v8964_v27, %v4076_v35  ;;  %v4824_v21 = vadd.f32 %v4823_v25, %v4822_v24  ;;  %v3552_v49 = vpack.c.bf16 %v8888_v52, %v8885_v30 }
 0x34a   : > { %3787 = vmatmul.mubr.bf16.gmra.mxu1 %v3548_v31  ;;  %v4078_v39 = vmul.f32 %v8953_v17, %v3953_v55  ;;  %v8988_v53 = vadd.f32 %v8964_v27, %v4077_v62  ;;  %v4079_v31 = vmul.f32 %v8953_v17, %v3958_v6  ;;  %v3961_v46 = vadd.f32 %v4821_v50, %v4709_v10  ;;  %v4826_v32 = vpop.f32.mrf.mxu0 }
 0x34b   : > { %3794 = vmatprep.mubr.bf16.mxu1 %v3551_v9  ;;  %5219 = vpow2.f32 %v4613_v22  ;;  %v4614_v41 = vmul.f32 -1.442695, %v8984_v29  ;;  %v4827_v1 = vadd.f32 %v4826_v32, %v4825_v4 }
 0x34c   : > { %v8993_v43 = vadd.f32 %v8964_v27, %v4078_v39  ;;  %v4615_v42 = vmul.f32 -1.442695, %v8988_v53  ;;  %v8997_v12 = vadd.f32 %v8964_v27, %v4079_v31  ;;  %v4080_v14 = vmul.f32 %v8953_v17, %v3961_v46  ;;  %v4828_v63 = vpop.f32.mrf.mxu0 }
 0x34d   : > { %5221 = vpow2.f32 %v4614_v41 }
 0x34e   : > { %v4616_v56 = vmul.f32 -1.442695, %v8993_v43  ;;  %5223 = vpow2.f32 %v4615_v42  ;;  %v4617_v7 = vmul.f32 -1.442695, %v8997_v12  ;;  %v9003_v45 = vadd.f32 %v8964_v27, %v4080_v14  ;;  %v4829_v59 = vpop.f32.mrf.mxu0 }
 0x34f   : > { %v4710_v51 = vpop.f32.mrf.mxu1  ;;  %v4830_v60 = vadd.f32 %v4829_v59, %v4828_v63 }
 0x350   : > { %5225 = vpow2.f32 %v4616_v56  ;;  %v4618_v0 = vmul.f32 -1.442695, %v9003_v45  ;;  %v4831_v57 = vpop.f32.mrf.mxu0 }
 0x351   : > { %v4711_v5 = vpop.f32.mrf.mxu1  ;;  %5227 = vpow2.f32 %v4617_v7 }
 0x352   : > { %3795 = vmatmul.mubr.bf16.gmra.mxu1 %v3550_v26  ;;  %v4712_v37 = vadd.f32 %v4711_v5, %v4710_v51  ;;  %5229 = vpow2.f32 %v4618_v0  ;;  %v4832_v35 = vpop.f32.mrf.mxu0 }
 0x353   : > { %3802 = vmatprep.mubr.bf16.mxu1 %v3553_v2  ;;  %v4713_v23 = vpop.f32.mrf.mxu1  ;;  %v4833_v39 = vadd.f32 %v4832_v35, %v4831_v57 }
 0x354   : > { %v3966_v16 = vadd.f32 %v4824_v21, %v4712_v37  ;;  %v4834_v21 = vpop.f32.mrf.mxu0 }
 0x355   : > { %v4714_v36 = vpop.f32.mrf.mxu1 }
 0x356   : > { %v4081_v58 = vmul.f32 %v8953_v17, %v3966_v16  ;;  %v4715_v11 = vadd.f32 %v4714_v36, %v4713_v23 }
 0x358   : > { %v9013_v34 = vadd.f32 %v8964_v27, %v4081_v58  ;;  %v3969_v26 = vadd.f32 %v4827_v1, %v4715_v11  ;;  %v5220_v44 = vpop.eup %5219 }
 0x359   : > { %v4242_v48 = vadd.f32 1.0, %v5220_v44 }
 0x35a   : > { %3803 = vmatmul.mubr.bf16.gmra.mxu1 %v3552_v49  ;;  %v4619_v38 = vmul.f32 -1.442695, %v9013_v34  ;;  %v4082_v20 = vmul.f32 %v8953_v17, %v3969_v26  ;;  %v5222_v33 = vpop.eup %5221 }
 0x35b   : > { %v5224_v8 = vpop.eup %5223  ;;  %v4243_v30 = vadd.f32 1.0, %v5222_v33 }
 0x35c   : > { %5231 = vpow2.f32 %v4619_v38  ;;  %v9018_v40 = vadd.f32 %v8964_v27, %v4082_v20  ;;  %v4244_v19 = vadd.f32 1.0, %v5224_v8 }
 0x35d   : > { %5233 = vrcp.f32 %v4242_v48  ;;  %v5226_v52 = vpop.eup %5225 }
 0x35e   : > { %v5228_v9 = vpop.eup %5227  ;;  %5235 = vrcp.f32 %v4243_v30  ;;  %v4245_v54 = vadd.f32 1.0, %v5226_v52  ;;  %v4620_v3 = vmul.f32 -1.442695, %v9018_v40 }
 0x35f   : > { %5237 = vrcp.f32 %v4244_v19  ;;  %v4246_v47 = vadd.f32 1.0, %v5228_v9  ;;  %v5230_v24 = vpop.eup %5229 }
 0x360   : > { %5239 = vrcp.f32 %v4245_v54  ;;  %v4247_v28 = vadd.f32 1.0, %v5230_v24 }
 0x361   : > { %5241 = vrcp.f32 %v4246_v47 }
 0x362   : > { %5243 = vpow2.f32 %v4620_v3 }
 0x363   : > { %5245 = vrcp.f32 %v4247_v28 }
 0x365   : > { %v4716_v15 = vpop.f32.mrf.mxu1 }
 0x367   : > { %v4717_v2 = vpop.f32.mrf.mxu1 }
 0x368   : > { %v4718_v61 = vadd.f32 %v4717_v2, %v4716_v15 }
 0x369   : > { %v5232_v13 = vpop.eup %5231  ;;  %v4719_v55 = vpop.f32.mrf.mxu1 }
 0x36a   : > { %v5234_v50 = vpop.eup %5233  ;;  %v4248_v62 = vadd.f32 1.0, %v5232_v13  ;;  %v3974_v6 = vadd.f32 %v4830_v60, %v4718_v61 }
 0x36b   : > { %v4338_v10 = vmul.f32 %v5234_v50, %v8978_v18  ;;  %v4720_v25 = vpop.f32.mrf.mxu1  ;;  %v5236_v22 = vpop.eup %5235 }
 0x36c   : > { %5247 = vrcp.f32 %v4248_v62  ;;  %v4083_v31 = vmul.f32 %v8953_v17, %v3974_v6  ;;  %v4721_v46 = vadd.f32 %v4720_v25, %v4719_v55  ;;  %v5238_v41 = vpop.eup %5237  ;;  %v4339_v42 = vmul.f32 %v5236_v22, %v8984_v29 }
 0x36d   : > { %4370 = vst [vmem:[%s9024_s16] sm:$0xff] %v4338_v10  ;;  %v5240_v14 = vpop.eup %5239  ;;  %v4340_v18 = vmul.f32 %v5238_v41, %v8988_v53 }
 0x36e   : > { %v4122_v4 = vadd.f32 %v8964_v27, %v4083_v31  ;;  %v3977_v56 = vadd.f32 %v4833_v39, %v4721_v46  ;;  %v5242_v51 = vpop.eup %5241  ;;  %4371 = vst [vmem:[%s9024_s16 + $0x8] sm:$0xff] %v4339_v42  ;;  %v4341_v7 = vmul.f32 %v5240_v14, %v8993_v43  ;;  %v4835_v43 = vpop.f32.mrf.mxu0 }
 0x36f   : > { %v5244_v5 = vpop.eup %5243  ;;  %4372 = vst [vmem:[%s9024_s16 + $0x10] sm:$0xff] %v4340_v18  ;;  %v4342_v0 = vmul.f32 %v5242_v51, %v8997_v12  ;;  %v4836_v26 = vadd.f32 %v4835_v43, %v4834_v21 }
 0x370   : > { %v4621_v37 = vmul.f32 -1.442695, %v4122_v4  ;;  %v4084_v29 = vmul.f32 %v8953_v17, %v3977_v56  ;;  %v5246_v32 = vpop.eup %5245  ;;  %4373 = vst [vmem:[%s9024_s16 + $0x18] sm:$0xff] %v4341_v7  ;;  %v4249_v23 = vadd.f32 1.0, %v5244_v5  ;;  %v4837_v1 = vpop.f32.mrf.mxu0 }
 0x371   : > { %4374 = vst [vmem:[%s9024_s16 + $0x20] sm:$0xff] %v4342_v0  ;;  %v4343_v53 = vmul.f32 %v5246_v32, %v9003_v45 }
 0x372   : > { %5249 = vpow2.f32 %v4621_v37  ;;  %v4123_v16 = vadd.f32 %v8964_v27, %v4084_v29  ;;  %v4838_v44 = vpop.f32.mrf.mxu0 }
 0x373   : > { %5251 = vrcp.f32 %v4249_v23  ;;  %4375 = vst [vmem:[%s9024_s16 + $0x28] sm:$0xff] %v4343_v53  ;;  %v4839_v63 = vadd.f32 %v4838_v44, %v4837_v1 }
 0x374   : > { %v4622_v36 = vmul.f32 -1.442695, %v4123_v16  ;;  %v4840_v30 = vpop.f32.mrf.mxu0 }
 0x376   : > { %5253 = vpow2.f32 %v4622_v36  ;;  %v4841_v24 = vpop.f32.mrf.mxu0 }
 0x377   : > { %v4842_v62 = vadd.f32 %v4841_v24, %v4840_v30 }
 0x378   : > { %v4843_v2 = vpop.f32.mrf.mxu0 }
 0x379   : > { %v5248_v12 = vpop.eup %5247  ;;  %v4722_v58 = vpop.f32.mrf.mxu1 }
 0x37a   : > { %v4344_v11 = vmul.f32 %v5248_v12, %v9013_v34 }
 0x37b   : > { %v4723_v49 = vpop.f32.mrf.mxu1 }
 0x37c   : > { %4376 = vst [vmem:[%s9024_s16 + $0x30] sm:$0xff] %v4344_v11  ;;  %v4724_v38 = vadd.f32 %v4723_v49, %v4722_v58 }
 0x37d   : > { %v4725_v45 = vpop.f32.mrf.mxu1 }
 0x37e   : > { %v3982_v20 = vadd.f32 %v4836_v26, %v4724_v38 }
 0x37f   : > { %v5250_v48 = vpop.eup %5249  ;;  %v4726_v33 = vpop.f32.mrf.mxu1 }
 0x380   : > { %v5252_v8 = vpop.eup %5251  ;;  %v4250_v52 = vadd.f32 1.0, %v5250_v48  ;;  %v4085_v19 = vmul.f32 %v8953_v17, %v3982_v20  ;;  %v4727_v9 = vadd.f32 %v4726_v33, %v4725_v45 }
 0x381   : > { %v4345_v54 = vmul.f32 %v5252_v8, %v9018_v40  ;;  %v4844_v40 = vpop.f32.mrf.mxu0 }
 0x382   : > { %5255 = vrcp.f32 %v4250_v52  ;;  %v4124_v34 = vadd.f32 %v8964_v27, %v4085_v19  ;;  %v3985_v3 = vadd.f32 %v4839_v63, %v4727_v9  ;;  %v4845_v14 = vadd.f32 %v4844_v40, %v4843_v2 }
 0x383   : > { %v5254_v47 = vpop.eup %5253  ;;  %4377 = vst [vmem:[%s9024_s16 + $0x38] sm:$0xff] %v4345_v54  ;;  %v4846_v35 = vpop.f32.mrf.mxu0 }
 0x384   : > { %v4251_v59 = vadd.f32 1.0, %v5254_v47  ;;  %v4623_v28 = vmul.f32 -1.442695, %v4124_v34  ;;  %v4086_v57 = vmul.f32 %v8953_v17, %v3985_v3 }
 0x385   : > { %v4847_v39 = vpop.f32.mrf.mxu0 }
 0x386   : > { %5257 = vrcp.f32 %v4251_v59  ;;  %v4125_v15 = vadd.f32 %v8964_v27, %v4086_v57  ;;  %v4848_v58 = vadd.f32 %v4847_v39, %v4846_v35 }
 0x387   : > { %5259 = vpow2.f32 %v4623_v28 }
 0x388   : > { %v4624_v60 = vmul.f32 -1.442695, %v4125_v15 }
 0x38a   : > { %5261 = vpow2.f32 %v4624_v60 }
 0x38f   : > { %v5256_v61 = vpop.eup %5255  ;;  %v4728_v13 = vpop.f32.mrf.mxu1 }
 0x390   : > { %v4346_v55 = vmul.f32 %v5256_v61, %v4122_v4  ;;  %v4849_v4 = vpop.f32.mrf.mxu0 }
 0x391   : > { %v4729_v50 = vpop.f32.mrf.mxu1 }
 0x392   : > { %4378 = vst [vmem:[%s9024_s16 + $0x40] sm:$0xff] %v4346_v55  ;;  %v4730_v6 = vadd.f32 %v4729_v50, %v4728_v13  ;;  %v4850_v29 = vpop.f32.mrf.mxu0 }
 0x393   : > { %v5258_v10 = vpop.eup %5257  ;;  %v4731_v25 = vpop.f32.mrf.mxu1  ;;  %v4851_v33 = vadd.f32 %v4850_v29, %v4849_v4 }
 0x394   : > { %v5260_v22 = vpop.eup %5259  ;;  %v4347_v31 = vmul.f32 %v5258_v10, %v4123_v16  ;;  %v3990_v46 = vadd.f32 %v4842_v62, %v4730_v6  ;;  %v4852_v53 = vpop.f32.mrf.mxu0 }
 0x395   : > { %v4252_v41 = vadd.f32 1.0, %v5260_v22  ;;  %v4732_v42 = vpop.f32.mrf.mxu1 }
 0x396   : > { %4379 = vst [vmem:[%s9024_s16 + $0x48] sm:$0xff] %v4347_v31  ;;  %v4087_v18 = vmul.f32 %v8953_v17, %v3990_v46  ;;  %v4733_v56 = vadd.f32 %v4732_v42, %v4731_v25  ;;  %v4853_v36 = vpop.f32.mrf.mxu0 }
 0x397   : > { %v5262_v51 = vpop.eup %5261  ;;  %5263 = vrcp.f32 %v4252_v41  ;;  %v4854_v13 = vadd.f32 %v4853_v36, %v4852_v53 }
 0x398   : > { %v4253_v7 = vadd.f32 1.0, %v5262_v51  ;;  %v4126_v5 = vadd.f32 %v8964_v27, %v4087_v18  ;;  %v3993_v21 = vadd.f32 %v4845_v14, %v4733_v56  ;;  %v4855_v44 = vpop.f32.mrf.mxu0 }
 0x39a   : > { %5265 = vrcp.f32 %v4253_v7  ;;  %v4625_v0 = vmul.f32 -1.442695, %v4126_v5  ;;  %v4088_v37 = vmul.f32 %v8953_v17, %v3993_v21  ;;  %v4856_v52 = vpop.f32.mrf.mxu0 }
 0x39b   : > { %v4857_v31 = vadd.f32 %v4856_v52, %v4855_v44 }
 0x39c   : > { %5267 = vpow2.f32 %v4625_v0  ;;  %v4127_v32 = vadd.f32 %v8964_v27, %v4088_v37  ;;  %v4858_v24 = vpop.f32.mrf.mxu0 }
 0x39e   : > { %v4626_v23 = vmul.f32 -1.442695, %v4127_v32  ;;  %v4859_v57 = vpop.f32.mrf.mxu0 }
 0x3a0   : > { %5269 = vpow2.f32 %v4626_v23 }
 0x3a3   : > { %v4734_v16 = vpop.f32.mrf.mxu1 }
 0x3a4   : > { %v5264_v43 = vpop.eup %5263 }
 0x3a5   : > { %v4348_v1 = vmul.f32 %v5264_v43, %v4124_v34  ;;  %v4735_v12 = vpop.f32.mrf.mxu1 }
 0x3a6   : > { %v4736_v11 = vadd.f32 %v4735_v12, %v4734_v16 }
 0x3a7   : > { %v5266_v49 = vpop.eup %5265  ;;  %4380 = vst [vmem:[%s9024_s16 + $0x50] sm:$0xff] %v4348_v1  ;;  %v4737_v26 = vpop.f32.mrf.mxu1  ;;  %v4860_v1 = vadd.f32 %v4859_v57, %v4858_v24 }
 0x3a8   : > { %v4349_v38 = vmul.f32 %v5266_v49, %v4125_v15  ;;  %v3998_v45 = vadd.f32 %v4848_v58, %v4736_v11  ;;  %v4861_v15 = vpop.f32.mrf.mxu0 }
 0x3a9   : > { %v5268_v20 = vpop.eup %5267  ;;  %v4738_v48 = vpop.f32.mrf.mxu1 }
 0x3aa   : > { %4381 = vst [vmem:[%s9024_s16 + $0x58] sm:$0xff] %v4349_v38  ;;  %v4254_v8 = vadd.f32 1.0, %v5268_v20  ;;  %v4089_v63 = vmul.f32 %v8953_v17, %v3998_v45  ;;  %v4739_v30 = vadd.f32 %v4738_v48, %v4737_v26  ;;  %v4862_v35 = vpop.f32.mrf.mxu0 }
 0x3ab   : > { %v4863_v20 = vadd.f32 %v4862_v35, %v4861_v15 }
 0x3ac   : > { %5271 = vrcp.f32 %v4254_v8  ;;  %v4128_v19 = vadd.f32 %v8964_v27, %v4089_v63  ;;  %v4001_v9 = vadd.f32 %v4851_v33, %v4739_v30  ;;  %v4864_v46 = vpop.f32.mrf.mxu0 }
 0x3ad   : > { %v5270_v54 = vpop.eup %5269 }
 0x3ae   : > { %v4255_v34 = vadd.f32 1.0, %v5270_v54  ;;  %v4627_v3 = vmul.f32 -1.442695, %v4128_v19  ;;  %v4090_v47 = vmul.f32 %v8953_v17, %v4001_v9  ;;  %v4865_v4 = vpop.f32.mrf.mxu0 }
 0x3b0   : > { %5273 = vrcp.f32 %v4255_v34  ;;  %v4129_v59 = vadd.f32 %v8964_v27, %v4090_v47  ;;  %v4867_v0 = vpop.f32.mrf.mxu0 }
 0x3b1   : > { %5275 = vpow2.f32 %v4627_v3 }
 0x3b2   : > { %v4628_v28 = vmul.f32 -1.442695, %v4129_v59  ;;  %v4868_v29 = vpop.f32.mrf.mxu0 }
 0x3b4   : > { %5277 = vpow2.f32 %v4628_v28  ;;  %v9066_v16 = vpop.f32.mrf.mxu0 }
 0x3b6   : > { %v4871_v44 = vpop.f32.mrf.mxu0 }
 0x3b8   : > { %v4873_v52 = vpop.f32.mrf.mxu0 }
 0x3b9   : > { %v5272_v2 = vpop.eup %5271 }
 0x3ba   : > { %v4740_v60 = vpop.f32.mrf.mxu1  ;;  %v4350_v40 = vmul.f32 %v5272_v2, %v4126_v5  ;;  %v4874_v3 = vpop.f32.mrf.mxu0 }
 0x3bc   : > { %v4741_v61 = vpop.f32.mrf.mxu1  ;;  %4382 = vst [vmem:[%s9024_s16 + $0x60] sm:$0xff] %v4350_v40  ;;  %v4876_v24 = vpop.f32.mrf.mxu0 }
 0x3bd   : > { %v4742_v55 = vadd.f32 %v4741_v61, %v4740_v60  ;;  %v5274_v50 = vpop.eup %5273  ;;  %v4866_v60 = vadd.f32 %v4865_v4, %v4864_v46 }
 0x3be   : > { %v4743_v62 = vpop.f32.mrf.mxu1  ;;  %v5276_v6 = vpop.eup %5275  ;;  %v4351_v10 = vmul.f32 %v5274_v50, %v4127_v32 }
 0x3bf   : > { %v4006_v25 = vadd.f32 %v4854_v13, %v4742_v55  ;;  %v4256_v22 = vadd.f32 1.0, %v5276_v6  ;;  %v4877_v57 = vpop.f32.mrf.mxu0 }
 0x3c0   : > { %v4744_v39 = vpop.f32.mrf.mxu1  ;;  %4383 = vst [vmem:[%s9024_s16 + $0x68] sm:$0xff] %v4351_v10 }
 0x3c1   : > { %v4091_v41 = vmul.f32 %v8953_v17, %v4006_v25  ;;  %v4745_v42 = vadd.f32 %v4744_v39, %v4743_v62  ;;  %v5278_v14 = vpop.eup %5277  ;;  %5279 = vrcp.f32 %v4256_v22  ;;  %v4879_v55 = vpop.f32.mrf.mxu0  ;;  %v4869_v25 = vadd.f32 %v4868_v29, %v4867_v0 }
 0x3c2   : > { %v4257_v18 = vadd.f32 1.0, %v5278_v14  ;;  %v4872_v29 = vadd.f32 %v4871_v44, %v9066_v16 }
 0x3c3   : > { %v4130_v56 = vadd.f32 %v8964_v27, %v4091_v41  ;;  %v4009_v51 = vadd.f32 %v4857_v31, %v4745_v42  ;;  %v4880_v41 = vpop.f32.mrf.mxu0 }
 0x3c4   : > { %5281 = vrcp.f32 %v4257_v18 }
 0x3c5   : > { %v4629_v7 = vmul.f32 -1.442695, %v4130_v56  ;;  %v4092_v5 = vmul.f32 %v8953_v17, %v4009_v51  ;;  %v4882_v51 = vpop.f32.mrf.mxu0 }
 0x3c7   : > { %5283 = vpow2.f32 %v4629_v7  ;;  %v4131_v21 = vadd.f32 %v8964_v27, %v4092_v5  ;;  %v4883_v5 = vpop.f32.mrf.mxu0 }
 0x3c9   : > { %v4630_v37 = vmul.f32 -1.442695, %v4131_v21 }
 0x3cb   : > { %5285 = vpow2.f32 %v4630_v37 }
 0x3ce   : > { %v5280_v32 = vpop.eup %5279 }
 0x3cf   : > { %v4746_v23 = vpop.f32.mrf.mxu1  ;;  %v4352_v53 = vmul.f32 %v5280_v32, %v4128_v19  ;;  %v4885_v32 = vpop.f32.mrf.mxu0 }
 0x3d1   : > { %v4747_v43 = vpop.f32.mrf.mxu1  ;;  %v5282_v36 = vpop.eup %5281  ;;  %4384 = vst [vmem:[%s9024_s16 + $0x70] sm:$0xff] %v4352_v53 }
 0x3d2   : > { %v4748_v12 = vadd.f32 %v4747_v43, %v4746_v23  ;;  %v4353_v58 = vmul.f32 %v5282_v36, %v4129_v59 }
 0x3d3   : > { %v4749_v11 = vpop.f32.mrf.mxu1 }
 0x3d4   : > { %v5284_v49 = vpop.eup %5283  ;;  %v4014_v26 = vadd.f32 %v4860_v1, %v4748_v12  ;;  %4385 = vst [vmem:[%s9024_s16 + $0x78] sm:$0xff] %v4353_v58  ;;  %v4875_v58 = vadd.f32 %v4874_v3, %v4873_v52 }
 0x3d5   : > { %v4258_v38 = vadd.f32 1.0, %v5284_v49  ;;  %v4750_v45 = vpop.f32.mrf.mxu1 }
 0x3d6   : > { %v4093_v48 = vmul.f32 %v8953_v17, %v4014_v26  ;;  %v4751_v33 = vadd.f32 %v4750_v45, %v4749_v11  ;;  %v4886_v11 = vpop.f32.mrf.mxu0 }
 0x3d7   : > { %5287 = vrcp.f32 %v4258_v38 }
 0x3d8   : > { %v5286_v8 = vpop.eup %5285  ;;  %v4132_v63 = vadd.f32 %v8964_v27, %v4093_v48  ;;  %v4017_v30 = vadd.f32 %v4863_v20, %v4751_v33  ;;  %v4878_v33 = vadd.f32 %v4877_v57, %v4876_v24 }
 0x3d9   : > { %v4259_v19 = vadd.f32 1.0, %v5286_v8 }
 0x3da   : > { %v4631_v9 = vmul.f32 -1.442695, %v4132_v63  ;;  %v4094_v54 = vmul.f32 %v8953_v17, %v4017_v30 }
 0x3db   : > { %5289 = vrcp.f32 %v4259_v19 }
 0x3dc   : > { %5291 = vpow2.f32 %v4631_v9  ;;  %v4133_v34 = vadd.f32 %v8964_v27, %v4094_v54 }
 0x3de   : > { %v4632_v47 = vmul.f32 -1.442695, %v4133_v34 }
 0x3e0   : > { %5293 = vpow2.f32 %v4632_v47 }
 0x3e4   : > { %v5288_v59 = vpop.eup %5287  ;;  %v4752_v28 = vpop.f32.mrf.mxu1 }
 0x3e5   : > { %v4354_v15 = vmul.f32 %v5288_v59, %v4130_v56  ;;  %v4881_v59 = vadd.f32 %v4880_v41, %v4879_v55 }
 0x3e6   : > { %v4753_v2 = vpop.f32.mrf.mxu1 }
 0x3e7   : > { %4386 = vst [vmem:[%s9024_s16 + $0x80] sm:$0xff] %v4354_v15  ;;  %v4754_v40 = vadd.f32 %v4753_v2, %v4752_v28 }
 0x3e8   : > { %v5290_v61 = vpop.eup %5289  ;;  %v4755_v13 = vpop.f32.mrf.mxu1 }
 0x3e9   : > { %v5292_v35 = vpop.eup %5291  ;;  %v4355_v50 = vmul.f32 %v5290_v61, %v4131_v21  ;;  %v4022_v62 = vadd.f32 %v4866_v60, %v4754_v40 }
 0x3ea   : > { %v4260_v6 = vadd.f32 1.0, %v5292_v35  ;;  %v4756_v10 = vpop.f32.mrf.mxu1 }
 0x3eb   : > { %4387 = vst [vmem:[%s9024_s16 + $0x88] sm:$0xff] %v4355_v50  ;;  %v4095_v22 = vmul.f32 %v8953_v17, %v4022_v62  ;;  %v4757_v39 = vadd.f32 %v4756_v10, %v4755_v13 }
 0x3ec   : > { %5295 = vrcp.f32 %v4260_v6  ;;  %v4884_v6 = vadd.f32 %v4883_v5, %v4882_v51 }
 0x3ed   : > { %v5294_v31 = vpop.eup %5293  ;;  %v9078_v46 = vadd.f32 %v8964_v27, %v4095_v22  ;;  %v4025_v42 = vadd.f32 %v4869_v25, %v4757_v39 }
 0x3ee   : > { %v4261_v14 = vadd.f32 1.0, %v5294_v31 }
 0x3ef   : > { %v4633_v18 = vmul.f32 -1.442695, %v9078_v46  ;;  %v4096_v56 = vmul.f32 %v8953_v17, %v4025_v42 }
 0x3f0   : > { %5297 = vrcp.f32 %v4261_v14 }
 0x3f1   : > { %5299 = vpow2.f32 %v4633_v18  ;;  %v9083_v4 = vadd.f32 %v8964_v27, %v4096_v56  ;;  %v4887_v56 = vadd.f32 %v4886_v11, %v4885_v32 }
 0x3f3   : > { %v4634_v7 = vmul.f32 -1.442695, %v9083_v4 }
 0x3f5   : > { %5301 = vpow2.f32 %v4634_v7 }
 0x3f6   : > { %v4758_v21 = vpop.f32.mrf.mxu1 }
 0x3f8   : > { %v4759_v0 = vpop.f32.mrf.mxu1 }
 0x3f9   : > { %v5296_v37 = vpop.eup %5295  ;;  %v4760_v23 = vadd.f32 %v4759_v0, %v4758_v21 }
 0x3fa   : > { %v4356_v53 = vmul.f32 %v5296_v37, %v4132_v63  ;;  %v4761_v43 = vpop.f32.mrf.mxu1  ;;  %v4888_v63 = vpop.f32.mrf.mxu0 }
 0x3fb   : > { %v4030_v36 = vadd.f32 %v4872_v29, %v4760_v23 }
 0x3fc   : > { %4388 = vst [vmem:[%s9024_s16 + $0x90] sm:$0xff] %v4356_v53  ;;  %v4762_v1 = vpop.f32.mrf.mxu1  ;;  %v4889_v24 = vpop.f32.mrf.mxu0 }
 0x3fd   : > { %v5298_v12 = vpop.eup %5297  ;;  %v4097_v49 = vmul.f32 %v8953_v17, %v4030_v36  ;;  %v4763_v26 = vadd.f32 %v4762_v1, %v4761_v43  ;;  %v4890_v43 = vadd.f32 %v4889_v24, %v4888_v63 }
 0x3fe   : > { %v5300_v38 = vpop.eup %5299  ;;  %v4357_v45 = vmul.f32 %v5298_v12, %v4133_v34  ;;  %v4764_v20 = vpop.f32.mrf.mxu1 }
 0x3ff   : > { %v4262_v48 = vadd.f32 1.0, %v5300_v38  ;;  %v9090_v16 = vadd.f32 %v8964_v27, %v4097_v49  ;;  %v4033_v44 = vadd.f32 %v4875_v58, %v4763_v26  ;;  %v4891_v61 = vpop.f32.mrf.mxu0 }
 0x400   : > { %4389 = vst [vmem:[%s9024_s16 + $0x98] sm:$0xff] %v4357_v45  ;;  %v4765_v8 = vpop.f32.mrf.mxu1 }
 0x401   : > { %5303 = vrcp.f32 %v4262_v48  ;;  %v4635_v30 = vmul.f32 -1.442695, %v9090_v16  ;;  %v4098_v52 = vmul.f32 %v8953_v17, %v4033_v44  ;;  %v4766_v19 = vadd.f32 %v4765_v8, %v4764_v20  ;;  %v4892_v10 = vpop.f32.mrf.mxu0 }
 0x402   : > { %v5302_v9 = vpop.eup %5301  ;;  %v4767_v54 = vpop.f32.mrf.mxu1  ;;  %v4893_v45 = vadd.f32 %v4892_v10, %v4891_v61 }
 0x403   : > { %v4263_v3 = vadd.f32 1.0, %v5302_v9  ;;  %5305 = vpow2.f32 %v4635_v30  ;;  %v9096_v34 = vadd.f32 %v8964_v27, %v4098_v52  ;;  %v4038_v47 = vadd.f32 %v4878_v33, %v4766_v19  ;;  %v4894_v7 = vpop.f32.mrf.mxu0 }
 0x404   : > { %v4768_v28 = vpop.f32.mrf.mxu1 }
 0x405   : > { %5307 = vrcp.f32 %v4263_v3  ;;  %v4636_v57 = vmul.f32 -1.442695, %v9096_v34  ;;  %v4099_v15 = vmul.f32 %v8953_v17, %v4038_v47  ;;  %v4769_v2 = vadd.f32 %v4768_v28, %v4767_v54  ;;  %v4895_v32 = vpop.f32.mrf.mxu0 }
 0x406   : > { %v4896_v54 = vadd.f32 %v4895_v32, %v4894_v7 }
 0x407   : > { %5309 = vpow2.f32 %v4636_v57  ;;  %v9101_v60 = vadd.f32 %v8964_v27, %v4099_v15  ;;  %v4041_v40 = vadd.f32 %v4881_v59, %v4769_v2  ;;  %v4897_v48 = vpop.f32.mrf.mxu0 }
 0x409   : > { %v4637_v13 = vmul.f32 -1.442695, %v9101_v60  ;;  %v4100_v35 = vmul.f32 %v8953_v17, %v4041_v40  ;;  %v4898_v47 = vpop.f32.mrf.mxu0 }
 0x40a   : > { %v4770_v50 = vpop.f32.mrf.mxu1 }
 0x40b   : > { %5311 = vpow2.f32 %v4637_v13  ;;  %v9106_v55 = vadd.f32 %v8964_v27, %v4100_v35  ;;  %v4899_v13 = vadd.f32 %v4898_v47, %v4897_v48 }
 0x40c   : > { %v4771_v62 = vpop.f32.mrf.mxu1 }
 0x40d   : > { %v4638_v25 = vmul.f32 -1.442695, %v9106_v55  ;;  %v4772_v22 = vadd.f32 %v4771_v62, %v4770_v50 }
 0x40e   : > { %v5304_v39 = vpop.eup %5303  ;;  %v4773_v31 = vpop.f32.mrf.mxu1 }
 0x40f   : > { %v4358_v41 = vmul.f32 %v5304_v39, %v9078_v46  ;;  %5313 = vpow2.f32 %v4638_v25  ;;  %v4046_v42 = vadd.f32 %v4884_v6, %v4772_v22 }
 0x410   : > { %v5306_v14 = vpop.eup %5305  ;;  %v4774_v18 = vpop.f32.mrf.mxu1 }
 0x411   : > { %4390 = vst [vmem:[%s9024_s16 + $0xa0] sm:$0xff] %v4358_v41  ;;  %v4264_v21 = vadd.f32 1.0, %v5306_v14  ;;  %v4101_v0 = vmul.f32 %v8953_v17, %v4046_v42  ;;  %v4775_v51 = vadd.f32 %v4774_v18, %v4773_v31 }
 0x412   : > { %v5308_v5 = vpop.eup %5307  ;;  %v4776_v37 = vpop.f32.mrf.mxu1 }
 0x413   : > { %v4359_v29 = vmul.f32 %v5308_v5, %v9083_v4  ;;  %5315 = vrcp.f32 %v4264_v21  ;;  %v9114_v23 = vadd.f32 %v8964_v27, %v4101_v0  ;;  %v4049_v46 = vadd.f32 %v4887_v56, %v4775_v51 }
 0x414   : > { %v5310_v53 = vpop.eup %5309  ;;  %v4777_v36 = vpop.f32.mrf.mxu1 }
 0x415   : > { %4391 = vst [vmem:[%s9024_s16 + $0xa8] sm:$0xff] %v4359_v29  ;;  %v4265_v1 = vadd.f32 1.0, %v5310_v53  ;;  %v4639_v12 = vmul.f32 -1.442695, %v9114_v23  ;;  %v4102_v58 = vmul.f32 %v8953_v17, %v4049_v46  ;;  %v4778_v11 = vadd.f32 %v4777_v36, %v4776_v37 }
 0x416   : > { %v4779_v49 = vpop.f32.mrf.mxu1 }
 0x417   : > { %5317 = vrcp.f32 %v4265_v1  ;;  %v9120_v4 = vadd.f32 %v8964_v27, %v4102_v58  ;;  %v4054_v26 = vadd.f32 %v4890_v43, %v4778_v11 }
 0x418   : > { %v5312_v38 = vpop.eup %5311  ;;  %5319 = vpow2.f32 %v4639_v12  ;;  %v4780_v20 = vpop.f32.mrf.mxu1 }
 0x419   : > { %v4266_v44 = vadd.f32 1.0, %v5312_v38  ;;  %v4640_v33 = vmul.f32 -1.442695, %v9120_v4  ;;  %v4103_v8 = vmul.f32 %v8953_v17, %v4054_v26  ;;  %v4781_v63 = vadd.f32 %v4780_v20, %v4779_v49 }
 0x41a   : > { %v4782_v30 = vpop.f32.mrf.mxu1 }
 0x41b   : > { %5321 = vrcp.f32 %v4266_v44  ;;  %v9125_v52 = vadd.f32 %v8964_v27, %v4103_v8  ;;  %v4057_v19 = vadd.f32 %v4893_v45, %v4781_v63 }
 0x41c   : > { %v5314_v9 = vpop.eup %5313  ;;  %5323 = vpow2.f32 %v4640_v33  ;;  %v4783_v3 = vpop.f32.mrf.mxu1 }
 0x41d   : > { %v4267_v59 = vadd.f32 1.0, %v5314_v9  ;;  %v4641_v28 = vmul.f32 -1.442695, %v9125_v52  ;;  %v4104_v24 = vmul.f32 %v8953_v17, %v4057_v19  ;;  %v4784_v57 = vadd.f32 %v4783_v3, %v4782_v30 }
 0x41e   : > { %v4785_v15 = vpop.f32.mrf.mxu1 }
 0x41f   : > { %5325 = vrcp.f32 %v4267_v59  ;;  %v4143_v2 = vadd.f32 %v8964_v27, %v4104_v24  ;;  %v4062_v40 = vadd.f32 %v4896_v54, %v4784_v57 }
 0x420   : > { %v5316_v61 = vpop.eup %5315  ;;  %5327 = vpow2.f32 %v4641_v28  ;;  %v4786_v35 = vpop.f32.mrf.mxu1 }
 0x421   : > { %v4360_v50 = vmul.f32 %v5316_v61, %v9090_v16  ;;  %v4642_v62 = vmul.f32 -1.442695, %v4143_v2  ;;  %v4105_v6 = vmul.f32 %v8953_v17, %v4062_v40  ;;  %v4787_v10 = vadd.f32 %v4786_v35, %v4785_v15 }
 0x423   : > { %4392 = vst [vmem:[%s9024_s16 + $0xb0] sm:$0xff] %v4360_v50  ;;  %5329 = vpow2.f32 %v4642_v62  ;;  %v4144_v25 = vadd.f32 %v8964_v27, %v4105_v6  ;;  %v4065_v22 = vadd.f32 %v4899_v13, %v4787_v10 }
 0x424   : > { %v5318_v39 = vpop.eup %5317 }
 0x425   : > { %v5320_v31 = vpop.eup %5319  ;;  %v4361_v41 = vmul.f32 %v5318_v39, %v9096_v34  ;;  %v4643_v42 = vmul.f32 -1.442695, %v4144_v25  ;;  %v4106_v14 = vmul.f32 %v8953_v17, %v4065_v22 }
 0x426   : > { %v4268_v18 = vadd.f32 1.0, %v5320_v31 }
 0x427   : > { %4393 = vst [vmem:[%s9024_s16 + $0xb8] sm:$0xff] %v4361_v41  ;;  %5331 = vpow2.f32 %v4643_v42  ;;  %v4145_v16 = vadd.f32 %v8964_v27, %v4106_v14 }
 0x428   : > { %v5322_v56 = vpop.eup %5321  ;;  %5333 = vrcp.f32 %v4268_v18 }
 0x429   : > { %v5324_v7 = vpop.eup %5323  ;;  %v4362_v21 = vmul.f32 %v5322_v56, %v9101_v60  ;;  %v4644_v0 = vmul.f32 -1.442695, %v4145_v16 }
 0x42a   : > { %v4269_v51 = vadd.f32 1.0, %v5324_v7 }
 0x42b   : > { %4394 = vst [vmem:[%s9024_s16 + $0xc0] sm:$0xff] %v4362_v21  ;;  %5335 = vpow2.f32 %v4644_v0 }
 0x42c   : > { %v5326_v5 = vpop.eup %5325  ;;  %5337 = vrcp.f32 %v4269_v51 }
 0x42d   : > { %v5328_v34 = vpop.eup %5327  ;;  %v4363_v17 = vmul.f32 %v5326_v5, %v9106_v55 }
 0x42e   : > { %v4270_v37 = vadd.f32 1.0, %v5328_v34 }
 0x42f   : > { %4395 = vst [vmem:[%s9024_s16 + $0xc8] sm:$0xff] %v4363_v17 }
 0x430   : > { %v5330_v29 = vpop.eup %5329  ;;  %5339 = vrcp.f32 %v4270_v37 }
 0x431   : > { %v4271_v27 = vadd.f32 1.0, %v5330_v29 }
 0x433   : > { %5341 = vrcp.f32 %v4271_v27 }
 0x434   : > { %v5332_v46 = vpop.eup %5331 }
 0x435   : > { %v5334_v60 = vpop.eup %5333  ;;  %v4272_v53 = vadd.f32 1.0, %v5332_v46 }
 0x436   : > { %v4364_v43 = vmul.f32 %v5334_v60, %v9114_v23 }
 0x437   : > { %5343 = vrcp.f32 %v4272_v53 }
 0x438   : > { %v5336_v36 = vpop.eup %5335  ;;  %4396 = vst [vmem:[%s9024_s16 + $0xd0] sm:$0xff] %v4364_v43 }
 0x439   : > { %v5338_v55 = vpop.eup %5337  ;;  %v4273_v32 = vadd.f32 1.0, %v5336_v36 }
 0x43a   : > { %v4365_v1 = vmul.f32 %v5338_v55, %v9120_v4 }
 0x43b   : > { %5345 = vrcp.f32 %v4273_v32 }
 0x43c   : > { %4397 = vst [vmem:[%s9024_s16 + $0xd8] sm:$0xff] %v4365_v1 }
 0x43d   : > { %v5340_v12 = vpop.eup %5339 }
 0x43e   : > { %v4366_v58 = vmul.f32 %v5340_v12, %v9125_v52 }
 0x440   : > { %v5342_v11 = vpop.eup %5341  ;;  %4398 = vst [vmem:[%s9024_s16 + $0xe0] sm:$0xff] %v4366_v58 }
 0x441   : > { %v4367_v23 = vmul.f32 %v5342_v11, %v4143_v2 }
 0x443   : > { %4399 = vst [vmem:[%s9024_s16 + $0xe8] sm:$0xff] %v4367_v23 }
 0x444   : > { %v5344_v49 = vpop.eup %5343 }
 0x445   : > { %v4368_v26 = vmul.f32 %v5344_v49, %v4144_v25 }
 0x447   : > { %4400 = vst [vmem:[%s9024_s16 + $0xf0] sm:$0xff] %v4368_v26 }
 0x448   : > { %v5346_v38 = vpop.eup %5345 }
 0x449   : > { %v4369_v4 = vmul.f32 %v5346_v38, %v4145_v16 }
 0x44b   : > { %4401 = vst [vmem:[%s9024_s16 + $0xf8] sm:$0xff] %v4369_v4 }
 0x44c   : > { %5440 = shalt.err (!%p5437_p3)
}
 0x44d   : > { %s5441_s29 = scalar_lea.hbm %s9155_s30, 4096  ;;  %s5445_s14 = scalar_lea.hbm %s9208_s7, 8192 }
 0x44e   : > { %p5442_p11 = scmp.ne.s32.totalorder %s9155_s30, %s5441_s29  ;;  %p5446_p4 = scmp.lt.s32.totalorder %s9155_s30, %s9208_s7 }
 0x44f   : > { %p5447_p6 = scmp.lt.s32.totalorder %s5445_s14, %s5441_s29 }
 0x450   : > { %p5443_p9 = pnand %p5442_p11, %p9477_p2 }
 0x451   : > { %p5448_p8 = por %p5447_p6, %p5446_p4 }
 0x452   : > { %p5444_p1 = pneg %p5443_p9 }
 0x454   : > { %p5449_p5 = pnand %p5448_p8, %p5444_p1 }
 0x456   : > { %5452 = shalt.err (!%p5449_p5)
}
 0x457   : > { %s5503_s15 = smov 128   ;;  %s5504_s19 = smov 8  }
 0x458   : > { %4974 = dma.vmem_to_hbm [thread:$0]  (%p9477_p2), %s9157_s1, 4096, %s9155_s30, %s4403_s9, %s5503_s15, %s5503_s15, %s5504_s19  }
 0x459 PF: > { %s4431_s20 = sand.u32 1, %s5483_s24   ;;  %p9478_p7 = scmp.ne.s32.totalorder %s9266_s8, 0 }
 0x45a   : > { %p9479_p12 = scmp.ge.s32.totalorder %s5495_s27, 2  ;;  %s4432_s28 = scalar_lea.sflag [#allocation5], %s4431_s20 }
 0x45c   : > { %p4988_p13 = pnand %p9479_p12, %p9478_p7 }
 0x45e   : > { %p4989_p0 = pneg %p4988_p13 }
 0x460   : > { %5478 = dma.done.wait (%p4989_p0), %s4432_s28, 4096  }
 0x461   : > { %5480 = vsyncadd (%p4989_p0), %s4432_s28, 4294963200  ;;  %p21_p10 = scmp.ge.s32.totalorder %s5623_s23, 4   ;;  %s9480_s24 = smov %s5487_s25 }
 0x462   : > { %s9481_s25 = smov %s5491_s26  ;;  %s9482_s26 = smov %s5639_s12 }
 0x463   : > { %s9483_s27 = smov %s5623_s23  ;;  %23 = sbr.rel (!%p21_p10) target bundleno = 8 (0x8), region = 106 }
 0x468   :  { %4437 = vsyncpa [#allocation4], 1 }
 0x469   :  { %4439 = vsyncpa [#allocation4 + $0x1], 1 }
 0x46a   :  { %4440 = vsyncpa [#allocation7], 1 }
 0x46b   :  { %4441 = vsyncpa [#allocation5], 1 }
 0x46c   :  { %4443 = vsyncpa [#allocation5 + $0x1], 1 }

</bundles_post_ra>
